<compile_context>
chip_gen: v6e
topology: v6e:2x2x1
jax: 0.10.0
libtpu: 0.0.40
codegen_flags: <defaults>
</compile_context>

<pallas_src>
import jax
import jax.numpy as jnp
from jax import lax
from jax.experimental import pallas as pl
from jax.experimental.pallas import tpu as pltpu

VMEM_LIMIT_BYTES = 40 * 1024 * 1024  # fits the 64 MiB physical VMEM of v7x


def _round_up(v, m):
    return ((v + m - 1) // m) * m


def _pad_axes(a, target_shape):
    pads = [(0, t - s) for s, t in zip(a.shape, target_shape)]
    return jnp.pad(a, pads)


# ---------------- kernel 1a: per-snapshot node projection + dst scores ----------
def _proj_kernel(x_ref, w_ref, adst_ref, h_ref, e_ref):
    x = x_ref[0]                                                # (TN, Fin) bf16
    h = jnp.dot(x, w_ref[...], preferred_element_type=jnp.float32)   # (TN, Fs_p) f32
    # e_dst per node in LANE-major form: (8, TN) = a_dst_pad (8, Fs_p) . h^T
    e = lax.dot_general(adst_ref[...], h, (((1,), (1,)), ((), ())),
                        preferred_element_type=jnp.float32)    # (8, TN) f32
    h_ref[0] = h.astype(h_ref.dtype)                            # bf16 writeback
    e_ref[0] = e


# ---------------- kernel 1b: structural GAT aggregation (one t x one row tile) --
def _gat_agg_kernel(h_ref, ed_ref, adj_ref, a_ref, o_ref):
    tn = o_ref.shape[1]
    row0 = pl.multiple_of(pl.program_id(1) * tn, tn)
    h_all = h_ref[0]                                            # (N_p, Fs_p) bf16
    h_q = h_ref[0, pl.ds(row0, tn), :]                          # (TN, Fs_p)  bf16
    a_src = a_ref[0:1, :]                                       # (1, Fs_p)   f32
    # e[i, j] = LeakyReLU(a_src . h_i + a_dst . h_j); a_dst . h_j precomputed (1a)
    e_src = jnp.sum(h_q.astype(jnp.float32) * a_src, axis=-1, keepdims=True)  # (TN,1)
    e_dst = ed_ref[0, 0:1, :]                                   # (1, N_p) f32
    e = e_src + e_dst                                           # (TN, N_p)
    e = jnp.maximum(e, 0.2 * e)                                 # LeakyReLU(0.2), one vmax
    e = jnp.where(adj_ref[0].astype(jnp.int32) > 0, e, -1e30)   # mask non-edges
    e = e - jnp.max(e, axis=-1, keepdims=True)
    p = jnp.exp(e)                                              # masked entries -> 0
    # normalize AFTER the aggregation matmul (saves a (TN, N_p) VPU multiply)
    agg_un = jnp.dot(p.astype(jnp.bfloat16), h_all,
                     preferred_element_type=jnp.float32)        # (TN, Fs_p)
    denom = jnp.maximum(jnp.sum(p, axis=-1, keepdims=True), 1e-9)
    agg = agg_un * pl.reciprocal(denom, approx=True)
    out = jnp.where(agg > 0, agg, jnp.exp(jnp.minimum(agg, 0.0)) - 1.0)   # ELU
    o_ref[0] = out.astype(o_ref.dtype)


# ---------------- kernel 2: temporal (causal) self-attention, last step only ----
def _make_temporal_kernel(t_steps, scale):
    def kernel(s_ref, pos_ref, wq_ref, wkv_ref, wo_ref, gate_ref, o_ref):
        fp = wq_ref.shape[1]                                    # padded feature dim
        tn = s_ref.shape[1]
        x_last = (s_ref[t_steps - 1].astype(jnp.float32)
                  + pos_ref[t_steps - 1:t_steps, :])            # (TN, Fp) f32
        q = jnp.dot(x_last.astype(jnp.bfloat16), wq_ref[...],
                    preferred_element_type=jnp.float32)         # (TN, Fp)

        m0 = jnp.full((tn, 1), -1e30, jnp.float32)
        d0 = jnp.zeros((tn, 1), jnp.float32)
        a0 = jnp.zeros((tn, fp), jnp.float32)

        # online (flash-style) accumulation — only (m, denom, acc) stay live
        def body(t, carry):
            m, d, acc = carry
            x_t = s_ref[t].astype(jnp.float32) + pos_ref[pl.ds(t, 1), :]
            kv = jnp.dot(x_t.astype(jnp.bfloat16), wkv_ref[...],
                         preferred_element_type=jnp.float32)    # (TN, 2*Fp)
            k = kv[:, :fp]
            v = kv[:, fp:]
            sc = jnp.sum(q * k, axis=-1, keepdims=True) * scale  # (TN, 1)
            m_new = jnp.maximum(m, sc)
            corr = jnp.exp(m - m_new)
            p = jnp.exp(sc - m_new)
            return m_new, corr * d + p, corr * acc + p * v

        _, d, acc = lax.fori_loop(0, t_steps, body, (m0, d0, a0), unroll=True)
        attn = acc * pl.reciprocal(d, approx=True)               # (TN, Fp)
        ff = jnp.dot(attn.astype(jnp.bfloat16), wo_ref[...],
                     preferred_element_type=jnp.float32)
        g = gate_ref[0, 0]                                       # SMEM scalar
        o_ref[...] = (g * ff + x_last).astype(o_ref.dtype)
    return kernel


# ---------------- kernel 3: fused gather + edge Hadamard + MLP classifier -------
def _classifier_kernel(nids_ref, emb_ref, w1_ref, b1_ref, w2_ref, b2_ref, o_ref):
    ids = nids_ref[...]                                         # (TE, 2) int32
    te = ids.shape[0]
    n_nodes = emb_ref.shape[0]
    # one-hot MXU gather keeps the row gather in-kernel (fine for moderate N)
    iota_n = lax.broadcasted_iota(jnp.int32, (te, n_nodes), 1)
    src_oh = (ids[:, 0:1] == iota_n).astype(jnp.bfloat16)
    tgt_oh = (ids[:, 1:2] == iota_n).astype(jnp.bfloat16)
    embb = emb_ref[...]                                         # (N_p, Fs_p) bf16
    src = jnp.dot(src_oh, embb, preferred_element_type=jnp.float32)
    tgt = jnp.dot(tgt_oh, embb, preferred_element_type=jnp.float32)
    x = (src * tgt).astype(jnp.bfloat16)                        # source_emb * target_emb
    h = jnp.dot(x, w1_ref[...], preferred_element_type=jnp.float32) + b1_ref[...]
    h = jnp.maximum(h, 0.0)                                     # ReLU
    o_ref[...] = jnp.dot(h.astype(jnp.bfloat16), w2_ref[...],
                         preferred_element_type=jnp.float32) + b2_ref[...]


# ----------------------------------- wrapper ------------------------------------
def dgnn_forward(params, x, adj, nids, gate):
    T, N, Fin = x.shape
    E = nids.shape[0]
    Fs = params["w_struct"].shape[1]
    H = params["w1"].shape[1]
    C = params["w2"].shape[1]

    LANE = 128
    f32, bf16 = jnp.float32, jnp.bfloat16
    Fs_p = _round_up(Fs, LANE)
    H_p = _round_up(H, LANE)
    C_p = _round_up(C, LANE)
    # 256-row tiles fill the 256-wide MXU on v6e/v7x; 128 for small N / v5e.
    TN = 256 if N >= 512 else 128
    N_p = _round_up(N, TN)
    NT = N_p // TN
    TE = 512 if E > 512 else _round_up(E, 8)
    E_p = _round_up(E, TE)

    # ---- pad / cast parameters and inputs (zero padding keeps math identical) ----
    x_p = _pad_axes(x, (T, N_p, Fin)).astype(bf16)
    adj_p = _pad_axes((adj > 0).astype(jnp.int8), (T, N_p, N_p))        # int8 mask
    w_struct_p = _pad_axes(params["w_struct"], (Fin, Fs_p)).astype(bf16)
    a_struct_p = _pad_axes(params["a_struct"], (2, Fs_p)).astype(f32)
    a_dst_pad = jnp.zeros((8, Fs_p), f32).at[0].set(a_struct_p[1])       # row 0 = a_dst
    pos_p = _pad_axes(params["pos"], (T, Fs_p)).astype(f32)
    wq_p = _pad_axes(params["wq"], (Fs_p, Fs_p)).astype(bf16)
    wkv_p = jnp.concatenate(
        [_pad_axes(params["wk"], (Fs_p, Fs_p)),
         _pad_axes(params["wv"], (Fs_p, Fs_p))], axis=1).astype(bf16)    # (Fs_p, 2*Fs_p)
    wo_p = _pad_axes(params["wo"], (Fs_p, Fs_p)).astype(bf16)
    w1_p = _pad_axes(params["w1"], (Fs_p, H_p)).astype(bf16)
    b1_p = _pad_axes(params["b1"], (1, H_p)).astype(f32)
    w2_p = _pad_axes(params["w2"], (H_p, C_p)).astype(bf16)
    b2_p = _pad_axes(params["b2"], (1, C_p)).astype(f32)
    nids_p = _pad_axes(nids.astype(jnp.int32), (E_p, 2))
    gate2 = jnp.asarray(gate, f32).reshape(1, 1)

    cp = pltpu.CompilerParams  # shorthand

    # ---- 1a) per-snapshot projection h_all = x @ W and dst attention scores -----
    h_all, e_dst_all = pl.pallas_call(
        _proj_kernel,
        out_shape=(jax.ShapeDtypeStruct((T, N_p, Fs_p), bf16),
                   jax.ShapeDtypeStruct((T, 8, N_p), f32)),
        grid=(T, NT),
        in_specs=[
            pl.BlockSpec((1, TN, Fin), lambda t, i: (t, i, 0)),
            pl.BlockSpec((Fin, Fs_p), lambda t, i: (0, 0)),
            pl.BlockSpec((8, Fs_p), lambda t, i: (0, 0)),
        ],
        out_specs=[
            pl.BlockSpec((1, TN, Fs_p), lambda t, i: (t, i, 0)),
            pl.BlockSpec((1, 8, TN), lambda t, i: (t, 0, i)),
        ],
        compiler_params=cp(dimension_semantics=("parallel", "parallel"),
                           vmem_limit_bytes=VMEM_LIMIT_BYTES),
    )(x_p, w_struct_p, a_dst_pad)

    # ---- 1b) structural GAT aggregation, grid = (time, node-row tiles) ----------
    struct_out = pl.pallas_call(
        _gat_agg_kernel,
        out_shape=jax.ShapeDtypeStruct((T, N_p, Fs_p), bf16),
        grid=(T, NT),
        in_specs=[
            pl.BlockSpec((1, N_p, Fs_p), lambda t, i: (t, 0, 0)),  # resident per t
            pl.BlockSpec((1, 8, N_p), lambda t, i: (t, 0, 0)),     # dst scores per t
            pl.BlockSpec((1, TN, N_p), lambda t, i: (t, i, 0)),    # int8 adjacency tile
            pl.BlockSpec((2, Fs_p), lambda t, i: (0, 0)),
        ],
        out_specs=pl.BlockSpec((1, TN, Fs_p), lambda t, i: (t, i, 0)),
        compiler_params=cp(dimension_semantics=("parallel", "parallel"),
                           vmem_limit_bytes=VMEM_LIMIT_BYTES),
    )(h_all, e_dst_all, adj_p, a_struct_p)

    # ---- 2) temporal attention, grid over node tiles; only last step is consumed
    emb = pl.pallas_call(
        _make_temporal_kernel(T, float(Fs) ** -0.5),
        out_shape=jax.ShapeDtypeStruct((N_p, Fs_p), bf16),
        grid=(NT,),
        in_specs=[
            pl.BlockSpec((T, TN, Fs_p), lambda i: (0, i, 0)),   # time-major, no transpose
            pl.BlockSpec((T, Fs_p), lambda i: (0, 0)),
            pl.BlockSpec((Fs_p, Fs_p), lambda i: (0, 0)),
            pl.BlockSpec((Fs_p, 2 * Fs_p), lambda i: (0, 0)),
            pl.BlockSpec((Fs_p, Fs_p), lambda i: (0, 0)),
            pl.BlockSpec(memory_space=pltpu.MemorySpace.SMEM),  # gate scalar
        ],
        out_specs=pl.BlockSpec((TN, Fs_p), lambda i: (i, 0)),
        compiler_params=cp(dimension_semantics=("parallel",),
                           vmem_limit_bytes=VMEM_LIMIT_BYTES),
    )(struct_out, pos_p, wq_p, wkv_p, wo_p, gate2)

    # ---- 3) edge classifier, grid over edge tiles, gather fused in kernel -------
    logits_p = pl.pallas_call(
        _classifier_kernel,
        out_shape=jax.ShapeDtypeStruct((E_p, C_p), f32),
        grid=(E_p // TE,),
        in_specs=[
            pl.BlockSpec((TE, 2), lambda e: (e, 0)),
            pl.BlockSpec((N_p, Fs_p), lambda e: (0, 0)),
            pl.BlockSpec((Fs_p, H_p), lambda e: (0, 0)),
            pl.BlockSpec((1, H_p), lambda e: (0, 0)),
            pl.BlockSpec((H_p, C_p), lambda e: (0, 0)),
            pl.BlockSpec((1, C_p), lambda e: (0, 0)),
        ],
        out_specs=pl.BlockSpec((TE, C_p), lambda e: (e, 0)),
        compiler_params=cp(dimension_semantics=("parallel",),
                           vmem_limit_bytes=VMEM_LIMIT_BYTES),
    )(nids_p, emb, w1_p, b1_p, w2_p, b2_p)

    return logits_p[:E, :C]


def init_params(key, fin, fs, hid, ncls, t_steps):
    ks = jax.random.split(key, 9)
    sc = 0.1
    return {
        "w_struct": sc * jax.random.normal(ks[0], (fin, fs), jnp.float32),
        "a_struct": sc * jax.random.normal(ks[1], (2, fs), jnp.float32),
        "pos": sc * jax.random.normal(ks[2], (t_steps, fs), jnp.float32),
        "wq": sc * jax.random.normal(ks[3], (fs, fs), jnp.float32),
        "wk": sc * jax.random.normal(ks[4], (fs, fs), jnp.float32),
        "wv": sc * jax.random.normal(ks[5], (fs, fs), jnp.float32),
        "wo": sc * jax.random.normal(ks[6], (fs, fs), jnp.float32),
        "w1": sc * jax.random.normal(ks[7], (fs, hid), jnp.float32),
        "b1": jnp.zeros((1, hid), jnp.float32),
        "w2": sc * jax.random.normal(ks[8], (hid, ncls), jnp.float32),
        "b2": jnp.zeros((1, ncls), jnp.float32),
    }


if __name__ == "__main__":
    T, N, Fin, Fs, H, C, E = 4, 32, 8, 16, 32, 2, 16
    key = jax.random.PRNGKey(0)
    k_x, k_adj, k_nid, k_p = jax.random.split(key, 4)

    x = jax.random.normal(k_x, (T, N, Fin), jnp.float32)
    a = (jax.random.uniform(k_adj, (T, N, N)) < 0.25).astype(jnp.float32)
    adj = jnp.clip(a + jnp.transpose(a, (0, 2, 1)) + jnp.eye(N, dtype=jnp.float32)[None],
                   0.0, 1.0)
    nids = jax.random.randint(k_nid, (E, 2), 0, N, dtype=jnp.int32)
    gate = jnp.float32(1.0)
    params = init_params(k_p, Fin, Fs, H, C, T)

    fwd = jax.jit(dgnn_forward)
    out = fwd(params, x, adj, nids, gate)
    jax.block_until_ready(out)
    assert out.shape == (E, C) and out.dtype == jnp.float32
    assert bool(jnp.all(jnp.isfinite(out)))
    print("KERNEL_OK")
</pallas_src>

<mosaic_0001>
module attributes {stable_mosaic.version = 11 : i64} {
  func.func @_proj_kernel(%arg0: i32, %arg1: i32, %arg2: memref<1x128x8xbf16, #tpu.memory_space<vmem>>, %arg3: memref<8x128xbf16, #tpu.memory_space<vmem>>, %arg4: memref<8x128xf32, #tpu.memory_space<vmem>>, %arg5: memref<1x128x128xbf16, #tpu.memory_space<vmem>>, %arg6: memref<1x8x128xf32, #tpu.memory_space<vmem>>) attributes {dimension_semantics = [#tpu.dimension_semantics<parallel>, #tpu.dimension_semantics<parallel>], iteration_bounds = array<i64: 4, 1>, scalar_prefetch = 0 : i64, scratch_operands = 0 : i64, tpu.core_type = #tpu.core_type<tc>, window_params = [{transform_indices = @transform_0, window_bounds = array<i64: 1, 128, 8>}, {pipeline_mode = #tpu.pipeline_mode<synchronous>, transform_indices = @transform_1, window_bounds = array<i64: 8, 128>}, {pipeline_mode = #tpu.pipeline_mode<synchronous>, transform_indices = @transform_2, window_bounds = array<i64: 8, 128>}, {transform_indices = @transform_3, window_bounds = array<i64: 1, 128, 128>}, {transform_indices = @transform_4, window_bounds = array<i64: 1, 8, 128>}]} {
    %c0 = arith.constant 0 : index
    %c0_0 = arith.constant 0 : index
    %c0_1 = arith.constant 0 : index
    %0 = vector.load %arg2[%c0, %c0_0, %c0_1] : memref<1x128x8xbf16, #tpu.memory_space<vmem>>, vector<1x128x8xbf16>
    %1 = vector.shape_cast %0 : vector<1x128x8xbf16> to vector<128x8xbf16>
    %c0_2 = arith.constant 0 : index
    %c0_3 = arith.constant 0 : index
    %2 = vector.load %arg3[%c0_2, %c0_3] : memref<8x128xbf16, #tpu.memory_space<vmem>>, vector<8x128xbf16>
    %cst = arith.constant dense<0.000000e+00> : vector<128x128xf32>
    %3 = tpu.matmul %1, %2, %cst {dimension_numbers = #tpu.dot_dimension_numbers<[1], [0], [0], [1], [0, 0, 1, 1], [], []>} : vector<128x8xbf16>, vector<8x128xbf16>, vector<128x128xf32> -> vector<128x128xf32>
    %c0_4 = arith.constant 0 : index
    %c0_5 = arith.constant 0 : index
    %4 = vector.load %arg4[%c0_4, %c0_5] : memref<8x128xf32, #tpu.memory_space<vmem>>, vector<8x128xf32>
    %cst_6 = arith.constant dense<0.000000e+00> : vector<8x128xf32>
    %5 = tpu.matmul %4, %3, %cst_6 {dimension_numbers = #tpu.dot_dimension_numbers<[1], [1], [0], [0], [0, 0, 1, 0], [], []>} : vector<8x128xf32>, vector<128x128xf32>, vector<8x128xf32> -> vector<8x128xf32>
    %6 = arith.truncf %3 : vector<128x128xf32> to vector<128x128xbf16>
    %c0_7 = arith.constant 0 : index
    %c0_8 = arith.constant 0 : index
    %c0_9 = arith.constant 0 : index
    %7 = vector.load %arg5[%c0_7, %c0_8, %c0_9] : memref<1x128x128xbf16, #tpu.memory_space<vmem>>, vector<1x128x128xbf16>
    %8 = vector.shape_cast %7 : vector<1x128x128xbf16> to vector<128x128xbf16>
    %9 = vector.shape_cast %6 : vector<128x128xbf16> to vector<1x128x128xbf16>
    tpu.vector_store %arg5[%c0_7, %c0_8, %c0_9], %9 {strides = array<i32>} : memref<1x128x128xbf16, #tpu.memory_space<vmem>>, vector<1x128x128xbf16>,
    %c0_10 = arith.constant 0 : index
    %c0_11 = arith.constant 0 : index
    %c0_12 = arith.constant 0 : index
    %10 = vector.load %arg6[%c0_10, %c0_11, %c0_12] : memref<1x8x128xf32, #tpu.memory_space<vmem>>, vector<1x8x128xf32>
    %11 = vector.shape_cast %10 : vector<1x8x128xf32> to vector<8x128xf32>
    %12 = vector.shape_cast %5 : vector<8x128xf32> to vector<1x8x128xf32>
    tpu.vector_store %arg6[%c0_10, %c0_11, %c0_12], %12 {strides = array<i32>} : memref<1x8x128xf32, #tpu.memory_space<vmem>>, vector<1x8x128xf32>,
    return
  }
  func.func @transform_0(%arg0: i32, %arg1: i32) -> (i32, i32, i32) {
    %c0_i32 = arith.constant 0 : i32
    %c0_i32_0 = arith.constant 0 : i32
    return %arg0, %arg1, %c0_i32 : i32, i32, i32
  }
  func.func @transform_1(%arg0: i32, %arg1: i32) -> (i32, i32) {
    %c0_i32 = arith.constant 0 : i32
    %c0_i32_0 = arith.constant 0 : i32
    %c0_i32_1 = arith.constant 0 : i32
    return %c0_i32, %c0_i32_0 : i32, i32
  }
  func.func @transform_2(%arg0: i32, %arg1: i32) -> (i32, i32) {
    %c0_i32 = arith.constant 0 : i32
    %c0_i32_0 = arith.constant 0 : i32
    %c0_i32_1 = arith.constant 0 : i32
    return %c0_i32, %c0_i32_0 : i32, i32
  }
  func.func @transform_3(%arg0: i32, %arg1: i32) -> (i32, i32, i32) {
    %c0_i32 = arith.constant 0 : i32
    %c0_i32_0 = arith.constant 0 : i32
    return %arg0, %arg1, %c0_i32 : i32, i32, i32
  }
  func.func @transform_4(%arg0: i32, %arg1: i32) -> (i32, i32, i32) {
    %c0_i32 = arith.constant 0 : i32
    %c0_i32_0 = arith.constant 0 : i32
    return %arg0, %c0_i32, %arg1 : i32, i32, i32
  }
}

module attributes {stable_mosaic.version = 11 : i64} {
  func.func @_gat_agg_kernel(%arg0: i32, %arg1: i32, %arg2: memref<1x128x128xbf16, #tpu.memory_space<vmem>>, %arg3: memref<1x8x128xf32, #tpu.memory_space<vmem>>, %arg4: memref<1x128x128xi8, #tpu.memory_space<vmem>>, %arg5: memref<2x128xf32, #tpu.memory_space<vmem>>, %arg6: memref<1x128x128xbf16, #tpu.memory_space<vmem>>) attributes {dimension_semantics = [#tpu.dimension_semantics<parallel>, #tpu.dimension_semantics<parallel>], iteration_bounds = array<i64: 4, 1>, scalar_prefetch = 0 : i64, scratch_operands = 0 : i64, tpu.core_type = #tpu.core_type<tc>, window_params = [{transform_indices = @transform_0, window_bounds = array<i64: 1, 128, 128>}, {transform_indices = @transform_1, window_bounds = array<i64: 1, 8, 128>}, {transform_indices = @transform_2, window_bounds = array<i64: 1, 128, 128>}, {pipeline_mode = #tpu.pipeline_mode<synchronous>, transform_indices = @transform_3, window_bounds = array<i64: 2, 128>}, {transform_indices = @transform_4, window_bounds = array<i64: 1, 128, 128>}]} {
    %c128_i32 = arith.constant 128 : i32
    %0 = arith.muli %arg1, %c128_i32 : i32
    %1 = tpu.assume_multiple %0, 128 : i32
    %c0 = arith.constant 0 : index
    %c0_0 = arith.constant 0 : index
    %c0_1 = arith.constant 0 : index
    %2 = vector.load %arg2[%c0, %c0_0, %c0_1] : memref<1x128x128xbf16, #tpu.memory_space<vmem>>, vector<1x128x128xbf16>
    %3 = vector.shape_cast %2 : vector<1x128x128xbf16> to vector<128x128xbf16>
    %c0_2 = arith.constant 0 : index
    %4 = arith.index_cast %1 : i32 to index
    %c0_3 = arith.constant 0 : index
    %5 = vector.load %arg2[%c0_2, %4, %c0_3] : memref<1x128x128xbf16, #tpu.memory_space<vmem>>, vector<1x128x128xbf16>
    %6 = vector.shape_cast %5 : vector<1x128x128xbf16> to vector<128x128xbf16>
    %c0_4 = arith.constant 0 : index
    %c0_5 = arith.constant 0 : index
    %7 = vector.load %arg5[%c0_4, %c0_5] : memref<2x128xf32, #tpu.memory_space<vmem>>, vector<1x128xf32>
    %8 = arith.extf %6 : vector<128x128xbf16> to vector<128x128xf32>
    %9 = vector.broadcast %7 : vector<1x128xf32> to vector<128x128xf32>
    %10 = arith.mulf %8, %9 : vector<128x128xf32>
    %cst = arith.constant dense<0.000000e+00> : vector<128xf32>
    %11 = vector.multi_reduction <add>, %10, %cst [1] : vector<128x128xf32> to vector<128xf32>
    %12 = vector.shape_cast %11 : vector<128xf32> to vector<128x1xf32>
    %c0_6 = arith.constant 0 : index
    %c0_7 = arith.constant 0 : index
    %c0_8 = arith.constant 0 : index
    %13 = vector.load %arg3[%c0_6, %c0_7, %c0_8] : memref<1x8x128xf32, #tpu.memory_space<vmem>>, vector<1x1x128xf32>
    %14 = vector.shape_cast %13 : vector<1x1x128xf32> to vector<1x128xf32>
    %15 = vector.broadcast %12 : vector<128x1xf32> to vector<128x128xf32>
    %16 = vector.broadcast %14 : vector<1x128xf32> to vector<128x128xf32>
    %17 = arith.addf %15, %16 : vector<128x128xf32>
    %cst_9 = arith.constant 2.000000e-01 : f32
    %18 = vector.broadcast %cst_9 : f32 to vector<128x128xf32>
    %19 = arith.mulf %18, %17 : vector<128x128xf32>
    %20 = arith.maximumf %17, %19 : vector<128x128xf32>
    %c0_10 = arith.constant 0 : index
    %c0_11 = arith.constant 0 : index
    %c0_12 = arith.constant 0 : index
    %21 = vector.load %arg4[%c0_10, %c0_11, %c0_12] : memref<1x128x128xi8, #tpu.memory_space<vmem>>, vector<1x128x128xi8>
    %22 = vector.shape_cast %21 : vector<1x128x128xi8> to vector<128x128xi8>
    %23 = arith.extsi %22 : vector<128x128xi8> to vector<128x128xi32>
    %c0_i32 = arith.constant 0 : i32
    %24 = vector.broadcast %c0_i32 : i32 to vector<128x128xi32>
    %25 = arith.cmpi sgt, %23, %24 : vector<128x128xi32>
    %cst_13 = arith.constant -1.000000e+30 : f32
    %26 = vector.broadcast %cst_13 : f32 to vector<128x128xf32>
    %27 = arith.select %25, %20, %26 : vector<128x128xi1>, vector<128x128xf32>
    %cst_14 = arith.constant dense<0xFF800000> : vector<128xf32>
    %28 = vector.multi_reduction <maximumf>, %27, %cst_14 [1] : vector<128x128xf32> to vector<128xf32>
    %29 = vector.shape_cast %28 : vector<128xf32> to vector<128x1xf32>
    %30 = vector.broadcast %29 : vector<128x1xf32> to vector<128x128xf32>
    %31 = arith.subf %27, %30 : vector<128x128xf32>
    %32 = math.exp %31 : vector<128x128xf32>
    %33 = arith.truncf %32 : vector<128x128xf32> to vector<128x128xbf16>
    %cst_15 = arith.constant dense<0.000000e+00> : vector<128x128xf32>
    %34 = tpu.matmul %33, %3, %cst_15 {dimension_numbers = #tpu.dot_dimension_numbers<[1], [0], [0], [1], [0, 0, 1, 1], [], []>} : vector<128x128xbf16>, vector<128x128xbf16>, vector<128x128xf32> -> vector<128x128xf32>
    %cst_16 = arith.constant dense<0.000000e+00> : vector<128xf32>
    %35 = vector.multi_reduction <add>, %32, %cst_16 [1] : vector<128x128xf32> to vector<128xf32>
    %36 = vector.shape_cast %35 : vector<128xf32> to vector<128x1xf32>
    %cst_17 = arith.constant 9.99999971E-10 : f32
    %37 = vector.broadcast %cst_17 : f32 to vector<128x1xf32>
    %38 = arith.maximumf %36, %37 : vector<128x1xf32>
    %39 = tpu.reciprocal %38 {approx = true} : vector<128x1xf32> -> vector<128x1xf32>
    %40 = vector.broadcast %39 : vector<128x1xf32> to vector<128x128xf32>
    %41 = arith.mulf %34, %40 : vector<128x128xf32>
    %cst_18 = arith.constant 0.000000e+00 : f32
    %42 = vector.broadcast %cst_18 : f32 to vector<128x128xf32>
    %43 = arith.cmpf ogt, %41, %42 : vector<128x128xf32>
    %cst_19 = arith.constant 0.000000e+00 : f32
    %44 = vector.broadcast %cst_19 : f32 to vector<128x128xf32>
    %45 = arith.minimumf %41, %44 : vector<128x128xf32>
    %46 = math.exp %45 : vector<128x128xf32>
    %cst_20 = arith.constant 1.000000e+00 : f32
    %47 = vector.broadcast %cst_20 : f32 to vector<128x128xf32>
    %48 = arith.subf %46, %47 : vector<128x128xf32>
    %49 = arith.select %43, %41, %48 : vector<128x128xi1>, vector<128x128xf32>
    %50 = arith.truncf %49 : vector<128x128xf32> to vector<128x128xbf16>
    %c0_21 = arith.constant 0 : index
    %c0_22 = arith.constant 0 : index
    %c0_23 = arith.constant 0 : index
    %51 = vector.load %arg6[%c0_21, %c0_22, %c0_23] : memref<1x128x128xbf16, #tpu.memory_space<vmem>>, vector<1x128x128xbf16>
    %52 = vector.shape_cast %51 : vector<1x128x128xbf16> to vector<128x128xbf16>
    %53 = vector.shape_cast %50 : vector<128x128xbf16> to vector<1x128x128xbf16>
    tpu.vector_store %arg6[%c0_21, %c0_22, %c0_23], %53 {strides = array<i32>} : memref<1x128x128xbf16, #tpu.memory_space<vmem>>, vector<1x128x128xbf16>,
    return
  }
  func.func @transform_0(%arg0: i32, %arg1: i32) -> (i32, i32, i32) {
    %c0_i32 = arith.constant 0 : i32
    %c0_i32_0 = arith.constant 0 : i32
    %c0_i32_1 = arith.constant 0 : i32
    return %arg0, %c0_i32, %c0_i32_0 : i32, i32, i32
  }
  func.func @transform_1(%arg0: i32, %arg1: i32) -> (i32, i32, i32) {
    %c0_i32 = arith.constant 0 : i32
    %c0_i32_0 = arith.constant 0 : i32
    %c0_i32_1 = arith.constant 0 : i32
    return %arg0, %c0_i32, %c0_i32_0 : i32, i32, i32
  }
  func.func @transform_2(%arg0: i32, %arg1: i32) -> (i32, i32, i32) {
    %c0_i32 = arith.constant 0 : i32
    %c0_i32_0 = arith.constant 0 : i32
    return %arg0, %arg1, %c0_i32 : i32, i32, i32
  }
  func.func @transform_3(%arg0: i32, %arg1: i32) -> (i32, i32) {
    %c0_i32 = arith.constant 0 : i32
    %c0_i32_0 = arith.constant 0 : i32
    %c0_i32_1 = arith.constant 0 : i32
    return %c0_i32, %c0_i32_0 : i32, i32
  }
  func.func @transform_4(%arg0: i32, %arg1: i32) -> (i32, i32, i32) {
    %c0_i32 = arith.constant 0 : i32
    %c0_i32_0 = arith.constant 0 : i32
    return %arg0, %arg1, %c0_i32 : i32, i32, i32
  }
}

module attributes {stable_mosaic.version = 11 : i64} {
  func.func @kernel(%arg0: i32, %arg1: memref<4x128x128xbf16, #tpu.memory_space<vmem>>, %arg2: memref<4x128xf32, #tpu.memory_space<vmem>>, %arg3: memref<128x128xbf16, #tpu.memory_space<vmem>>, %arg4: memref<128x256xbf16, #tpu.memory_space<vmem>>, %arg5: memref<128x128xbf16, #tpu.memory_space<vmem>>, %arg6: memref<1x1xf32, #tpu.memory_space<smem>>, %arg7: memref<128x128xbf16, #tpu.memory_space<vmem>>) attributes {dimension_semantics = [#tpu.dimension_semantics<parallel>], iteration_bounds = array<i64: 1>, scalar_prefetch = 0 : i64, scratch_operands = 0 : i64, tpu.core_type = #tpu.core_type<tc>, window_params = [{transform_indices = @transform_0, window_bounds = array<i64: 4, 128, 128>}, {pipeline_mode = #tpu.pipeline_mode<synchronous>, transform_indices = @transform_1, window_bounds = array<i64: 4, 128>}, {pipeline_mode = #tpu.pipeline_mode<synchronous>, transform_indices = @transform_2, window_bounds = array<i64: 128, 128>}, {pipeline_mode = #tpu.pipeline_mode<synchronous>, transform_indices = @transform_3, window_bounds = array<i64: 128, 256>}, {pipeline_mode = #tpu.pipeline_mode<synchronous>, transform_indices = @transform_4, window_bounds = array<i64: 128, 128>}, {transform_indices = @transform_5, window_bounds = array<i64: 1, 1>}, {transform_indices = @transform_6, window_bounds = array<i64: 128, 128>}]} {
    %c3 = arith.constant 3 : index
    %c0 = arith.constant 0 : index
    %c0_0 = arith.constant 0 : index
    %0 = vector.load %arg1[%c3, %c0, %c0_0] : memref<4x128x128xbf16, #tpu.memory_space<vmem>>, vector<1x128x128xbf16>
    %1 = vector.shape_cast %0 : vector<1x128x128xbf16> to vector<128x128xbf16>
    %2 = arith.extf %1 : vector<128x128xbf16> to vector<128x128xf32>
    %c3_1 = arith.constant 3 : index
    %c0_2 = arith.constant 0 : index
    %3 = vector.load %arg2[%c3_1, %c0_2] : memref<4x128xf32, #tpu.memory_space<vmem>>, vector<1x128xf32>
    %4 = vector.broadcast %3 : vector<1x128xf32> to vector<128x128xf32>
    %5 = arith.addf %2, %4 : vector<128x128xf32>
    %6 = arith.truncf %5 : vector<128x128xf32> to vector<128x128xbf16>
    %c0_3 = arith.constant 0 : index
    %c0_4 = arith.constant 0 : index
    %7 = vector.load %arg3[%c0_3, %c0_4] : memref<128x128xbf16, #tpu.memory_space<vmem>>, vector<128x128xbf16>
    %cst = arith.constant dense<0.000000e+00> : vector<128x128xf32>
    %8 = tpu.matmul %6, %7, %cst {dimension_numbers = #tpu.dot_dimension_numbers<[1], [0], [0], [1], [0, 0, 1, 1], [], []>} : vector<128x128xbf16>, vector<128x128xbf16>, vector<128x128xf32> -> vector<128x128xf32>
    %cst_5 = arith.constant -1.000000e+30 : f32
    %9 = vector.broadcast %cst_5 : f32 to vector<128x1xf32>
    %cst_6 = arith.constant 0.000000e+00 : f32
    %10 = vector.broadcast %cst_6 : f32 to vector<128x1xf32>
    %cst_7 = arith.constant 0.000000e+00 : f32
    %11 = vector.broadcast %cst_7 : f32 to vector<128x128xf32>
    %c0_i32 = arith.constant 0 : i32
    %12 = arith.index_cast %c0_i32 : i32 to index
    %c0_8 = arith.constant 0 : index
    %c0_9 = arith.constant 0 : index
    %13 = vector.load %arg1[%12, %c0_8, %c0_9] : memref<4x128x128xbf16, #tpu.memory_space<vmem>>, vector<1x128x128xbf16>
    %14 = vector.shape_cast %13 : vector<1x128x128xbf16> to vector<128x128xbf16>
    %15 = arith.extf %14 : vector<128x128xbf16> to vector<128x128xf32>
    %16 = arith.index_cast %c0_i32 : i32 to index
    %c0_10 = arith.constant 0 : index
    %17 = vector.load %arg2[%16, %c0_10] : memref<4x128xf32, #tpu.memory_space<vmem>>, vector<1x128xf32>
    %18 = vector.broadcast %17 : vector<1x128xf32> to vector<128x128xf32>
    %19 = arith.addf %15, %18 : vector<128x128xf32>
    %20 = arith.truncf %19 : vector<128x128xf32> to vector<128x128xbf16>
    %c0_11 = arith.constant 0 : index
    %c0_12 = arith.constant 0 : index
    %21 = vector.load %arg4[%c0_11, %c0_12] : memref<128x256xbf16, #tpu.memory_space<vmem>>, vector<128x256xbf16>
    %cst_13 = arith.constant dense<0.000000e+00> : vector<128x256xf32>
    %22 = tpu.matmul %20, %21, %cst_13 {dimension_numbers = #tpu.dot_dimension_numbers<[1], [0], [0], [1], [0, 0, 1, 1], [], []>} : vector<128x128xbf16>, vector<128x256xbf16>, vector<128x256xf32> -> vector<128x256xf32>
    %23 = vector.extract_strided_slice %22 {offsets = [0, 0], sizes = [128, 128], strides = [1, 1]} : vector<128x256xf32> to vector<128x128xf32>
    %24 = vector.extract_strided_slice %22 {offsets = [0, 128], sizes = [128, 128], strides = [1, 1]} : vector<128x256xf32> to vector<128x128xf32>
    %25 = arith.mulf %8, %23 : vector<128x128xf32>
    %cst_14 = arith.constant dense<0.000000e+00> : vector<128xf32>
    %26 = vector.multi_reduction <add>, %25, %cst_14 [1] : vector<128x128xf32> to vector<128xf32>
    %27 = vector.shape_cast %26 : vector<128xf32> to vector<128x1xf32>
    %cst_15 = arith.constant 2.500000e-01 : f32
    %28 = vector.broadcast %cst_15 : f32 to vector<128x1xf32>
    %29 = arith.mulf %27, %28 : vector<128x1xf32>
    %30 = arith.maximumf %9, %29 : vector<128x1xf32>
    %31 = arith.subf %9, %30 : vector<128x1xf32>
    %32 = math.exp %31 : vector<128x1xf32>
    %33 = arith.subf %29, %30 : vector<128x1xf32>
    %34 = math.exp %33 : vector<128x1xf32>
    %35 = arith.mulf %32, %10 : vector<128x1xf32>
    %36 = arith.addf %35, %34 : vector<128x1xf32>
    %37 = vector.broadcast %32 : vector<128x1xf32> to vector<128x128xf32>
    %38 = arith.mulf %37, %11 : vector<128x128xf32>
    %39 = vector.broadcast %34 : vector<128x1xf32> to vector<128x128xf32>
    %40 = arith.mulf %39, %24 : vector<128x128xf32>
    %41 = arith.addf %38, %40 : vector<128x128xf32>
    %c1_i32 = arith.constant 1 : i32
    %42 = arith.index_cast %c1_i32 : i32 to index
    %c0_16 = arith.constant 0 : index
    %c0_17 = arith.constant 0 : index
    %43 = vector.load %arg1[%42, %c0_16, %c0_17] : memref<4x128x128xbf16, #tpu.memory_space<vmem>>, vector<1x128x128xbf16>
    %44 = vector.shape_cast %43 : vector<1x128x128xbf16> to vector<128x128xbf16>
    %45 = arith.extf %44 : vector<128x128xbf16> to vector<128x128xf32>
    %46 = arith.index_cast %c1_i32 : i32 to index
    %c0_18 = arith.constant 0 : index
    %47 = vector.load %arg2[%46, %c0_18] : memref<4x128xf32, #tpu.memory_space<vmem>>, vector<1x128xf32>
    %48 = vector.broadcast %47 : vector<1x128xf32> to vector<128x128xf32>
    %49 = arith.addf %45, %48 : vector<128x128xf32>
    %50 = arith.truncf %49 : vector<128x128xf32> to vector<128x128xbf16>
    %c0_19 = arith.constant 0 : index
    %c0_20 = arith.constant 0 : index
    %51 = vector.load %arg4[%c0_19, %c0_20] : memref<128x256xbf16, #tpu.memory_space<vmem>>, vector<128x256xbf16>
    %cst_21 = arith.constant dense<0.000000e+00> : vector<128x256xf32>
    %52 = tpu.matmul %50, %51, %cst_21 {dimension_numbers = #tpu.dot_dimension_numbers<[1], [0], [0], [1], [0, 0, 1, 1], [], []>} : vector<128x128xbf16>, vector<128x256xbf16>, vector<128x256xf32> -> vector<128x256xf32>
    %53 = vector.extract_strided_slice %52 {offsets = [0, 0], sizes = [128, 128], strides = [1, 1]} : vector<128x256xf32> to vector<128x128xf32>
    %54 = vector.extract_strided_slice %52 {offsets = [0, 128], sizes = [128, 128], strides = [1, 1]} : vector<128x256xf32> to vector<128x128xf32>
    %55 = arith.mulf %8, %53 : vector<128x128xf32>
    %cst_22 = arith.constant dense<0.000000e+00> : vector<128xf32>
    %56 = vector.multi_reduction <add>, %55, %cst_22 [1] : vector<128x128xf32> to vector<128xf32>
    %57 = vector.shape_cast %56 : vector<128xf32> to vector<128x1xf32>
    %cst_23 = arith.constant 2.500000e-01 : f32
    %58 = vector.broadcast %cst_23 : f32 to vector<128x1xf32>
    %59 = arith.mulf %57, %58 : vector<128x1xf32>
    %60 = arith.maximumf %30, %59 : vector<128x1xf32>
    %61 = arith.subf %30, %60 : vector<128x1xf32>
    %62 = math.exp %61 : vector<128x1xf32>
    %63 = arith.subf %59, %60 : vector<128x1xf32>
    %64 = math.exp %63 : vector<128x1xf32>
    %65 = arith.mulf %62, %36 : vector<128x1xf32>
    %66 = arith.addf %65, %64 : vector<128x1xf32>
    %67 = vector.broadcast %62 : vector<128x1xf32> to vector<128x128xf32>
    %68 = arith.mulf %67, %41 : vector<128x128xf32>
    %69 = vector.broadcast %64 : vector<128x1xf32> to vector<128x128xf32>
    %70 = arith.mulf %69, %54 : vector<128x128xf32>
    %71 = arith.addf %68, %70 : vector<128x128xf32>
    %c2_i32 = arith.constant 2 : i32
    %72 = arith.index_cast %c2_i32 : i32 to index
    %c0_24 = arith.constant 0 : index
    %c0_25 = arith.constant 0 : index
    %73 = vector.load %arg1[%72, %c0_24, %c0_25] : memref<4x128x128xbf16, #tpu.memory_space<vmem>>, vector<1x128x128xbf16>
    %74 = vector.shape_cast %73 : vector<1x128x128xbf16> to vector<128x128xbf16>
    %75 = arith.extf %74 : vector<128x128xbf16> to vector<128x128xf32>
    %76 = arith.index_cast %c2_i32 : i32 to index
    %c0_26 = arith.constant 0 : index
    %77 = vector.load %arg2[%76, %c0_26] : memref<4x128xf32, #tpu.memory_space<vmem>>, vector<1x128xf32>
    %78 = vector.broadcast %77 : vector<1x128xf32> to vector<128x128xf32>
    %79 = arith.addf %75, %78 : vector<128x128xf32>
    %80 = arith.truncf %79 : vector<128x128xf32> to vector<128x128xbf16>
    %c0_27 = arith.constant 0 : index
    %c0_28 = arith.constant 0 : index
    %81 = vector.load %arg4[%c0_27, %c0_28] : memref<128x256xbf16, #tpu.memory_space<vmem>>, vector<128x256xbf16>
    %cst_29 = arith.constant dense<0.000000e+00> : vector<128x256xf32>
    %82 = tpu.matmul %80, %81, %cst_29 {dimension_numbers = #tpu.dot_dimension_numbers<[1], [0], [0], [1], [0, 0, 1, 1], [], []>} : vector<128x128xbf16>, vector<128x256xbf16>, vector<128x256xf32> -> vector<128x256xf32>
    %83 = vector.extract_strided_slice %82 {offsets = [0, 0], sizes = [128, 128], strides = [1, 1]} : vector<128x256xf32> to vector<128x128xf32>
    %84 = vector.extract_strided_slice %82 {offsets = [0, 128], sizes = [128, 128], strides = [1, 1]} : vector<128x256xf32> to vector<128x128xf32>
    %85 = arith.mulf %8, %83 : vector<128x128xf32>
    %cst_30 = arith.constant dense<0.000000e+00> : vector<128xf32>
    %86 = vector.multi_reduction <add>, %85, %cst_30 [1] : vector<128x128xf32> to vector<128xf32>
    %87 = vector.shape_cast %86 : vector<128xf32> to vector<128x1xf32>
    %cst_31 = arith.constant 2.500000e-01 : f32
    %88 = vector.broadcast %cst_31 : f32 to vector<128x1xf32>
    %89 = arith.mulf %87, %88 : vector<128x1xf32>
    %90 = arith.maximumf %60, %89 : vector<128x1xf32>
    %91 = arith.subf %60, %90 : vector<128x1xf32>
    %92 = math.exp %91 : vector<128x1xf32>
    %93 = arith.subf %89, %90 : vector<128x1xf32>
    %94 = math.exp %93 : vector<128x1xf32>
    %95 = arith.mulf %92, %66 : vector<128x1xf32>
    %96 = arith.addf %95, %94 : vector<128x1xf32>
    %97 = vector.broadcast %92 : vector<128x1xf32> to vector<128x128xf32>
    %98 = arith.mulf %97, %71 : vector<128x128xf32>
    %99 = vector.broadcast %94 : vector<128x1xf32> to vector<128x128xf32>
    %100 = arith.mulf %99, %84 : vector<128x128xf32>
    %101 = arith.addf %98, %100 : vector<128x128xf32>
    %c3_i32 = arith.constant 3 : i32
    %102 = arith.index_cast %c3_i32 : i32 to index
    %c0_32 = arith.constant 0 : index
    %c0_33 = arith.constant 0 : index
    %103 = vector.load %arg1[%102, %c0_32, %c0_33] : memref<4x128x128xbf16, #tpu.memory_space<vmem>>, vector<1x128x128xbf16>
    %104 = vector.shape_cast %103 : vector<1x128x128xbf16> to vector<128x128xbf16>
    %105 = arith.extf %104 : vector<128x128xbf16> to vector<128x128xf32>
    %106 = arith.index_cast %c3_i32 : i32 to index
    %c0_34 = arith.constant 0 : index
    %107 = vector.load %arg2[%106, %c0_34] : memref<4x128xf32, #tpu.memory_space<vmem>>, vector<1x128xf32>
    %108 = vector.broadcast %107 : vector<1x128xf32> to vector<128x128xf32>
    %109 = arith.addf %105, %108 : vector<128x128xf32>
    %110 = arith.truncf %109 : vector<128x128xf32> to vector<128x128xbf16>
    %c0_35 = arith.constant 0 : index
    %c0_36 = arith.constant 0 : index
    %111 = vector.load %arg4[%c0_35, %c0_36] : memref<128x256xbf16, #tpu.memory_space<vmem>>, vector<128x256xbf16>
    %cst_37 = arith.constant dense<0.000000e+00> : vector<128x256xf32>
    %112 = tpu.matmul %110, %111, %cst_37 {dimension_numbers = #tpu.dot_dimension_numbers<[1], [0], [0], [1], [0, 0, 1, 1], [], []>} : vector<128x128xbf16>, vector<128x256xbf16>, vector<128x256xf32> -> vector<128x256xf32>
    %113 = vector.extract_strided_slice %112 {offsets = [0, 0], sizes = [128, 128], strides = [1, 1]} : vector<128x256xf32> to vector<128x128xf32>
    %114 = vector.extract_strided_slice %112 {offsets = [0, 128], sizes = [128, 128], strides = [1, 1]} : vector<128x256xf32> to vector<128x128xf32>
    %115 = arith.mulf %8, %113 : vector<128x128xf32>
    %cst_38 = arith.constant dense<0.000000e+00> : vector<128xf32>
    %116 = vector.multi_reduction <add>, %115, %cst_38 [1] : vector<128x128xf32> to vector<128xf32>
    %117 = vector.shape_cast %116 : vector<128xf32> to vector<128x1xf32>
    %cst_39 = arith.constant 2.500000e-01 : f32
    %118 = vector.broadcast %cst_39 : f32 to vector<128x1xf32>
    %119 = arith.mulf %117, %118 : vector<128x1xf32>
    %120 = arith.maximumf %90, %119 : vector<128x1xf32>
    %121 = arith.subf %90, %120 : vector<128x1xf32>
    %122 = math.exp %121 : vector<128x1xf32>
    %123 = arith.subf %119, %120 : vector<128x1xf32>
    %124 = math.exp %123 : vector<128x1xf32>
    %125 = arith.mulf %122, %96 : vector<128x1xf32>
    %126 = arith.addf %125, %124 : vector<128x1xf32>
    %127 = vector.broadcast %122 : vector<128x1xf32> to vector<128x128xf32>
    %128 = arith.mulf %127, %101 : vector<128x128xf32>
    %129 = vector.broadcast %124 : vector<128x1xf32> to vector<128x128xf32>
    %130 = arith.mulf %129, %114 : vector<128x128xf32>
    %131 = arith.addf %128, %130 : vector<128x128xf32>
    %c4_i32 = arith.constant 4 : i32
    %132 = tpu.reciprocal %126 {approx = true} : vector<128x1xf32> -> vector<128x1xf32>
    %133 = vector.broadcast %132 : vector<128x1xf32> to vector<128x128xf32>
    %134 = arith.mulf %131, %133 : vector<128x128xf32>
    %135 = arith.truncf %134 : vector<128x128xf32> to vector<128x128xbf16>
    %c0_40 = arith.constant 0 : index
    %c0_41 = arith.constant 0 : index
    %136 = vector.load %arg5[%c0_40, %c0_41] : memref<128x128xbf16, #tpu.memory_space<vmem>>, vector<128x128xbf16>
    %cst_42 = arith.constant dense<0.000000e+00> : vector<128x128xf32>
    %137 = tpu.matmul %135, %136, %cst_42 {dimension_numbers = #tpu.dot_dimension_numbers<[1], [0], [0], [1], [0, 0, 1, 1], [], []>} : vector<128x128xbf16>, vector<128x128xbf16>, vector<128x128xf32> -> vector<128x128xf32>
    %c0_43 = arith.constant 0 : index
    %c0_44 = arith.constant 0 : index
    %138 = memref.load %arg6[%c0_43, %c0_44] : memref<1x1xf32, #tpu.memory_space<smem>>
    %139 = vector.broadcast %138 : f32 to vector<128x128xf32>
    %140 = arith.mulf %139, %137 : vector<128x128xf32>
    %141 = arith.addf %140, %5 : vector<128x128xf32>
    %142 = arith.truncf %141 : vector<128x128xf32> to vector<128x128xbf16>
    %c0_45 = arith.constant 0 : index
    %c0_46 = arith.constant 0 : index
    %143 = vector.load %arg7[%c0_45, %c0_46] : memref<128x128xbf16, #tpu.memory_space<vmem>>, vector<128x128xbf16>
    tpu.vector_store %arg7[%c0_45, %c0_46], %142 {strides = array<i32>} : memref<128x128xbf16, #tpu.memory_space<vmem>>, vector<128x128xbf16>,
    return
  }
  func.func @transform_0(%arg0: i32) -> (i32, i32, i32) {
    %c0_i32 = arith.constant 0 : i32
    %c0_i32_0 = arith.constant 0 : i32
    %c0_i32_1 = arith.constant 0 : i32
    return %c0_i32, %arg0, %c0_i32_0 : i32, i32, i32
  }
  func.func @transform_1(%arg0: i32) -> (i32, i32) {
    %c0_i32 = arith.constant 0 : i32
    %c0_i32_0 = arith.constant 0 : i32
    %c0_i32_1 = arith.constant 0 : i32
    return %c0_i32, %c0_i32_0 : i32, i32
  }
  func.func @transform_2(%arg0: i32) -> (i32, i32) {
    %c0_i32 = arith.constant 0 : i32
    %c0_i32_0 = arith.constant 0 : i32
    %c0_i32_1 = arith.constant 0 : i32
    return %c0_i32, %c0_i32_0 : i32, i32
  }
  func.func @transform_3(%arg0: i32) -> (i32, i32) {
    %c0_i32 = arith.constant 0 : i32
    %c0_i32_0 = arith.constant 0 : i32
    %c0_i32_1 = arith.constant 0 : i32
    return %c0_i32, %c0_i32_0 : i32, i32
  }
  func.func @transform_4(%arg0: i32) -> (i32, i32) {
    %c0_i32 = arith.constant 0 : i32
    %c0_i32_0 = arith.constant 0 : i32
    %c0_i32_1 = arith.constant 0 : i32
    return %c0_i32, %c0_i32_0 : i32, i32
  }
  func.func @transform_5(%arg0: i32) -> (i32, i32) {
    %c0_i32 = arith.constant 0 : i32
    %c0_i32_0 = arith.constant 0 : i32
    %c0_i32_1 = arith.constant 0 : i32
    return %c0_i32, %c0_i32_0 : i32, i32
  }
  func.func @transform_6(%arg0: i32) -> (i32, i32) {
    %c0_i32 = arith.constant 0 : i32
    %c0_i32_0 = arith.constant 0 : i32
    return %arg0, %c0_i32 : i32, i32
  }
}

module attributes {stable_mosaic.version = 11 : i64} {
  func.func @_classifier_kernel(%arg0: i32, %arg1: memref<16x2xi32, #tpu.memory_space<vmem>>, %arg2: memref<128x128xbf16, #tpu.memory_space<vmem>>, %arg3: memref<128x128xbf16, #tpu.memory_space<vmem>>, %arg4: memref<1x128xf32, #tpu.memory_space<vmem>>, %arg5: memref<128x128xbf16, #tpu.memory_space<vmem>>, %arg6: memref<1x128xf32, #tpu.memory_space<vmem>>, %arg7: memref<16x128xf32, #tpu.memory_space<vmem>>) attributes {dimension_semantics = [#tpu.dimension_semantics<parallel>], iteration_bounds = array<i64: 1>, scalar_prefetch = 0 : i64, scratch_operands = 0 : i64, tpu.core_type = #tpu.core_type<tc>, window_params = [{transform_indices = @transform_0, window_bounds = array<i64: 16, 2>}, {pipeline_mode = #tpu.pipeline_mode<synchronous>, transform_indices = @transform_1, window_bounds = array<i64: 128, 128>}, {pipeline_mode = #tpu.pipeline_mode<synchronous>, transform_indices = @transform_2, window_bounds = array<i64: 128, 128>}, {pipeline_mode = #tpu.pipeline_mode<synchronous>, transform_indices = @transform_3, window_bounds = array<i64: 1, 128>}, {pipeline_mode = #tpu.pipeline_mode<synchronous>, transform_indices = @transform_4, window_bounds = array<i64: 128, 128>}, {pipeline_mode = #tpu.pipeline_mode<synchronous>, transform_indices = @transform_5, window_bounds = array<i64: 1, 128>}, {transform_indices = @transform_6, window_bounds = array<i64: 16, 128>}]} {
    %c0 = arith.constant 0 : index
    %c0_0 = arith.constant 0 : index
    %0 = vector.load %arg1[%c0, %c0_0] : memref<16x2xi32, #tpu.memory_space<vmem>>, vector<16x2xi32>
    %1 = tpu.iota {dimensions = array<i32: 1>} : vector<16x128xi32>
    %2 = vector.extract_strided_slice %0 {offsets = [0, 0], sizes = [16, 1], strides = [1, 1]} : vector<16x2xi32> to vector<16x1xi32>
    %3 = vector.broadcast %2 : vector<16x1xi32> to vector<16x128xi32>
    %4 = arith.cmpi eq, %3, %1 : vector<16x128xi32>
    %5 = arith.extui %4 : vector<16x128xi1> to vector<16x128xi32>
    %6 = arith.sitofp %5 : vector<16x128xi32> to vector<16x128xf32>
    %7 = arith.truncf %6 : vector<16x128xf32> to vector<16x128xbf16>
    %8 = vector.extract_strided_slice %0 {offsets = [0, 1], sizes = [16, 1], strides = [1, 1]} : vector<16x2xi32> to vector<16x1xi32>
    %9 = vector.broadcast %8 : vector<16x1xi32> to vector<16x128xi32>
    %10 = arith.cmpi eq, %9, %1 : vector<16x128xi32>
    %11 = arith.extui %10 : vector<16x128xi1> to vector<16x128xi32>
    %12 = arith.sitofp %11 : vector<16x128xi32> to vector<16x128xf32>
    %13 = arith.truncf %12 : vector<16x128xf32> to vector<16x128xbf16>
    %c0_1 = arith.constant 0 : index
    %c0_2 = arith.constant 0 : index
    %14 = vector.load %arg2[%c0_1, %c0_2] : memref<128x128xbf16, #tpu.memory_space<vmem>>, vector<128x128xbf16>
    %cst = arith.constant dense<0.000000e+00> : vector<16x128xf32>
    %15 = tpu.matmul %7, %14, %cst {dimension_numbers = #tpu.dot_dimension_numbers<[1], [0], [0], [1], [0, 0, 1, 1], [], []>} : vector<16x128xbf16>, vector<128x128xbf16>, vector<16x128xf32> -> vector<16x128xf32>
    %cst_3 = arith.constant dense<0.000000e+00> : vector<16x128xf32>
    %16 = tpu.matmul %13, %14, %cst_3 {dimension_numbers = #tpu.dot_dimension_numbers<[1], [0], [0], [1], [0, 0, 1, 1], [], []>} : vector<16x128xbf16>, vector<128x128xbf16>, vector<16x128xf32> -> vector<16x128xf32>
    %17 = arith.mulf %15, %16 : vector<16x128xf32>
    %18 = arith.truncf %17 : vector<16x128xf32> to vector<16x128xbf16>
    %c0_4 = arith.constant 0 : index
    %c0_5 = arith.constant 0 : index
    %19 = vector.load %arg3[%c0_4, %c0_5] : memref<128x128xbf16, #tpu.memory_space<vmem>>, vector<128x128xbf16>
    %cst_6 = arith.constant dense<0.000000e+00> : vector<16x128xf32>
    %20 = tpu.matmul %18, %19, %cst_6 {dimension_numbers = #tpu.dot_dimension_numbers<[1], [0], [0], [1], [0, 0, 1, 1], [], []>} : vector<16x128xbf16>, vector<128x128xbf16>, vector<16x128xf32> -> vector<16x128xf32>
    %c0_7 = arith.constant 0 : index
    %c0_8 = arith.constant 0 : index
    %21 = vector.load %arg4[%c0_7, %c0_8] : memref<1x128xf32, #tpu.memory_space<vmem>>, vector<1x128xf32>
    %22 = vector.broadcast %21 : vector<1x128xf32> to vector<16x128xf32>
    %23 = arith.addf %20, %22 : vector<16x128xf32>
    %cst_9 = arith.constant 0.000000e+00 : f32
    %24 = vector.broadcast %cst_9 : f32 to vector<16x128xf32>
    %25 = arith.maximumf %23, %24 : vector<16x128xf32>
    %26 = arith.truncf %25 : vector<16x128xf32> to vector<16x128xbf16>
    %c0_10 = arith.constant 0 : index
    %c0_11 = arith.constant 0 : index
    %27 = vector.load %arg5[%c0_10, %c0_11] : memref<128x128xbf16, #tpu.memory_space<vmem>>, vector<128x128xbf16>
    %cst_12 = arith.constant dense<0.000000e+00> : vector<16x128xf32>
    %28 = tpu.matmul %26, %27, %cst_12 {dimension_numbers = #tpu.dot_dimension_numbers<[1], [0], [0], [1], [0, 0, 1, 1], [], []>} : vector<16x128xbf16>, vector<128x128xbf16>, vector<16x128xf32> -> vector<16x128xf32>
    %c0_13 = arith.constant 0 : index
    %c0_14 = arith.constant 0 : index
    %29 = vector.load %arg6[%c0_13, %c0_14] : memref<1x128xf32, #tpu.memory_space<vmem>>, vector<1x128xf32>
    %30 = vector.broadcast %29 : vector<1x128xf32> to vector<16x128xf32>
    %31 = arith.addf %28, %30 : vector<16x128xf32>
    %c0_15 = arith.constant 0 : index
    %c0_16 = arith.constant 0 : index
    %32 = vector.load %arg7[%c0_15, %c0_16] : memref<16x128xf32, #tpu.memory_space<vmem>>, vector<16x128xf32>
    tpu.vector_store %arg7[%c0_15, %c0_16], %31 {strides = array<i32>} : memref<16x128xf32, #tpu.memory_space<vmem>>, vector<16x128xf32>,
    return
  }
  func.func @transform_0(%arg0: i32) -> (i32, i32) {
    %c0_i32 = arith.constant 0 : i32
    %c0_i32_0 = arith.constant 0 : i32
    return %arg0, %c0_i32 : i32, i32
  }
  func.func @transform_1(%arg0: i32) -> (i32, i32) {
    %c0_i32 = arith.constant 0 : i32
    %c0_i32_0 = arith.constant 0 : i32
    %c0_i32_1 = arith.constant 0 : i32
    return %c0_i32, %c0_i32_0 : i32, i32
  }
  func.func @transform_2(%arg0: i32) -> (i32, i32) {
    %c0_i32 = arith.constant 0 : i32
    %c0_i32_0 = arith.constant 0 : i32
    %c0_i32_1 = arith.constant 0 : i32
    return %c0_i32, %c0_i32_0 : i32, i32
  }
  func.func @transform_3(%arg0: i32) -> (i32, i32) {
    %c0_i32 = arith.constant 0 : i32
    %c0_i32_0 = arith.constant 0 : i32
    %c0_i32_1 = arith.constant 0 : i32
    return %c0_i32, %c0_i32_0 : i32, i32
  }
  func.func @transform_4(%arg0: i32) -> (i32, i32) {
    %c0_i32 = arith.constant 0 : i32
    %c0_i32_0 = arith.constant 0 : i32
    %c0_i32_1 = arith.constant 0 : i32
    return %c0_i32, %c0_i32_0 : i32, i32
  }
  func.func @transform_5(%arg0: i32) -> (i32, i32) {
    %c0_i32 = arith.constant 0 : i32
    %c0_i32_0 = arith.constant 0 : i32
    %c0_i32_1 = arith.constant 0 : i32
    return %c0_i32, %c0_i32_0 : i32, i32
  }
  func.func @transform_6(%arg0: i32) -> (i32, i32) {
    %c0_i32 = arith.constant 0 : i32
    %c0_i32_0 = arith.constant 0 : i32
    return %arg0, %c0_i32 : i32, i32
  }
}

</mosaic_0001>

<bundles_post_ra>
// kernel: dgnn_forward.4
= control target key start
LH: loop header
LB: loop body
LE: loop exit
PB: predicated region body
PF: predicated region fallthrough
CT: control target
= control target key end

     0   :  { %s994_s15 = smov 0   ;;  %s996_s16 = smov 0   ;;  %s1075_s0 = inlined_call_operand.vmem [shape: bf16[4,128,8], index: 0, kind: input, shape index: {}]   ;;  %s1076_s1 = inlined_call_operand.vmem [shape: bf16[8,128], index: 1, kind: input, shape index: {}]   ;;  %s1077_s2 = inlined_call_operand.vmem [shape: f32[8,128], index: 2, kind: input, shape index: {}]   ;;  %s1078_s3 = inlined_call_operand.vmem [shape: bf16[4,128,128], index: 3, kind: output, shape index: {0}]   ;;  %s1079_s4 = inlined_call_operand.vmem [shape: f32[4,8,128], index: 4, kind: output, shape index: {1}]  }
   0x1   :  { %s998_s17 = smov 0  }
   0x2 LB: > { %s27_s18 = sadd.s32 1, %s961_s16  ;;  %p724_p0 = scmp.ge.s32.totalorder %s965_s17, 1  ;;  %s965_s17 = sphi %s998_s17, %s15_s17   ;;  %s961_s16 = sphi %s996_s16, %s1081_s16   ;;  %s957_s15 = sphi %s994_s15, %s1080_s15  }
   0x3   : > { %p29_p1 = scmp.ge.s32.totalorder %s27_s18, 4  ;;  %p188_p2 = scmp.lt.s32.totalorder %s965_s17, 5 }
   0x5   : > { %s1083_s18 = smov (%p29_p1, %s27_s18), 0  ;;  %p189_p3 = pnand %p724_p0, %p188_p2 }
   0x6   : > { %p230_p4 = scmp.lt.s32.totalorder (!%p189_p3), %s957_s15, 3 }
   0x7   : > { %192 = sbr.rel (%p189_p3) target bundleno = 496 (0x1f0), region = 32 }
   0xc   : > { %v273_v0 = vld [vmem:[%s1076_s1] sm:$0xf]  ;;  %vm339_vm0 = vcmask 1043456   ;;  %s1085_s15 = smov (!%p230_p4, %s957_s15), 3  ;;  %vm314_vm1 = vcmask 64512   ;;  %v967_v10 = vmov 0.0  }
   0xd   : > { %908 = vmatprep.subr.msk.bf16.mxu0 %vm339_vm0, %v273_v0  ;;  %v341_v1 = vsel %vm339_vm0, %v273_v0, 0  ;;  %s764_s21 = sshll.u32 %s1085_s15, 6  ;;  %873 = vmatprep.subr.mxu1 %v967_v10  ;;  %vm968_vm2 = vmmov 0   ;;  %v440_v35 = vld [vmem:[%s1077_s2] sm:$0xff]  ;;  %s729_s30 = sshll.u32 %s1085_s15, 3 }
   0xe   : > { %856 = vmatpush3.bf16.msra.mxu0 %v341_v1  ;;  %s237_s24 = scalar_lea.vmem %s1075_s0, %s764_s21  ;;  %905 = vmatprep.mubr.msk.f32.mxu1 %vm968_vm2, %v967_v10  ;;  %s1034_s27 = scalar_lea.vmem %s1078_s3, %s764_s21 }
   0xf   : > { %v935_v2 = vld [vmem:[%s237_s24] sm:$0xff]   ;;  %v936_v3 = vld [vmem:[%s237_s24 + $0x8] sm:$0xff]   ;;  %v937_v4 = vld [vmem:[%s237_s24 + $0x10] sm:$0xff]   ;;  %s255_s7 = scalar_lea.vmem %s1079_s4, %s729_s30 }
  0x10   : > { %857 = vmatprep.mubr.msk.bf16.mxu0 %vm314_vm1, %v935_v2  ;;  %v938_v5 = vld [vmem:[%s237_s24 + $0x18] sm:$0xff]   ;;  %v939_v6 = vld [vmem:[%s237_s24 + $0x20] sm:$0xff]   ;;  %v940_v7 = vld [vmem:[%s237_s24 + $0x28] sm:$0xff]  }
  0x11   : > { %858 = vmatmul.mubr.msk.bf16.vlgmr.msra.gmra.mxu0 %vm314_vm1, %v936_v3  ;;  %v941_v8 = vld [vmem:[%s237_s24 + $0x30] sm:$0xff]   ;;  %v942_v9 = vld [vmem:[%s237_s24 + $0x38] sm:$0xff]  }
  0x12   : > { %861 = vmatprep.mubr.msk.bf16.mxu0 %vm314_vm1, %v937_v4 }
  0x19   : > { %862 = vmatmul.mubr.msk.bf16.gmra.mxu0 %vm314_vm1, %v938_v5 }
  0x1a   : > { %865 = vmatprep.mubr.msk.bf16.mxu0 %vm314_vm1, %v939_v6 }
  0x21   : > { %866 = vmatmul.mubr.msk.bf16.gmra.mxu0 %vm314_vm1, %v940_v7 }
  0x22   : > { %869 = vmatprep.mubr.msk.bf16.mxu0 %vm314_vm1, %v941_v8 }
  0x29   : > { %870 = vmatmul.mubr.msk.bf16.gmra.mxu0 %vm314_vm1, %v942_v9 }
  0xd1   : > { %v859_v11 = vpop.f32.mrf.mxu0 }
  0xd3   : > { %v377_v12 = vpop.f32.mrf.mxu0 }
  0xd5   : > { %v860_v13 = vpop.f32.mrf.mxu0 }
  0xd6   : > { %v790_v14 = vpack.c.bf16 %v860_v13, %v859_v11 }
  0xd7   : > { %v380_v15 = vpop.f32.mrf.mxu0 }
  0xd8   : > { %822 = vst [vmem:[%s1034_s27 + $0x8] sm:$0xff] %v790_v14   ;;  %v785_v16 = vpack.c.bf16 %v380_v15, %v377_v12 }
  0xd9   : > { %v863_v17 = vpop.f32.mrf.mxu0 }
  0xda   : > { %786 = vst [vmem:[%s1034_s27] sm:$0xff] %v785_v16  }
  0xdb   : > { %v393_v18 = vpop.f32.mrf.mxu0 }
  0xdd   : > { %v864_v19 = vpop.f32.mrf.mxu0 }
  0xde   : > { %v800_v20 = vpack.c.bf16 %v864_v19, %v863_v17 }
  0xdf   : > { %v396_v21 = vpop.f32.mrf.mxu0 }
  0xe0   : > { %824 = vst [vmem:[%s1034_s27 + $0x18] sm:$0xff] %v800_v20   ;;  %v795_v22 = vpack.c.bf16 %v396_v21, %v393_v18 }
  0xe1   : > { %v867_v23 = vpop.f32.mrf.mxu0 }
  0xe2   : > { %823 = vst [vmem:[%s1034_s27 + $0x10] sm:$0xff] %v795_v22  }
  0xe3   : > { %v409_v24 = vpop.f32.mrf.mxu0 }
  0xe5   : > { %v868_v25 = vpop.f32.mrf.mxu0 }
  0xe6   : > { %v810_v26 = vpack.c.bf16 %v868_v25, %v867_v23 }
  0xe7   : > { %v412_v27 = vpop.f32.mrf.mxu0 }
  0xe8   : > { %826 = vst [vmem:[%s1034_s27 + $0x28] sm:$0xff] %v810_v26   ;;  %v805_v28 = vpack.c.bf16 %v412_v27, %v409_v24 }
  0xe9   : > { %v871_v29 = vpop.f32.mrf.mxu0 }
  0xea   : > { %825 = vst [vmem:[%s1034_s27 + $0x20] sm:$0xff] %v805_v28  }
  0xeb   : > { %v425_v30 = vpop.f32.mrf.mxu0 }
  0xed   : > { %v872_v31 = vpop.f32.mrf.mxu0 }
  0xee   : > { %v820_v32 = vpack.c.bf16 %v872_v31, %v871_v29  ;;  %874 = vmatpush3.xpose.msra.mxu1 %v872_v31 }
  0xef   : > { %v428_v33 = vpop.f32.mrf.mxu0  ;;  %875 = vmatprep.subr.mxu1 %v967_v10 }
  0xf0   : > { %828 = vst [vmem:[%s1034_s27 + $0x38] sm:$0xff] %v820_v32   ;;  %v815_v34 = vpack.c.bf16 %v428_v33, %v425_v30 }
  0xf2   : > { %827 = vst [vmem:[%s1034_s27 + $0x30] sm:$0xff] %v815_v34   ;;  %876 = vmatpush3.xpose.msra.mxu1 %v871_v29 }
  0xf3   : > { %877 = vmatprep.subr.mxu1 %v967_v10 }
  0xf6   : > { %878 = vmatpush3.xpose.msra.mxu1 %v428_v33 }
  0xf7   : > { %879 = vmatprep.subr.mxu1 %v967_v10 }
  0xfa   : > { %880 = vmatpush3.xpose.msra.mxu1 %v425_v30 }
  0xfb   : > { %881 = vmatprep.subr.mxu1 %v967_v10 }
  0xfe   : > { %882 = vmatpush3.xpose.msra.mxu1 %v868_v25 }
  0xff   : > { %883 = vmatprep.subr.mxu1 %v967_v10 }
 0x102   : > { %884 = vmatpush3.xpose.msra.mxu1 %v867_v23 }
 0x103   : > { %885 = vmatprep.subr.mxu1 %v967_v10 }
 0x106   : > { %886 = vmatpush3.xpose.msra.mxu1 %v412_v27 }
 0x107   : > { %887 = vmatprep.subr.mxu1 %v967_v10 }
 0x10a   : > { %888 = vmatpush3.xpose.msra.mxu1 %v409_v24 }
 0x10b   : > { %889 = vmatprep.subr.mxu1 %v967_v10 }
 0x10e   : > { %890 = vmatpush3.xpose.msra.mxu1 %v864_v19 }
 0x10f   : > { %891 = vmatprep.subr.mxu1 %v967_v10 }
 0x112   : > { %892 = vmatpush3.xpose.msra.mxu1 %v863_v17 }
 0x113   : > { %893 = vmatprep.subr.mxu1 %v967_v10 }
 0x116   : > { %894 = vmatpush3.xpose.msra.mxu1 %v396_v21 }
 0x117   : > { %895 = vmatprep.subr.mxu1 %v967_v10 }
 0x11a   : > { %896 = vmatpush3.xpose.msra.mxu1 %v393_v18 }
 0x11b   : > { %897 = vmatprep.subr.mxu1 %v967_v10 }
 0x11e   : > { %898 = vmatpush3.xpose.msra.mxu1 %v860_v13 }
 0x11f   : > { %899 = vmatprep.subr.mxu1 %v967_v10 }
 0x122   : > { %900 = vmatpush3.xpose.msra.mxu1 %v859_v11 }
 0x123   : > { %901 = vmatprep.subr.mxu1 %v967_v10 }
 0x126   : > { %902 = vmatpush3.xpose.msra.mxu1 %v380_v15 }
 0x127   : > { %903 = vmatprep.subr.mxu1 %v967_v10 }
 0x12a   : > { %904 = vmatpush3.xpose.msra.mxu1 %v377_v12 }
 0x12d   : > { %906 = vmatmul.mubr.f32.vlgmr.msra.gmra.mxu1 %v440_v35 }
 0x1ed   : > { %v507_v36 = vpop.f32.mrf.mxu1 }
 0x1ee   : > { %591 = vst [vmem:[%s255_s7] sm:$0xff] %v507_v36 }
 0x1ef   : > { %v907_v37 = vpop.f32.mrf.mxu1 }
 0x1f0 PF: > { %s15_s17 = sadd.s32 1, %s965_s17   ;;  %s1080_s15 = smov %s961_s16 }
 0x1f1   : > { %p12_p5 = scmp.ge.s32.totalorder %s15_s17, 6   ;;  %s1081_s16 = smov %s1083_s18 }
 0x1f3   :  { %14 = sbr.rel (!%p12_p5) target bundleno = 2 (0x2), region = 74 }

// kernel: dgnn_forward.7
= control target key start
LH: loop header
LB: loop body
LE: loop exit
PB: predicated region body
PF: predicated region fallthrough
CT: control target
= control target key end

     0   :  { %v618_v0 = vmov 1   ;;  %v619_v1 = vmov 0   ;;  %v620_v5 = vmov 0.0   ;;  %vm621_vm0 = vmmov 0   ;;  %s788_s0 = inlined_call_operand.vmem [shape: s32[16,2], index: 0, kind: input, shape index: {}]   ;;  %s789_s1 = inlined_call_operand.vmem [shape: bf16[128,128], index: 1, kind: input, shape index: {}]   ;;  %s790_s2 = inlined_call_operand.vmem [shape: bf16[128,128], index: 2, kind: input, shape index: {}]   ;;  %s791_s4 = inlined_call_operand.vmem [shape: bf16[128,128], index: 4, kind: input, shape index: {}]   ;;  %s792_s3 = inlined_call_operand.vmem [shape: f32[1,128], index: 3, kind: input, shape index: {}]   ;;  %s793_s5 = inlined_call_operand.vmem [shape: f32[1,128], index: 5, kind: input, shape index: {}]   ;;  %s794_s6 = inlined_call_operand.vmem [shape: f32[16,128], index: 6, kind: output, shape index: {}]  }
   0x1   :  { %592 = vset.pattern.permute.xlu1 %v618_v0  ;;  %591 = vset.pattern.permute.xlu0 %v619_v1  ;;  %v24_v2 = vld [vmem:[%s788_s0] sm:$0xff]  ;;  %v594_v3 = vld [vmem:[%s789_s1 + $0x38] sm:$0xff]   ;;  %v25_v4 = vld [vmem:[%s788_s0 + $0x8] sm:$0xff]  ;;  %v26_v13 = vlaneseq  ;;  %v622_v20 = vmov 1.0|1.0  }
   0x2   :  { %42 = vperm.xlu1 %592, %v24_v2   ;;  %29 = vperm.xlu0 %591, %v24_v2   ;;  %v595_v6 = vld [vmem:[%s789_s1 + $0x30] sm:$0xff]   ;;  %v596_v7 = vld [vmem:[%s789_s1 + $0x28] sm:$0xff]   ;;  %v597_v8 = vld [vmem:[%s789_s1 + $0x20] sm:$0xff]  }
   0x3   :  { %506 = vmatprep.subr.bf16.mxu0 %v620_v5  ;;  %526 = vmatprep.subr.bf16.mxu1 %v620_v5  ;;  %v598_v9 = vld [vmem:[%s789_s1 + $0x18] sm:$0xff]   ;;  %v599_v10 = vld [vmem:[%s789_s1 + $0x10] sm:$0xff]   ;;  %v600_v11 = vld [vmem:[%s789_s1 + $0x8] sm:$0xff]   ;;  %v27_v16 = vand.u32 127, %v26_v13 }
   0x4   :  { %507 = vmatpush3.bf16.msra.mxu0 %v594_v3  ;;  %527 = vmatpush3.bf16.msra.mxu1 %v594_v3  ;;  %v601_v12 = vld [vmem:[%s789_s1] sm:$0xff]   ;;  %v602_v19 = vld [vmem:[%s790_s2 + $0x38] sm:$0xff]   ;;  %v603_v21 = vld [vmem:[%s790_s2 + $0x30] sm:$0xff]  }
   0x5   :  { %508 = vmatprep.subr.bf16.mxu0 %v620_v5  ;;  %528 = vmatprep.subr.bf16.mxu1 %v620_v5  ;;  %v604_v22 = vld [vmem:[%s790_s2 + $0x28] sm:$0xff]   ;;  %v605_v23 = vld [vmem:[%s790_s2 + $0x20] sm:$0xff]   ;;  %v606_v24 = vld [vmem:[%s790_s2 + $0x18] sm:$0xff]  }
   0x6   :  { %45 = vperm.xlu1 %592, %v25_v4   ;;  %32 = vperm.xlu0 %591, %v25_v4   ;;  %v607_v25 = vld [vmem:[%s790_s2 + $0x10] sm:$0xff]   ;;  %v608_v26 = vld [vmem:[%s790_s2 + $0x8] sm:$0xff]   ;;  %v609_v27 = vld [vmem:[%s790_s2] sm:$0xff]  }
   0x7   :  { %522 = vmatprep.mubr.msk.bf16.mxu0 %vm621_vm0, %v620_v5  ;;  %542 = vmatprep.mubr.msk.bf16.mxu1 %vm621_vm0, %v620_v5  ;;  %v610_v28 = vld [vmem:[%s791_s4 + $0x38] sm:$0xff]   ;;  %v611_v29 = vld [vmem:[%s791_s4 + $0x30] sm:$0xff]   ;;  %v612_v30 = vld [vmem:[%s791_s4 + $0x28] sm:$0xff]  }
   0x8   :  { %509 = vmatpush3.bf16.msra.mxu0 %v595_v6  ;;  %529 = vmatpush3.bf16.msra.mxu1 %v595_v6  ;;  %v613_v31 = vld [vmem:[%s791_s4 + $0x20] sm:$0xff]   ;;  %v614_v32 = vld [vmem:[%s791_s4 + $0x18] sm:$0xff]   ;;  %v615_v44 = vld [vmem:[%s791_s4 + $0x10] sm:$0xff]  }
   0x9   :  { %510 = vmatprep.subr.bf16.mxu0 %v620_v5  ;;  %530 = vmatprep.subr.bf16.mxu1 %v620_v5  ;;  %v616_v45 = vld [vmem:[%s791_s4 + $0x8] sm:$0xff]   ;;  %v617_v46 = vld [vmem:[%s791_s4] sm:$0xff]  }
   0xa   :  { %593 = vset.pattern.permute.xlu0 %v618_v0  ;;  %v452_v47 = vld [vmem:[%s792_s3] ss:$0 sm:$0xff] }
   0xb   :  { %v461_v57 = vld [vmem:[%s793_s5] ss:$0 sm:$0xff] }
   0xc   :  { %511 = vmatpush3.bf16.msra.mxu0 %v596_v7  ;;  %531 = vmatpush3.bf16.msra.mxu1 %v596_v7 }
   0xd   :  { %512 = vmatprep.subr.bf16.mxu0 %v620_v5  ;;  %532 = vmatprep.subr.bf16.mxu1 %v620_v5 }
  0x10   :  { %513 = vmatpush3.bf16.msra.mxu0 %v597_v8  ;;  %533 = vmatpush3.bf16.msra.mxu1 %v597_v8 }
  0x11   :  { %514 = vmatprep.subr.bf16.mxu0 %v620_v5  ;;  %534 = vmatprep.subr.bf16.mxu1 %v620_v5 }
  0x14   :  { %515 = vmatpush3.bf16.msra.mxu0 %v598_v9  ;;  %535 = vmatpush3.bf16.msra.mxu1 %v598_v9 }
  0x15   :  { %516 = vmatprep.subr.bf16.mxu0 %v620_v5  ;;  %536 = vmatprep.subr.bf16.mxu1 %v620_v5 }
  0x18   :  { %517 = vmatpush3.bf16.msra.mxu0 %v599_v10  ;;  %537 = vmatpush3.bf16.msra.mxu1 %v599_v10 }
  0x19   :  { %518 = vmatprep.subr.bf16.mxu0 %v620_v5  ;;  %538 = vmatprep.subr.bf16.mxu1 %v620_v5 }
  0x1c   :  { %519 = vmatpush3.bf16.msra.mxu0 %v600_v11  ;;  %539 = vmatpush3.bf16.msra.mxu1 %v600_v11 }
  0x1d   :  { %520 = vmatprep.subr.bf16.mxu0 %v620_v5  ;;  %540 = vmatprep.subr.bf16.mxu1 %v620_v5 }
  0x20   :  { %521 = vmatpush3.bf16.msra.mxu0 %v601_v12  ;;  %541 = vmatpush3.bf16.msra.mxu1 %v601_v12 }
  0x21   :  { %546 = vmatprep.subr.bf16.mxu0 %v620_v5  ;;  %566 = vmatprep.subr.bf16.mxu1 %v620_v5 }
  0x7d   :  { %v43_v14 = vpop.permute.xlu1 %42  ;;  %v30_v15 = vpop.permute.xlu0 %29 }
  0x7e   :  { %vm47_vm1 = vcmp.eq.s32.totalorder %v43_v14, %v27_v16  ;;  %vm34_vm4 = vcmp.eq.s32.totalorder %v30_v15, %v27_v16 }
  0x81   :  { %v46_v17 = vpop.permute.xlu1 %45  ;;  %v33_v18 = vpop.permute.xlu0 %32 }
  0x82   :  { %vm48_vm2 = vcmp.eq.s32.totalorder %v46_v17, %v27_v16  ;;  %vm35_vm3 = vcmp.eq.s32.totalorder %v33_v18, %v27_v16 }
  0x83   :  { %vm450_vm5 = vmpackc.low %vm48_vm2, %vm47_vm1 }
  0x84   :  { %vm448_vm6 = vmpackc.low %vm35_vm3, %vm34_vm4  ;;  %543 = vmatmul.mubr.msk.bf16.vlgmr.msra.gmra.mxu1 %vm450_vm5, %v622_v20 }
  0x85   :  { %523 = vmatmul.mubr.msk.bf16.vlgmr.msra.gmra.mxu0 %vm448_vm6, %v622_v20  ;;  %582 = vmatprep.mubr.msk.bf16.mxu1 %vm621_vm0, %v620_v5 }
  0x86   :  { %547 = vmatpush3.bf16.msra.mxu0 %v602_v19  ;;  %562 = vmatprep.mubr.msk.bf16.mxu0 %vm621_vm0, %v620_v5 }
  0x87   :  { %548 = vmatprep.subr.bf16.mxu0 %v620_v5  ;;  %567 = vmatpush3.bf16.msra.mxu1 %v610_v28 }
  0x88   :  { %568 = vmatprep.subr.bf16.mxu1 %v620_v5 }
  0x8a   :  { %549 = vmatpush3.bf16.msra.mxu0 %v603_v21 }
  0x8b   :  { %550 = vmatprep.subr.bf16.mxu0 %v620_v5  ;;  %569 = vmatpush3.bf16.msra.mxu1 %v611_v29 }
  0x8c   :  { %570 = vmatprep.subr.bf16.mxu1 %v620_v5 }
  0x8e   :  { %551 = vmatpush3.bf16.msra.mxu0 %v604_v22 }
  0x8f   :  { %552 = vmatprep.subr.bf16.mxu0 %v620_v5  ;;  %571 = vmatpush3.bf16.msra.mxu1 %v612_v30 }
  0x90   :  { %572 = vmatprep.subr.bf16.mxu1 %v620_v5 }
  0x92   :  { %553 = vmatpush3.bf16.msra.mxu0 %v605_v23 }
  0x93   :  { %554 = vmatprep.subr.bf16.mxu0 %v620_v5  ;;  %573 = vmatpush3.bf16.msra.mxu1 %v613_v31 }
  0x94   :  { %574 = vmatprep.subr.bf16.mxu1 %v620_v5 }
  0x96   :  { %555 = vmatpush3.bf16.msra.mxu0 %v606_v24 }
  0x97   :  { %556 = vmatprep.subr.bf16.mxu0 %v620_v5  ;;  %575 = vmatpush3.bf16.msra.mxu1 %v614_v32 }
  0x98   :  { %576 = vmatprep.subr.bf16.mxu1 %v620_v5 }
  0x9a   :  { %557 = vmatpush3.bf16.msra.mxu0 %v607_v25 }
  0x9b   :  { %558 = vmatprep.subr.bf16.mxu0 %v620_v5  ;;  %577 = vmatpush3.bf16.msra.mxu1 %v615_v44 }
  0x9c   :  { %578 = vmatprep.subr.bf16.mxu1 %v620_v5 }
  0x9e   :  { %559 = vmatpush3.bf16.msra.mxu0 %v608_v26 }
  0x9f   :  { %560 = vmatprep.subr.bf16.mxu0 %v620_v5  ;;  %579 = vmatpush3.bf16.msra.mxu1 %v616_v45 }
  0xa0   :  { %580 = vmatprep.subr.bf16.mxu1 %v620_v5 }
  0xa2   :  { %561 = vmatpush3.bf16.msra.mxu0 %v609_v27 }
  0xa3   :  { %581 = vmatpush3.bf16.msra.mxu1 %v617_v46 }
 0x144   :  { %v193_v33 = vpop.f32.mrf.mxu1 }
 0x145   :  { %v152_v34 = vpop.f32.mrf.mxu0 }
 0x146   :  { %v544_v35 = vpop.f32.mrf.mxu1  ;;  %v200_v39 = vmul.f32 %v193_v33, %v152_v34 }
 0x147   :  { %v524_v36 = vpop.f32.mrf.mxu0 }
 0x148   :  { %v196_v37 = vpop.f32.mrf.mxu1 }
 0x149   :  { %v155_v38 = vpop.f32.mrf.mxu0 }
 0x14a   :  { %v201_v40 = vmul.f32 %v196_v37, %v155_v38  ;;  %v545_v41 = vpop.f32.mrf.mxu1 }
 0x14b   :  { %v525_v42 = vpop.f32.mrf.mxu0 }
 0x14c   :  { %v202_v43 = vpack.c.bf16 %v201_v40, %v200_v39 }
 0x14e   :  { %563 = vmatmul.mubr.bf16.vlgmr.msra.gmra.mxu0 %v202_v43 }
 0x20e   :  { %v308_v48 = vpop.f32.mrf.mxu0 }
 0x20f   :  { %v309_v50 = vadd.f32 %v452_v47, %v308_v48 }
 0x210   :  { %v564_v49 = vpop.f32.mrf.mxu0 }
 0x211   :  { %v315_v54 = vmax.f32 %v309_v50, 0.0 }
 0x212   :  { %v311_v51 = vpop.f32.mrf.mxu0 }
 0x213   :  { %v312_v52 = vadd.f32 %v452_v47, %v311_v51 }
 0x214   :  { %v565_v53 = vpop.f32.mrf.mxu0 }
 0x215   :  { %v316_v55 = vmax.f32 %v312_v52, 0.0 }
 0x217   :  { %v317_v56 = vpack.c.bf16 %v316_v55, %v315_v54 }
 0x219   :  { %583 = vmatmul.mubr.bf16.vlgmr.msra.gmra.mxu1 %v317_v56 }
 0x2d9   :  { %v423_v58 = vpop.f32.mrf.mxu1 }
 0x2da   :  { %v424_v59 = vadd.f32 %v461_v57, %v423_v58 }
 0x2db   :  { %v584_v60 = vpop.f32.mrf.mxu1 }
 0x2dc   :  { %430 = vst [vmem:[%s794_s6] sm:$0xff] %v424_v59 }
 0x2dd   :  { %v426_v61 = vpop.f32.mrf.mxu1 }
 0x2de   :  { %v427_v62 = vadd.f32 %v461_v57, %v426_v61 }
 0x2df   :  { %v585_v63 = vpop.f32.mrf.mxu1 }
 0x2e0   :  { %431 = vst [vmem:[%s794_s6 + $0x8] sm:$0xff] %v427_v62 }

// kernel: dgnn_forward.5
= control target key start
LH: loop header
LB: loop body
LE: loop exit
PB: predicated region body
PF: predicated region fallthrough
CT: control target
= control target key end

     0   :  { %s1490_s15 = smov 0   ;;  %s1492_s16 = smov 0   ;;  %s1783_s0 = inlined_call_operand.vmem [shape: bf16[4,128,128], index: 0, kind: input, shape index: {}]   ;;  %s1784_s1 = inlined_call_operand.vmem [shape: f32[4,8,128], index: 1, kind: input, shape index: {}]   ;;  %s1785_s2 = inlined_call_operand.vmem [shape: s8[4,128,128], index: 2, kind: input, shape index: {}]   ;;  %s1786_s3 = inlined_call_operand.vmem [shape: f32[2,128], index: 3, kind: input, shape index: {}]   ;;  %s1787_s4 = inlined_call_operand.vmem [shape: bf16[4,128,128], index: 4, kind: output, shape index: {}]  }
   0x1   :  { %s1494_s17 = smov 0  }
   0x2 LB: > { %s26_s18 = sadd.s32 1, %s1459_s16  ;;  %p1092_p0 = scmp.ge.s32.totalorder %s1463_s17, 1  ;;  %s1463_s17 = sphi %s1494_s17, %s14_s17   ;;  %s1459_s16 = sphi %s1492_s16, %s1797_s16   ;;  %s1455_s15 = sphi %s1490_s15, %s1796_s15  }
   0x3   : > { %p28_p1 = scmp.ge.s32.totalorder %s26_s18, 4  ;;  %p202_p2 = scmp.lt.s32.totalorder %s1463_s17, 5 }
   0x5   : > { %s1799_s18 = smov (%p28_p1, %s26_s18), 0  ;;  %p203_p3 = pnand %p1092_p0, %p202_p2 }
   0x6   : > { %p245_p4 = scmp.lt.s32.totalorder (!%p203_p3), %s1455_s15, 3 }
   0x7   : > { %206 = sbr.rel (%p203_p3) target bundleno = 584 (0x248), region = 36 }
   0xc   : > { %s1801_s15 = smov (!%p245_p4, %s1455_s15), 3  ;;  %v1100_v1 = vld [vmem:[%s1786_s3] ss:$0 sm:$0xff] }
   0xd   : > { %s1144_s19 = sshll.u32 %s1801_s15, 6  ;;  %s1145_s25 = sshll.u32 %s1801_s15, 5 }
   0xe   : > { %s1516_s22 = scalar_lea.vmem %s1783_s0, %s1144_s19  ;;  %s1095_s26 = sshll.u32 %s1801_s15, 3 }
   0xf   : > { %v1164_v0 = vld [vmem:[%s1516_s22] sm:$0xff]   ;;  %v1235_v7 = vld [vmem:[%s1516_s22 + $0x8] sm:$0xff]   ;;  %v1236_v19 = vld [vmem:[%s1516_s22 + $0x10] sm:$0xff]   ;;  %s1534_s29 = scalar_lea.vmem %s1785_s2, %s1145_s25  ;;  %s253_s6 = scalar_lea.vmem %s1784_s1, %s1095_s26 }
  0x10   : > { %v1238_v2 = vld [vmem:[%s1516_s22 + $0x20] sm:$0xff]   ;;  %v1165_v3 = vunpack.c.l.bf16 %v1164_v0  ;;  %v1166_v5 = vunpack.c.h.bf16 %v1164_v0  ;;  %v1239_v10 = vld [vmem:[%s1516_s22 + $0x28] sm:$0xff]   ;;  %v1169_v13 = vunpack.c.l.bf16 %v1235_v7  ;;  %v1170_v14 = vunpack.c.h.bf16 %v1235_v7  ;;  %v1240_v24 = vld [vmem:[%s1516_s22 + $0x30] sm:$0xff]   ;;  %s1728_s9 = scalar_lea.vmem %s1787_s4, %s1144_s19 }
  0x11   : > { %v1181_v4 = vunpack.c.l.bf16 %v1238_v2  ;;  %v1182_v6 = vunpack.c.h.bf16 %v1238_v2  ;;  %v1185_v17 = vunpack.c.l.bf16 %v1239_v10  ;;  %v1186_v18 = vunpack.c.h.bf16 %v1239_v10  ;;  %v1237_v29 = vld [vmem:[%s1516_s22 + $0x18] sm:$0xff]   ;;  %v434_v41 = vld [vmem:[%s1534_s29] sm:$0xff]  ;;  %v1543_v43 = vld [vmem:[%s1534_s29 + $0x10] sm:$0xff] }
  0x12   : > { %v333_v8 = vmul.f32 %v1165_v3, %v1100_v1  ;;  %v334_v11 = vmul.f32 %v1166_v5, %v1100_v1  ;;  %v335_v15 = vmul.f32 %v1169_v13, %v1100_v1  ;;  %v336_v16 = vmul.f32 %v1170_v14, %v1100_v1  ;;  %v1241_v34 = vld [vmem:[%s1516_s22 + $0x38] sm:$0xff]   ;;  %v1540_v42 = vld [vmem:[%s253_s6] ss:$0 sm:$0xff] }
  0x13   : > { %v341_v9 = vmul.f32 %v1181_v4, %v1100_v1  ;;  %v342_v12 = vmul.f32 %v1182_v6, %v1100_v1  ;;  %v343_v20 = vmul.f32 %v1185_v17, %v1100_v1  ;;  %v344_v21 = vmul.f32 %v1186_v18, %v1100_v1  ;;  %v1566_v17 = vld [vmem:[%s1534_s29 + $0x8] sm:$0xff] }
  0x14   : > { %349 = vadd.xlane.f32.xlu0 %v333_v8  ;;  %v1173_v22 = vunpack.c.l.bf16 %v1236_v19  ;;  %v1174_v23 = vunpack.c.h.bf16 %v1236_v19  ;;  %v1189_v27 = vunpack.c.l.bf16 %v1240_v24  ;;  %v1190_v28 = vunpack.c.h.bf16 %v1240_v24 }
  0x15   : > { %365 = vadd.xlane.f32.xlu1 %v341_v9  ;;  %v1177_v32 = vunpack.c.l.bf16 %v1237_v29  ;;  %v1178_v33 = vunpack.c.h.bf16 %v1237_v29  ;;  %v1193_v37 = vunpack.c.l.bf16 %v1241_v34  ;;  %v1194_v38 = vunpack.c.h.bf16 %v1241_v34 }
  0x16   : > { %v337_v25 = vmul.f32 %v1173_v22, %v1100_v1  ;;  %v338_v26 = vmul.f32 %v1174_v23, %v1100_v1  ;;  %v345_v30 = vmul.f32 %v1189_v27, %v1100_v1  ;;  %v346_v31 = vmul.f32 %v1190_v28, %v1100_v1  ;;  %v1337_v28 = vld [vmem:[%s1516_s22 + $0x38] sm:$0xff]  }
  0x17   : > { %v339_v35 = vmul.f32 %v1177_v32, %v1100_v1  ;;  %v340_v36 = vmul.f32 %v1178_v33, %v1100_v1  ;;  %v347_v39 = vmul.f32 %v1193_v37, %v1100_v1  ;;  %v348_v40 = vmul.f32 %v1194_v38, %v1100_v1  ;;  %v1584_v32 = vld [vmem:[%s1534_s29 + $0x18] sm:$0xff]  ;;  %1265 = vmatprep.subr.bf16.mxu0 %v1337_v28 }
  0x18   : > { %351 = vadd.xlane.f32.xlu0 %v334_v11  ;;  %v438_v46 = vunpack.c.0.s8 %v434_v41  ;;  %v446_v49 = vunpack.c.0.s8 %v1543_v43  ;;  %v439_v54 = vunpack.c.1.s8 %v434_v41  ;;  %v447_v59 = vunpack.c.1.s8 %v1543_v43  ;;  %1297 = vmatprep.subr.bf16.mxu1 %v1337_v28 }
  0x19   : > { %367 = vadd.xlane.f32.xlu1 %v342_v12  ;;  %v440_v1 = vunpack.c.2.s8 %v434_v41  ;;  %v441_v7 = vunpack.c.3.s8 %v434_v41  ;;  %v448_v13 = vunpack.c.2.s8 %v1543_v43  ;;  %v442_v27 = vunpack.c.0.s8 %v1566_v17  ;;  %1266 = vmatpush3.bf16.msra.mxu0 %v1337_v28 }
  0x1a   : > { %vm454_vm0 = vcmp.gt.s32.totalorder %v438_v46, 0  ;;  %vm462_vm1 = vcmp.gt.s32.totalorder %v446_v49, 0  ;;  %vm455_vm2 = vcmp.gt.s32.totalorder %v439_v54, 0  ;;  %vm463_vm3 = vcmp.gt.s32.totalorder %v447_v59, 0  ;;  %1305 = vmatpush3.bf16.msra.mxu1 %v1337_v28 }
  0x1b   : > { %vm456_vm4 = vcmp.gt.s32.totalorder %v440_v1, 0  ;;  %vm1570_vm5 = vcmp.gt.s32.totalorder %v441_v7, 0  ;;  %vm464_vm6 = vcmp.gt.s32.totalorder %v448_v13, 0  ;;  %vm458_vm8 = vcmp.gt.s32.totalorder %v442_v27, 0  ;;  %v1342_v27 = vld [vmem:[%s1516_s22 + $0x10] sm:$0xff]  }
  0x1c   : > { %353 = vadd.xlane.f32.xlu0 %v335_v15 }
  0x1d   : > { %355 = vadd.xlane.f32.xlu1 %v336_v16 }
  0x20   : > { %369 = vadd.xlane.f32.xlu0 %v343_v20 }
  0x21   : > { %371 = vadd.xlane.f32.xlu1 %v344_v21  ;;  %v449_v21 = vunpack.c.3.s8 %v1543_v43  ;;  %v450_v43 = vunpack.c.0.s8 %v1584_v32 }
  0x23   : > { %vm1590_vm7 = vcmp.gt.s32.totalorder %v449_v21, 0  ;;  %vm466_vm10 = vcmp.gt.s32.totalorder %v450_v43, 0 }
  0x24   : > { %357 = vadd.xlane.f32.xlu0 %v337_v25 }
  0x25   : > { %359 = vadd.xlane.f32.xlu1 %v338_v26 }
  0x28   : > { %373 = vadd.xlane.f32.xlu0 %v345_v30 }
  0x29   : > { %375 = vadd.xlane.f32.xlu1 %v346_v31 }
  0x2c   : > { %361 = vadd.xlane.f32.xlu0 %v339_v35 }
  0x2d   : > { %363 = vadd.xlane.f32.xlu1 %v340_v36  ;;  %v443_v36 = vunpack.c.1.s8 %v1566_v17 }
  0x2f   : > { %vm1607_vm9 = vcmp.gt.s32.totalorder %v443_v36, 0 }
  0x30   : > { %377 = vadd.xlane.f32.xlu0 %v347_v39 }
  0x31   : > { %379 = vadd.xlane.f32.xlu1 %v348_v40 }
  0x9d   : > { %v350_v44 = vpop.xlane.xlu0 %349 }
  0x9e   : > { %v366_v45 = vpop.xlane.xlu1 %365  ;;  %v386_v47 = vadd.f32 %v1540_v42, %v350_v44 }
  0x9f   : > { %v394_v48 = vadd.f32 %v1540_v42, %v366_v45 }
  0xa0   : > { %v402_v50 = vmul.f32 0.2, %v386_v47 }
  0xa1   : > { %v410_v51 = vmul.f32 0.2, %v394_v48  ;;  %v352_v52 = vpop.xlane.xlu0 %351 }
  0xa2   : > { %v368_v53 = vpop.xlane.xlu1 %367  ;;  %v387_v55 = vadd.f32 %v1540_v42, %v352_v52  ;;  %v418_v57 = vmax.f32 %v386_v47, %v402_v50  ;;  %v1338_v47 = vld [vmem:[%s1516_s22 + $0x30] sm:$0xff]  }
  0xa3   : > { %v395_v56 = vadd.f32 %v1540_v42, %v368_v53  ;;  %v426_v58 = vmax.f32 %v394_v48, %v410_v51  ;;  %v451_v51 = vunpack.c.1.s8 %v1584_v32  ;;  %1267 = vmatprep.subr.bf16.mxu0 %v1338_v47  ;;  %1298 = vmatprep.subr.bf16.mxu1 %v1338_v47 }
  0xa4   : > { %v403_v60 = vmul.f32 0.2, %v387_v55  ;;  %v1551_v62 = vsel %vm454_vm0, %v418_v57, -1e+30  ;;  %v444_v57 = vunpack.c.2.s8 %v1566_v17  ;;  %1268 = vmatpush3.bf16.msra.mxu0 %v1338_v47  ;;  %1306 = vmatpush3.bf16.msra.mxu1 %v1338_v47 }
  0xa5   : > { %v411_v61 = vmul.f32 0.2, %v395_v56  ;;  %486 = vmax.xlane.f32.xlu0 %v1551_v62  ;;  %v354_v63 = vpop.xlane.xlu0 %353  ;;  %v1556_v5 = vsel %vm462_vm1, %v426_v58, -1e+30  ;;  %vm1624_vm11 = vcmp.gt.s32.totalorder %v451_v51, 0 }
  0xa6   : > { %v356_v0 = vpop.xlane.xlu1 %355  ;;  %v388_v2 = vadd.f32 %v1540_v42, %v354_v63  ;;  %v419_v4 = vmax.f32 %v387_v55, %v403_v60  ;;  %vm460_vm12 = vcmp.gt.s32.totalorder %v444_v57, 0 }
  0xa7   : > { %v389_v3 = vadd.f32 %v1540_v42, %v356_v0  ;;  %v427_v6 = vmax.f32 %v395_v56, %v411_v61  ;;  %v1339_v61 = vld [vmem:[%s1516_s22 + $0x28] sm:$0xff]  }
  0xa8   : > { %v404_v8 = vmul.f32 0.2, %v388_v2  ;;  %v1558_v10 = vsel %vm455_vm2, %v419_v4, -1e+30  ;;  %1269 = vmatprep.subr.bf16.mxu0 %v1339_v61  ;;  %1299 = vmatprep.subr.bf16.mxu1 %v1339_v61 }
  0xa9   : > { %v405_v9 = vmul.f32 0.2, %v389_v3  ;;  %502 = vmax.xlane.f32.xlu0 %v1556_v5  ;;  %488 = vmax.xlane.f32.xlu1 %v1558_v10  ;;  %v370_v11 = vpop.xlane.xlu0 %369  ;;  %v1568_v18 = vsel %vm463_vm3, %v427_v6, -1e+30 }
  0xaa   : > { %v372_v12 = vpop.xlane.xlu1 %371  ;;  %v396_v14 = vadd.f32 %v1540_v42, %v370_v11  ;;  %v420_v16 = vmax.f32 %v388_v2, %v404_v8  ;;  %v445_v8 = vunpack.c.3.s8 %v1566_v17  ;;  %1270 = vmatpush3.bf16.msra.mxu0 %v1339_v61  ;;  %1307 = vmatpush3.bf16.msra.mxu1 %v1339_v61 }
  0xab   : > { %v397_v15 = vadd.f32 %v1540_v42, %v372_v12  ;;  %v421_v19 = vmax.f32 %v389_v3, %v405_v9  ;;  %v452_v9 = vunpack.c.2.s8 %v1584_v32 }
  0xac   : > { %v412_v22 = vmul.f32 0.2, %v396_v14  ;;  %v1575_v24 = vsel %vm456_vm4, %v420_v16, -1e+30  ;;  %vm461_vm13 = vcmp.gt.s32.totalorder %v445_v8, 0 }
  0xad   : > { %v413_v23 = vmul.f32 0.2, %v397_v15  ;;  %504 = vmax.xlane.f32.xlu1 %v1568_v18  ;;  %490 = vmax.xlane.f32.xlu0 %v1575_v24  ;;  %v358_v25 = vpop.xlane.xlu0 %357  ;;  %v1588_v33 = vsel %vm1570_vm5, %v421_v19, -1e+30  ;;  %vm468_vm14 = vcmp.gt.s32.totalorder %v452_v9, 0 }
  0xae   : > { %v360_v26 = vpop.xlane.xlu1 %359  ;;  %v390_v29 = vadd.f32 %v1540_v42, %v358_v25  ;;  %v428_v31 = vmax.f32 %v396_v14, %v412_v22  ;;  %v1340_v14 = vld [vmem:[%s1516_s22 + $0x20] sm:$0xff]   ;;  %v1341_v22 = vld [vmem:[%s1516_s22 + $0x18] sm:$0xff]  }
  0xaf   : > { %v391_v30 = vadd.f32 %v1540_v42, %v360_v26  ;;  %v429_v34 = vmax.f32 %v397_v15, %v413_v23  ;;  %1271 = vmatprep.subr.bf16.mxu0 %v1340_v14  ;;  %1300 = vmatprep.subr.bf16.mxu1 %v1340_v14 }
  0xb0   : > { %v406_v37 = vmul.f32 0.2, %v390_v29  ;;  %v1595_v39 = vsel %vm464_vm6, %v428_v31, -1e+30  ;;  %1272 = vmatpush3.bf16.msra.mxu0 %v1340_v14  ;;  %1308 = vmatpush3.bf16.msra.mxu1 %v1340_v14 }
  0xb1   : > { %v407_v38 = vmul.f32 0.2, %v391_v30  ;;  %492 = vmax.xlane.f32.xlu1 %v1588_v33  ;;  %506 = vmax.xlane.f32.xlu0 %v1595_v39  ;;  %v374_v40 = vpop.xlane.xlu0 %373  ;;  %v1605_v48 = vsel %vm1590_vm7, %v429_v34, -1e+30 }
  0xb2   : > { %v376_v41 = vpop.xlane.xlu1 %375  ;;  %v398_v44 = vadd.f32 %v1540_v42, %v374_v40  ;;  %v422_v46 = vmax.f32 %v390_v29, %v406_v37  ;;  %1273 = vmatprep.subr.bf16.mxu0 %v1341_v22  ;;  %1301 = vmatprep.subr.bf16.mxu1 %v1341_v22  ;;  %v1343_v29 = vld [vmem:[%s1516_s22 + $0x8] sm:$0xff]  }
  0xb3   : > { %v399_v45 = vadd.f32 %v1540_v42, %v376_v41  ;;  %v423_v49 = vmax.f32 %v391_v30, %v407_v38  ;;  %v1344_v30 = vld [vmem:[%s1516_s22] sm:$0xff]  }
  0xb4   : > { %v414_v52 = vmul.f32 0.2, %v398_v44  ;;  %v1612_v54 = vsel %vm458_vm8, %v422_v46, -1e+30  ;;  %1274 = vmatpush3.bf16.msra.mxu0 %v1341_v22  ;;  %1309 = vmatpush3.bf16.msra.mxu1 %v1341_v22 }
  0xb5   : > { %v415_v53 = vmul.f32 0.2, %v399_v45  ;;  %508 = vmax.xlane.f32.xlu1 %v1605_v48  ;;  %494 = vmax.xlane.f32.xlu0 %v1612_v54  ;;  %v362_v55 = vpop.xlane.xlu0 %361  ;;  %v1622_v63 = vsel %vm1607_vm9, %v423_v49, -1e+30 }
  0xb6   : > { %v364_v56 = vpop.xlane.xlu1 %363  ;;  %v392_v58 = vadd.f32 %v1540_v42, %v362_v55  ;;  %v430_v60 = vmax.f32 %v398_v44, %v414_v52  ;;  %1275 = vmatprep.subr.bf16.mxu0 %v1342_v27  ;;  %1302 = vmatprep.subr.bf16.mxu1 %v1342_v27 }
  0xb7   : > { %v393_v59 = vadd.f32 %v1540_v42, %v364_v56  ;;  %v431_v0 = vmax.f32 %v399_v45, %v415_v53 }
  0xb8   : > { %v408_v2 = vmul.f32 0.2, %v392_v58  ;;  %v1628_v4 = vsel %vm466_vm10, %v430_v60, -1e+30  ;;  %1276 = vmatpush3.bf16.msra.mxu0 %v1342_v27  ;;  %1310 = vmatpush3.bf16.msra.mxu1 %v1342_v27 }
  0xb9   : > { %v409_v3 = vmul.f32 0.2, %v393_v59  ;;  %496 = vmax.xlane.f32.xlu1 %v1622_v63  ;;  %510 = vmax.xlane.f32.xlu0 %v1628_v4  ;;  %v378_v6 = vpop.xlane.xlu0 %377  ;;  %v1639_v15 = vsel %vm1624_vm11, %v431_v0, -1e+30 }
  0xba   : > { %v380_v7 = vpop.xlane.xlu1 %379  ;;  %v400_v11 = vadd.f32 %v1540_v42, %v378_v6  ;;  %v424_v13 = vmax.f32 %v392_v58, %v408_v2  ;;  %1277 = vmatprep.subr.bf16.mxu0 %v1343_v29  ;;  %1303 = vmatprep.subr.bf16.mxu1 %v1343_v29 }
  0xbb   : > { %v401_v12 = vadd.f32 %v1540_v42, %v380_v7  ;;  %v425_v17 = vmax.f32 %v393_v59, %v409_v3  ;;  %v453_v42 = vunpack.c.3.s8 %v1584_v32 }
  0xbc   : > { %v416_v16 = vmul.f32 0.2, %v400_v11  ;;  %v1641_v20 = vsel %vm460_vm12, %v424_v13, -1e+30  ;;  %1278 = vmatpush3.bf16.msra.mxu0 %v1343_v29  ;;  %1311 = vmatpush3.bf16.msra.mxu1 %v1343_v29 }
  0xbd   : > { %v417_v19 = vmul.f32 0.2, %v401_v12  ;;  %512 = vmax.xlane.f32.xlu1 %v1639_v15  ;;  %498 = vmax.xlane.f32.xlu0 %v1641_v20  ;;  %v1647_v23 = vsel %vm461_vm13, %v425_v17, -1e+30  ;;  %vm469_vm15 = vcmp.gt.s32.totalorder %v453_v42, 0 }
  0xbe   : > { %v432_v21 = vmax.f32 %v400_v11, %v416_v16  ;;  %1279 = vmatprep.subr.bf16.mxu0 %v1344_v30  ;;  %1304 = vmatprep.subr.bf16.mxu1 %v1344_v30 }
  0xbf   : > { %v433_v26 = vmax.f32 %v401_v12, %v417_v19 }
  0xc0   : > { %v1649_v25 = vsel %vm468_vm14, %v432_v21, -1e+30  ;;  %1280 = vmatpush3.bf16.msra.mxu0 %v1344_v30  ;;  %1312 = vmatpush3.bf16.msra.mxu1 %v1344_v30 }
  0xc1   : > { %500 = vmax.xlane.f32.xlu1 %v1647_v23  ;;  %514 = vmax.xlane.f32.xlu0 %v1649_v25  ;;  %v1654_v28 = vsel %vm469_vm15, %v433_v26, -1e+30 }
  0xc5   : > { %516 = vmax.xlane.f32.xlu1 %v1654_v28 }
 0x12e   : > { %v487_v31 = vpop.xlane.xlu0 %486 }
 0x12f   : > { %v518_v32 = vsub.f32 %v1551_v62, %v487_v31 }
 0x131   : > { %v534_v34 = vmul.f32 1.442695, %v518_v32 }
 0x132   : > { %v489_v35 = vpop.xlane.xlu1 %488  ;;  %v503_v36 = vpop.xlane.xlu0 %502 }
 0x133   : > { %1345 = vpow2.f32 %v534_v34  ;;  %v519_v37 = vsub.f32 %v1558_v10, %v489_v35  ;;  %v526_v38 = vsub.f32 %v1556_v5, %v503_v36 }
 0x135   : > { %v536_v40 = vmul.f32 1.442695, %v519_v37  ;;  %v550_v41 = vmul.f32 1.442695, %v526_v38 }
 0x136   : > { %v505_v43 = vpop.xlane.xlu1 %504  ;;  %v491_v44 = vpop.xlane.xlu0 %490 }
 0x137   : > { %1347 = vpow2.f32 %v536_v40  ;;  %v527_v45 = vsub.f32 %v1568_v18, %v505_v43  ;;  %v520_v46 = vsub.f32 %v1575_v24, %v491_v44 }
 0x138   : > { %1349 = vpow2.f32 %v550_v41 }
 0x139   : > { %v552_v47 = vmul.f32 1.442695, %v527_v45  ;;  %v538_v49 = vmul.f32 1.442695, %v520_v46 }
 0x13a   : > { %v493_v62 = vpop.xlane.xlu1 %492  ;;  %v507_v50 = vpop.xlane.xlu0 %506 }
 0x13b   : > { %1351 = vpow2.f32 %v552_v47  ;;  %v521_v51 = vsub.f32 %v1588_v33, %v493_v62  ;;  %v528_v10 = vsub.f32 %v1595_v39, %v507_v50 }
 0x13c   : > { %1353 = vpow2.f32 %v538_v49 }
 0x13d   : > { %v540_v5 = vmul.f32 1.442695, %v521_v51  ;;  %v554_v52 = vmul.f32 1.442695, %v528_v10 }
 0x13e   : > { %v509_v53 = vpop.xlane.xlu1 %508  ;;  %v495_v55 = vpop.xlane.xlu0 %494 }
 0x13f   : > { %1355 = vpow2.f32 %v540_v5  ;;  %v529_v18 = vsub.f32 %v1605_v48, %v509_v53  ;;  %v522_v24 = vsub.f32 %v1612_v54, %v495_v55 }
 0x140   : > { %v1346_v56 = vpop.eup %1345  ;;  %1357 = vpow2.f32 %v554_v52 }
 0x141   : > { %v556_v57 = vmul.f32 1.442695, %v529_v18  ;;  %v542_v58 = vmul.f32 1.442695, %v522_v24  ;;  %719 = vadd.xlane.f32.xlu0 %v1346_v56 }
 0x142   : > { %v497_v59 = vpop.xlane.xlu1 %496  ;;  %v511_v60 = vpop.xlane.xlu0 %510 }
 0x143   : > { %1359 = vpow2.f32 %v556_v57  ;;  %v523_v33 = vsub.f32 %v1622_v63, %v497_v59  ;;  %v530_v39 = vsub.f32 %v1628_v4, %v511_v60 }
 0x144   : > { %v1348_v61 = vpop.eup %1347  ;;  %1361 = vpow2.f32 %v542_v58 }
 0x145   : > { %v544_v0 = vmul.f32 1.442695, %v523_v33  ;;  %721 = vadd.xlane.f32.xlu1 %v1348_v61  ;;  %v566_v1 = vpack.c.bf16 %v1348_v61, %v1346_v56  ;;  %v558_v48 = vmul.f32 1.442695, %v530_v39  ;;  %v1350_v3 = vpop.eup %1349 }
 0x146   : > { %v513_v2 = vpop.xlane.xlu1 %512  ;;  %v499_v54 = vpop.xlane.xlu0 %498 }
 0x147   : > { %1363 = vpow2.f32 %v544_v0  ;;  %v531_v6 = vsub.f32 %v1639_v15, %v513_v2  ;;  %v524_v7 = vsub.f32 %v1641_v20, %v499_v54  ;;  %1281 = vmatprep.mubr.bf16.mxu0 %v566_v1 }
 0x148   : > { %v1352_v8 = vpop.eup %1351  ;;  %1365 = vpow2.f32 %v558_v48 }
 0x149   : > { %v1354_v9 = vpop.eup %1353  ;;  %v560_v63 = vmul.f32 1.442695, %v531_v6  ;;  %v546_v11 = vmul.f32 1.442695, %v524_v7  ;;  %v570_v4 = vpack.c.bf16 %v1352_v8, %v1350_v3 }
 0x14a   : > { %723 = vadd.xlane.f32.xlu0 %v1354_v9  ;;  %v501_v12 = vpop.xlane.xlu1 %500  ;;  %v515_v13 = vpop.xlane.xlu0 %514 }
 0x14b   : > { %1367 = vpow2.f32 %v560_v63  ;;  %v525_v14 = vsub.f32 %v1647_v23, %v501_v12  ;;  %v532_v16 = vsub.f32 %v1649_v25, %v515_v13  ;;  %1289 = vmatprep.mubr.bf16.mxu1 %v570_v4 }
 0x14c   : > { %v1356_v19 = vpop.eup %1355  ;;  %1369 = vpow2.f32 %v546_v11 }
 0x14d   : > { %v548_v15 = vmul.f32 1.442695, %v525_v14  ;;  %725 = vadd.xlane.f32.xlu1 %v1356_v19  ;;  %v567_v20 = vpack.c.bf16 %v1356_v19, %v1354_v9  ;;  %v562_v17 = vmul.f32 1.442695, %v532_v16  ;;  %v1358_v21 = vpop.eup %1357 }
 0x14e   : > { %v517_v42 = vpop.xlane.xlu1 %516 }
 0x14f   : > { %1371 = vpow2.f32 %v548_v15  ;;  %v533_v22 = vsub.f32 %v1654_v28, %v517_v42  ;;  %1282 = vmatmul.mubr.bf16.vlgmr.msra.gmra.mxu0 %v567_v20 }
 0x150   : > { %v1360_v26 = vpop.eup %1359  ;;  %1373 = vpow2.f32 %v562_v17 }
 0x151   : > { %v1362_v27 = vpop.eup %1361  ;;  %v564_v29 = vmul.f32 1.442695, %v533_v22  ;;  %v571_v30 = vpack.c.bf16 %v1360_v26, %v1358_v21 }
 0x152   : > { %727 = vadd.xlane.f32.xlu0 %v1362_v27 }
 0x153   : > { %1375 = vpow2.f32 %v564_v29  ;;  %1290 = vmatmul.mubr.bf16.vlgmr.msra.gmra.mxu1 %v571_v30 }
 0x154   : > { %v1364_v23 = vpop.eup %1363 }
 0x155   : > { %729 = vadd.xlane.f32.xlu1 %v1364_v23  ;;  %v568_v25 = vpack.c.bf16 %v1364_v23, %v1362_v27  ;;  %v1366_v31 = vpop.eup %1365 }
 0x157   : > { %1285 = vmatprep.mubr.bf16.mxu0 %v568_v25 }
 0x158   : > { %v1368_v32 = vpop.eup %1367 }
 0x159   : > { %v1370_v34 = vpop.eup %1369  ;;  %v572_v35 = vpack.c.bf16 %v1368_v32, %v1366_v31 }
 0x15a   : > { %731 = vadd.xlane.f32.xlu0 %v1370_v34 }
 0x15b   : > { %1293 = vmatprep.mubr.bf16.mxu1 %v572_v35 }
 0x15c   : > { %v1372_v28 = vpop.eup %1371 }
 0x15d   : > { %733 = vadd.xlane.f32.xlu1 %v1372_v28  ;;  %v569_v36 = vpack.c.bf16 %v1372_v28, %v1370_v34  ;;  %v1374_v37 = vpop.eup %1373 }
 0x15e   : > { %735 = vadd.xlane.f32.xlu0 %v1350_v3 }
 0x15f   : > { %1286 = vmatmul.mubr.bf16.gmra.mxu0 %v569_v36 }
 0x160   : > { %v1376_v38 = vpop.eup %1375 }
 0x161   : > { %737 = vadd.xlane.f32.xlu1 %v1352_v8  ;;  %v573_v40 = vpack.c.bf16 %v1376_v38, %v1374_v37 }
 0x162   : > { %739 = vadd.xlane.f32.xlu0 %v1358_v21 }
 0x163   : > { %1294 = vmatmul.mubr.bf16.gmra.mxu1 %v573_v40 }
 0x165   : > { %741 = vadd.xlane.f32.xlu1 %v1360_v26 }
 0x166   : > { %743 = vadd.xlane.f32.xlu0 %v1366_v31 }
 0x169   : > { %745 = vadd.xlane.f32.xlu1 %v1368_v32 }
 0x16a   : > { %747 = vadd.xlane.f32.xlu0 %v1374_v37 }
 0x16d   : > { %749 = vadd.xlane.f32.xlu1 %v1376_v38 }
 0x1ca   : > { %v720_v41 = vpop.xlane.xlu0 %719 }
 0x1cb   : > { %v751_v5 = vmax.f32 %v720_v41, 1e-09 }
 0x1ce   : > { %v722_v43 = vpop.xlane.xlu1 %721 }
 0x1cf   : > { %v752_v24 = vmax.f32 %v722_v43, 1e-09 }
 0x1d3   : > { %v724_v44 = vpop.xlane.xlu0 %723 }
 0x1d4   : > { %v753_v10 = vmax.f32 %v724_v44, 1e-09 }
 0x1d6   : > { %v726_v45 = vpop.xlane.xlu1 %725  ;;  %1377 = vrcp.f32 %v753_v10 }
 0x1d7   : > { %v754_v53 = vmax.f32 %v726_v45, 1e-09  ;;  %1379 = vrcp.f32 %v751_v5 }
 0x1d9   : > { %1381 = vrcp.f32 %v754_v53 }
 0x1db   : > { %v728_v46 = vpop.xlane.xlu0 %727 }
 0x1dc   : > { %v755_v61 = vmax.f32 %v728_v46, 1e-09 }
 0x1de   : > { %v730_v47 = vpop.xlane.xlu1 %729 }
 0x1df   : > { %v756_v1 = vmax.f32 %v730_v47, 1e-09 }
 0x1e3   : > { %v732_v49 = vpop.xlane.xlu0 %731  ;;  %v1378_v39 = vpop.eup %1377 }
 0x1e4   : > { %v757_v60 = vmax.f32 %v732_v49, 1e-09  ;;  %v1380_v54 = vpop.eup %1379 }
 0x1e6   : > { %v734_v62 = vpop.xlane.xlu1 %733  ;;  %v1382_v9 = vpop.eup %1381 }
 0x1e7   : > { %v736_v50 = vpop.xlane.xlu0 %735  ;;  %v758_v3 = vmax.f32 %v734_v62, 1e-09 }
 0x1e8   : > { %v759_v56 = vmax.f32 %v736_v50, 1e-09 }
 0x1ea   : > { %v738_v51 = vpop.xlane.xlu1 %737 }
 0x1eb   : > { %v740_v52 = vpop.xlane.xlu0 %739  ;;  %v760_v58 = vmax.f32 %v738_v51, 1e-09 }
 0x1ec   : > { %v761_v55 = vmax.f32 %v740_v52, 1e-09 }
 0x1ee   : > { %v742_v18 = vpop.xlane.xlu1 %741  ;;  %1383 = vrcp.f32 %v761_v55 }
 0x1ef   : > { %v762_v57 = vmax.f32 %v742_v18, 1e-09  ;;  %1385 = vrcp.f32 %v752_v24  ;;  %v744_v59 = vpop.xlane.xlu0 %743 }
 0x1f0   : > { %1387 = vrcp.f32 %v759_v56  ;;  %v763_v20 = vmax.f32 %v744_v59, 1e-09 }
 0x1f1   : > { %1389 = vrcp.f32 %v762_v57 }
 0x1f2   : > { %1391 = vrcp.f32 %v760_v58  ;;  %v1675_v33 = vpop.xlane.xlu1 %745 }
 0x1f3   : > { %v748_v48 = vpop.xlane.xlu0 %747  ;;  %1393 = vrcp.f32 %v757_v60  ;;  %v764_v45 = vmax.f32 %v1675_v33, 1e-09 }
 0x1f4   : > { %1395 = vrcp.f32 %v755_v61  ;;  %v765_v63 = vmax.f32 %v748_v48, 1e-09 }
 0x1f5   : > { %1397 = vrcp.f32 %v756_v1 }
 0x1f6   : > { %v750_v13 = vpop.xlane.xlu1 %749  ;;  %1399 = vrcp.f32 %v758_v3 }
 0x1f7   : > { %v766_v32 = vmax.f32 %v750_v13, 1e-09 }
 0x1fb   : > { %v1384_v12 = vpop.eup %1383 }
 0x1fc   : > { %v1386_v15 = vpop.eup %1385 }
 0x1fd   : > { %v1388_v22 = vpop.eup %1387 }
 0x1fe   : > { %v1390_v29 = vpop.eup %1389 }
 0x1ff   : > { %v1392_v38 = vpop.eup %1391 }
 0x200   : > { %v1394_v62 = vpop.eup %1393 }
 0x201   : > { %v1396_v10 = vpop.eup %1395 }
 0x202   : > { %v1398_v52 = vpop.eup %1397 }
 0x203   : > { %v1400_v55 = vpop.eup %1399 }
 0x20f   : > { %v1283_v0 = vpop.f32.mrf.mxu0 }
 0x210   : > { %v1677_v2 = vmul.f32 %v1378_v39, %v1283_v0 }
 0x211   : > { %v656_v6 = vpop.f32.mrf.mxu0 }
 0x212   : > { %v817_v7 = vmin.f32 %v1677_v2, 0.0  ;;  %v1680_v8 = vmul.f32 %v1380_v54, %v656_v6  ;;  %vm801_vm0 = vcmp.gt.f32.partialorder %v1677_v2, 0.0 }
 0x213   : > { %v1284_v11 = vpop.f32.mrf.mxu0  ;;  %v1291_v4 = vpop.f32.mrf.mxu1 }
 0x214   : > { %v835_v14 = vmul.f32 1.442695, %v817_v7  ;;  %v815_v16 = vmin.f32 %v1680_v8, 0.0  ;;  %v1683_v19 = vmul.f32 %v1382_v9, %v1284_v11  ;;  %v1685_v17 = vmul.f32 %v1384_v12, %v1291_v4 }
 0x215   : > { %v659_v42 = vpop.f32.mrf.mxu0  ;;  %v688_v21 = vpop.f32.mrf.mxu1  ;;  %vm799_vm1 = vcmp.gt.f32.partialorder %v1680_v8, 0.0 }
 0x216   : > { %1401 = vpow2.f32 %v835_v14  ;;  %v831_v26 = vmul.f32 1.442695, %v815_v16  ;;  %v818_v27 = vmin.f32 %v1683_v19, 0.0  ;;  %v825_v30 = vmin.f32 %v1685_v17, 0.0 }
 0x217   : > { %1403 = vrcp.f32 %v765_v63  ;;  %v1689_v23 = vmul.f32 %v1386_v15, %v659_v42  ;;  %v1691_v25 = vmul.f32 %v1388_v22, %v688_v21  ;;  %v1292_v31 = vpop.f32.mrf.mxu1  ;;  %vm802_vm2 = vcmp.gt.f32.partialorder %v1683_v19, 0.0 }
 0x218   : > { %1405 = vpow2.f32 %v831_v26  ;;  %v837_v34 = vmul.f32 1.442695, %v818_v27  ;;  %v1693_v35 = vmul.f32 %v1390_v29, %v1292_v31  ;;  %v851_v28 = vmul.f32 1.442695, %v825_v30 }
 0x219   : > { %1407 = vrcp.f32 %v763_v20  ;;  %v816_v36 = vmin.f32 %v1689_v23, 0.0  ;;  %v691_v37 = vpop.f32.mrf.mxu1  ;;  %v823_v40 = vmin.f32 %v1691_v25, 0.0  ;;  %vm809_vm3 = vcmp.gt.f32.partialorder %v1685_v17, 0.0 }
 0x21a   : > { %1409 = vpow2.f32 %v837_v34  ;;  %v826_v41 = vmin.f32 %v1693_v35, 0.0  ;;  %v1698_v44 = vmul.f32 %v1392_v38, %v691_v37  ;;  %vm800_vm4 = vcmp.gt.f32.partialorder %v1689_v23, 0.0 }
 0x21b   : > { %1411 = vpow2.f32 %v851_v28  ;;  %v833_v43 = vmul.f32 1.442695, %v816_v36  ;;  %v847_v46 = vmul.f32 1.442695, %v823_v40  ;;  %vm810_vm5 = vcmp.gt.f32.partialorder %v1693_v35, 0.0 }
 0x21c   : > { %1413 = vrcp.f32 %v766_v32  ;;  %v853_v47 = vmul.f32 1.442695, %v826_v41  ;;  %v824_v49 = vmin.f32 %v1698_v44, 0.0  ;;  %vm807_vm6 = vcmp.gt.f32.partialorder %v1691_v25, 0.0 }
 0x21d   : > { %1415 = vpow2.f32 %v833_v43  ;;  %vm808_vm7 = vcmp.gt.f32.partialorder %v1698_v44, 0.0 }
 0x21e   : > { %1417 = vpow2.f32 %v847_v46  ;;  %v849_v50 = vmul.f32 1.442695, %v824_v49 }
 0x21f   : > { %1419 = vpow2.f32 %v853_v47  ;;  %v1287_v51 = vpop.f32.mrf.mxu0 }
 0x220   : > { %1421 = vrcp.f32 %v764_v45  ;;  %v1702_v5 = vmul.f32 %v1394_v62, %v1287_v51 }
 0x221   : > { %1423 = vpow2.f32 %v849_v50  ;;  %v672_v53 = vpop.f32.mrf.mxu0 }
 0x222   : > { %v821_v18 = vmin.f32 %v1702_v5, 0.0  ;;  %v1705_v24 = vmul.f32 %v1396_v10, %v672_v53  ;;  %vm805_vm8 = vcmp.gt.f32.partialorder %v1702_v5, 0.0 }
 0x223   : > { %v1402_v56 = vpop.eup %1401  ;;  %v1288_v57 = vpop.f32.mrf.mxu0 }
 0x224   : > { %v1295_v58 = vpop.f32.mrf.mxu1  ;;  %v1404_v59 = vpop.eup %1403  ;;  %v1112_v60 = vadd.f32 -1.0, %v1402_v56  ;;  %v843_v33 = vmul.f32 1.442695, %v821_v18  ;;  %v819_v39 = vmin.f32 %v1705_v24, 0.0  ;;  %v1708_v0 = vmul.f32 %v1400_v55, %v1288_v57 }
 0x225   : > { %v1406_v61 = vpop.eup %1405  ;;  %v1710_v1 = vmul.f32 %v1404_v59, %v1295_v58  ;;  %v675_v48 = vpop.f32.mrf.mxu0  ;;  %vm803_vm10 = vcmp.gt.f32.partialorder %v1705_v24, 0.0 }
 0x226   : > { %v704_v54 = vpop.f32.mrf.mxu1  ;;  %v1408_v3 = vpop.eup %1407  ;;  %v839_v6 = vmul.f32 1.442695, %v819_v39  ;;  %1425 = vpow2.f32 %v843_v33  ;;  %v822_v9 = vmin.f32 %v1708_v0, 0.0  ;;  %v881_v12 = vsel %vm801_vm0, %v1677_v2, %v1112_v60 }
 0x227   : > { %v1410_v7 = vpop.eup %1409  ;;  %v829_v63 = vmin.f32 %v1710_v1, 0.0  ;;  %v1110_v13 = vadd.f32 -1.0, %v1406_v61  ;;  %v1719_v16 = vmul.f32 %v1398_v52, %v675_v48  ;;  %v1721_v21 = vmul.f32 %v1408_v3, %v704_v54 }
 0x228   : > { %v1296_v11 = vpop.f32.mrf.mxu1  ;;  %v1412_v4 = vpop.eup %1411  ;;  %v1113_v14 = vadd.f32 -1.0, %v1410_v7  ;;  %1427 = vpow2.f32 %v839_v6  ;;  %v845_v20 = vmul.f32 1.442695, %v822_v9  ;;  %vm806_vm9 = vcmp.gt.f32.partialorder %v1708_v0, 0.0 }
 0x229   : > { %v1414_v15 = vpop.eup %1413  ;;  %v859_v42 = vmul.f32 1.442695, %v829_v63  ;;  %v1120_v26 = vadd.f32 -1.0, %v1412_v4  ;;  %v820_v27 = vmin.f32 %v1719_v16, 0.0  ;;  %v879_v28 = vsel %vm799_vm1, %v1680_v8, %v1110_v13 }
 0x22a   : > { %v1416_v22 = vpop.eup %1415  ;;  %v882_v2 = vsel %vm802_vm2, %v1683_v19, %v1113_v14  ;;  %v1734_v29 = vmul.f32 %v1414_v15, %v1296_v11  ;;  %1429 = vpow2.f32 %v845_v20  ;;  %v707_v37 = vpop.f32.mrf.mxu1  ;;  %v827_v43 = vmin.f32 %v1721_v21, 0.0 }
 0x22b   : > { %v1418_v30 = vpop.eup %1417  ;;  %v1203_v31 = vpack.c.bf16 %v882_v2, %v881_v12  ;;  %v1111_v32 = vadd.f32 -1.0, %v1416_v22  ;;  %v841_v19 = vmul.f32 1.442695, %v820_v27  ;;  %1431 = vpow2.f32 %v859_v42 }
 0x22c   : > { %v1420_v34 = vpop.eup %1419  ;;  %v1118_v36 = vadd.f32 -1.0, %v1418_v30  ;;  %v889_v46 = vsel %vm809_vm3, %v1685_v17, %v1120_v26  ;;  %v830_v47 = vmin.f32 %v1734_v29, 0.0  ;;  %v855_v50 = vmul.f32 1.442695, %v827_v43 }
 0x22d   : > { %v1422_v38 = vpop.eup %1421  ;;  %1242 = vst [vmem:[%s1728_s9 + $0x8] sm:$0xff] %v1203_v31   ;;  %v880_v40 = vsel %vm800_vm4, %v1689_v23, %v1111_v32  ;;  %v1121_v41 = vadd.f32 -1.0, %v1420_v34  ;;  %1433 = vpow2.f32 %v841_v19  ;;  %vm804_vm11 = vcmp.gt.f32.partialorder %v1719_v16, 0.0 }
 0x22e   : > { %v1424_v45 = vpop.eup %1423  ;;  %v1198_v8 = vpack.c.bf16 %v880_v40, %v879_v28  ;;  %v796_v23 = vmul.f32 %v1422_v38, %v707_v37  ;;  %v861_v10 = vmul.f32 1.442695, %v830_v47  ;;  %v887_v17 = vsel %vm807_vm6, %v1691_v25, %v1118_v36 }
 0x22f   : > { %v890_v49 = vsel %vm810_vm5, %v1693_v35, %v1121_v41  ;;  %v1119_v62 = vadd.f32 -1.0, %v1424_v45  ;;  %1435 = vpow2.f32 %v855_v50  ;;  %vm813_vm12 = vcmp.gt.f32.partialorder %v1710_v1, 0.0 }
 0x230   : > { %1199 = vst [vmem:[%s1728_s9] sm:$0xff] %v1198_v8   ;;  %v1223_v51 = vpack.c.bf16 %v890_v49, %v889_v46  ;;  %v828_v53 = vmin.f32 %v796_v23, 0.0  ;;  %1437 = vpow2.f32 %v861_v10  ;;  %vm814_vm13 = vcmp.gt.f32.partialorder %v1734_v29, 0.0 }
 0x231   : > { %v888_v52 = vsel %vm808_vm7, %v1698_v44, %v1119_v62  ;;  %vm811_vm14 = vcmp.gt.f32.partialorder %v1721_v21, 0.0  ;;  %vm812_vm15 = vcmp.gt.f32.partialorder %v796_v23, 0.0 }
 0x232   : > { %1246 = vst [vmem:[%s1728_s9 + $0x28] sm:$0xff] %v1223_v51   ;;  %v1218_v55 = vpack.c.bf16 %v888_v52, %v887_v17  ;;  %v857_v35 = vmul.f32 1.442695, %v828_v53 }
 0x233   : > { %v1426_v18 = vpop.eup %1425 }
 0x234   : > { %1245 = vst [vmem:[%s1728_s9 + $0x20] sm:$0xff] %v1218_v55   ;;  %1439 = vpow2.f32 %v857_v35  ;;  %v1116_v57 = vadd.f32 -1.0, %v1426_v18 }
 0x235   : > { %v1428_v56 = vpop.eup %1427 }
 0x236   : > { %v1114_v25 = vadd.f32 -1.0, %v1428_v56  ;;  %v885_v33 = vsel %vm805_vm8, %v1702_v5, %v1116_v57 }
 0x237   : > { %v1430_v58 = vpop.eup %1429 }
 0x238   : > { %v1117_v59 = vadd.f32 -1.0, %v1430_v58  ;;  %v1432_v60 = vpop.eup %1431  ;;  %v883_v3 = vsel %vm803_vm10, %v1705_v24, %v1114_v25 }
 0x239   : > { %v1124_v6 = vadd.f32 -1.0, %v1432_v60 }
 0x23a   : > { %v1434_v44 = vpop.eup %1433  ;;  %v886_v39 = vsel %vm806_vm9, %v1708_v0, %v1117_v59 }
 0x23b   : > { %v1213_v61 = vpack.c.bf16 %v886_v39, %v885_v33  ;;  %v1115_v48 = vadd.f32 -1.0, %v1434_v44  ;;  %v893_v4 = vsel %vm813_vm12, %v1710_v1, %v1124_v6 }
 0x23c   : > { %v1436_v54 = vpop.eup %1435 }
 0x23d   : > { %1244 = vst [vmem:[%s1728_s9 + $0x18] sm:$0xff] %v1213_v61   ;;  %v884_v7 = vsel %vm804_vm11, %v1719_v16, %v1115_v48  ;;  %v1438_v9 = vpop.eup %1437  ;;  %v1122_v5 = vadd.f32 -1.0, %v1436_v54 }
 0x23e   : > { %v1208_v63 = vpack.c.bf16 %v884_v7, %v883_v3  ;;  %v1125_v11 = vadd.f32 -1.0, %v1438_v9 }
 0x23f   : > { %v891_v14 = vsel %vm811_vm14, %v1721_v21, %v1122_v5 }
 0x240   : > { %1243 = vst [vmem:[%s1728_s9 + $0x10] sm:$0xff] %v1208_v63   ;;  %v894_v24 = vsel %vm814_vm13, %v1734_v29, %v1125_v11 }
 0x241   : > { %v1440_v0 = vpop.eup %1439  ;;  %v1233_v12 = vpack.c.bf16 %v894_v24, %v893_v4 }
 0x242   : > { %v1123_v13 = vadd.f32 -1.0, %v1440_v0 }
 0x243   : > { %1248 = vst [vmem:[%s1728_s9 + $0x38] sm:$0xff] %v1233_v12  }
 0x244   : > { %v892_v16 = vsel %vm812_vm15, %v796_v23, %v1123_v13 }
 0x245   : > { %v1228_v15 = vpack.c.bf16 %v892_v16, %v891_v14 }
 0x247   : > { %1247 = vst [vmem:[%s1728_s9 + $0x30] sm:$0xff] %v1228_v15  }
 0x248 PF: > { %s14_s17 = sadd.s32 1, %s1463_s17   ;;  %s1796_s15 = smov %s1459_s16 }
 0x249   : > { %p11_p5 = scmp.ge.s32.totalorder %s14_s17, 6   ;;  %s1797_s16 = smov %s1799_s18 }
 0x24b   :  { %13 = sbr.rel (!%p11_p5) target bundleno = 2 (0x2), region = 73 }

// kernel: dgnn_forward.6
= control target key start
LH: loop header
LB: loop body
LE: loop exit
PB: predicated region body
PF: predicated region fallthrough
CT: control target
= control target key end

     0   :  { %v4881_v1 = vmov 0   ;;  %s4871_s2 = inlined_call_operand.vmem [shape: bf16[128,128], index: 2, kind: input, shape index: {}]   ;;  %s4872_s3 = inlined_call_operand.vmem [shape: bf16[128,256], index: 3, kind: input, shape index: {}]   ;;  %s4873_s0 = inlined_call_operand.vmem [shape: bf16[4,128,128], index: 0, kind: input, shape index: {}]   ;;  %s4874_s1 = inlined_call_operand.vmem [shape: f32[4,128], index: 1, kind: input, shape index: {}]   ;;  %s4875_s4 = inlined_call_operand.vmem [shape: bf16[128,128], index: 4, kind: input, shape index: {}]   ;;  %s4876_s5 = inlined_call_operand.<no memory space> [shape: f32[1,1], index: 5, kind: input, shape index: {}]   ;;  %s4877_s6 = inlined_call_operand.vmem [shape: bf16[128,128], index: 6, kind: output, shape index: {}]  }
   0x1   :  { %v2727_v0 = vld [vmem:[%s4871_s2 + $0x38] sm:$0xff]   ;;  %437 = vmatprep.mubr.bf16.mxu1 %v4881_v1  ;;  %v2731_v4 = vld [vmem:[%s4871_s2 + $0x30] sm:$0xff]   ;;  %v3113_v5 = vld [vmem:[%s4872_s3 + $0x64] ss:$8 sps:$4 sm:$0xff]  }
   0x2   :  { %v3098_v2 = vld [vmem:[%s4872_s3 + $0x74] ss:$8 sps:$4 sm:$0xff]   ;;  %2662 = vmatprep.subr.bf16.mxu0 %v2727_v0  ;;  %v3103_v3 = vld [vmem:[%s4872_s3 + $0x70] ss:$8 sps:$4 sm:$0xff]   ;;  %v3118_v6 = vld [vmem:[%s4872_s3 + $0x60] ss:$8 sps:$4 sm:$0xff]  }
   0x3   :  { %405 = vmatprep.subr.bf16.mxu1 %v3098_v2  ;;  %2663 = vmatpush3.bf16.msra.mxu0 %v2727_v0  ;;  %v2735_v7 = vld [vmem:[%s4871_s2 + $0x28] sm:$0xff]   ;;  %v3127_v8 = vld [vmem:[%s4872_s3 + $0x54] ss:$8 sps:$4 sm:$0xff]   ;;  %v3132_v9 = vld [vmem:[%s4872_s3 + $0x50] ss:$8 sps:$4 sm:$0xff]  }
   0x4   :  { %406 = vmatpush1.bf16.msra.mxu1 %v3103_v3  ;;  %2664 = vmatprep.subr.bf16.mxu0 %v2731_v4  ;;  %v2739_v10 = vld [vmem:[%s4871_s2 + $0x20] sm:$0xff]   ;;  %v2743_v13 = vld [vmem:[%s4871_s2 + $0x18] sm:$0xff]   ;;  %v2747_v16 = vld [vmem:[%s4871_s2 + $0x10] sm:$0xff]  }
   0x5   :  { %407 = vmatprep.subr.bf16.mxu1 %v3113_v5  ;;  %v3142_v11 = vld [vmem:[%s4872_s3 + $0x44] ss:$8 sps:$4 sm:$0xff]   ;;  %v3147_v12 = vld [vmem:[%s4872_s3 + $0x40] ss:$8 sps:$4 sm:$0xff]   ;;  %v3157_v14 = vld [vmem:[%s4872_s3 + $0x34] ss:$8 sps:$4 sm:$0xff]  }
   0x6   :  { %v3162_v15 = vld [vmem:[%s4872_s3 + $0x30] ss:$8 sps:$4 sm:$0xff]   ;;  %v3172_v17 = vld [vmem:[%s4872_s3 + $0x24] ss:$8 sps:$4 sm:$0xff]   ;;  %v3180_v19 = vld [vmem:[%s4872_s3 + $0x20] ss:$8 sps:$4 sm:$0xff]  }
   0x7   :  { %2665 = vmatpush3.bf16.msra.mxu0 %v2731_v4  ;;  %v2592_v18 = vld [vmem:[%s4873_s0 + $0xc0] sm:$0xff]   ;;  %v2751_v23 = vld [vmem:[%s4871_s2 + $0x8] sm:$0xff]   ;;  %v3201_v26 = vld [vmem:[%s4872_s3 + $0x14] ss:$8 sps:$4 sm:$0xff]  }
   0x8   :  { %408 = vmatpush1.bf16.msra.mxu1 %v3118_v6  ;;  %2666 = vmatprep.subr.bf16.mxu0 %v2735_v7  ;;  %v2426_v20 = vunpack.c.l.bf16 %v2592_v18  ;;  %v2427_v21 = vunpack.c.h.bf16 %v2592_v18  ;;  %v3185_v22 = vld [vmem:[%s4874_s1 + $0x3] ss:$0 sm:$0xff]  ;;  %v2593_v24 = vld [vmem:[%s4873_s0 + $0xc8] sm:$0xff]   ;;  %v2594_v29 = vld [vmem:[%s4873_s0 + $0xd0] sm:$0xff]  }
   0x9   :  { %409 = vmatprep.subr.bf16.mxu1 %v3127_v8  ;;  %v2457_v25 = vld [vmem:[%s4873_s0] sm:$0xff]   ;;  %v2430_v30 = vunpack.c.l.bf16 %v2593_v24  ;;  %v2431_v31 = vunpack.c.h.bf16 %v2593_v24  ;;  %v3220_v35 = vld [vmem:[%s4872_s3 + $0x10] ss:$8 sps:$4 sm:$0xff]   ;;  %v2434_v38 = vunpack.c.l.bf16 %v2594_v29  ;;  %v2435_v39 = vunpack.c.h.bf16 %v2594_v29  ;;  %v2600_v49 = vld [vmem:[%s4873_s0 + $0x8] sm:$0xff]  }
   0xa   :  { %v3204_v27 = vadd.f32 %v2426_v20, %v3185_v22  ;;  %v3207_v28 = vadd.f32 %v2427_v21, %v3185_v22  ;;  %v2458_v33 = vunpack.c.l.bf16 %v2457_v25  ;;  %v2459_v34 = vunpack.c.h.bf16 %v2457_v25  ;;  %v2755_v36 = vld [vmem:[%s4871_s2] sm:$0xff]   ;;  %v2595_v45 = vld [vmem:[%s4873_s0 + $0xd8] sm:$0xff]   ;;  %v2597_v62 = vld [vmem:[%s4873_s0 + $0xe8] sm:$0xff]  }
   0xb   :  { %2667 = vmatpush3.bf16.msra.mxu0 %v2735_v7  ;;  %v3228_v37 = vld [vmem:[%s4874_s1] ss:$0 sm:$0xff]  ;;  %v3234_v40 = vld [vmem:[%s4872_s3 + $0x4] ss:$8 sps:$4 sm:$0xff]   ;;  %v3238_v41 = vadd.f32 %v2430_v30, %v3185_v22  ;;  %v3241_v42 = vadd.f32 %v2431_v31, %v3185_v22  ;;  %v3255_v47 = vadd.f32 %v2434_v38, %v3185_v22  ;;  %v3258_v48 = vadd.f32 %v2435_v39, %v3185_v22  ;;  %v2601_v4 = vld [vmem:[%s4873_s0 + $0x10] sm:$0xff]  }
   0xc   :  { %410 = vmatpush1.bf16.msra.mxu1 %v3132_v9  ;;  %2668 = vmatprep.subr.bf16.mxu0 %v2739_v10  ;;  %4927 = vst [vmem:[#allocation3_spill] sm:$0xff] %v3204_v27  ;;  %4928 = vst [vmem:[#allocation4_spill] sm:$0xff] %v3207_v28  ;;  %v3214_v32 = vpack.c.bf16 %v3207_v28, %v3204_v27  ;;  %v285_v43 = vadd.f32 %v2458_v33, %v3228_v37  ;;  %v3252_v46 = vld [vmem:[%s4872_s3] ss:$8 sps:$4 sm:$0xff]   ;;  %v2438_v52 = vunpack.c.l.bf16 %v2595_v45  ;;  %v2599_v31 = vld [vmem:[%s4873_s0 + $0xf8] sm:$0xff]  }
   0xd   :  { %411 = vmatprep.subr.bf16.mxu1 %v3142_v11  ;;  %4929 = vst [vmem:[#allocation5_spill] sm:$0xff] %v3238_v41  ;;  %4930 = vst [vmem:[#allocation6_spill] sm:$0xff] %v3241_v42  ;;  %v286_v44 = vadd.f32 %v2459_v34, %v3228_v37  ;;  %v2596_v50 = vld [vmem:[%s4873_s0 + $0xe0] sm:$0xff]   ;;  %v3269_v51 = vpack.c.bf16 %v3241_v42, %v3238_v41  ;;  %v2439_v53 = vunpack.c.h.bf16 %v2595_v45  ;;  %v2462_v55 = vunpack.c.l.bf16 %v2600_v49  ;;  %v2602_v39 = vld [vmem:[%s4873_s0 + $0x18] sm:$0xff]  }
   0xe   :  { %2678 = vmatprep.mubr.bf16.mxu0 %v3214_v32  ;;  %4931 = vst [vmem:[#allocation7_spill] sm:$0xff] %v3255_v47  ;;  %4932 = vst [vmem:[#allocation8_spill] sm:$0xff] %v3258_v48  ;;  %v2463_v56 = vunpack.c.h.bf16 %v2600_v49  ;;  %v3275_v57 = vpack.c.bf16 %v3258_v48, %v3255_v47  ;;  %v2442_v58 = vunpack.c.l.bf16 %v2596_v50  ;;  %v2443_v59 = vunpack.c.h.bf16 %v2596_v50  ;;  %v3342_v49 = vld [vmem:[%s4874_s1 + $0x2] ss:$0 sm:$0xff] }
   0xf   :  { %2669 = vmatpush3.bf16.msra.mxu0 %v2739_v10  ;;  %v301_v54 = vpack.c.bf16 %v286_v44, %v285_v43  ;;  %v3280_v60 = vadd.f32 %v2438_v52, %v3185_v22  ;;  %v3283_v61 = vadd.f32 %v2439_v53, %v3185_v22  ;;  %v287_v63 = vadd.f32 %v2462_v55, %v3228_v37  ;;  %v2615_v43 = vld [vmem:[%s4873_s0 + $0x80] sm:$0xff]  }
  0x10   :  { %412 = vmatpush1.bf16.msra.mxu1 %v3147_v12  ;;  %2670 = vmatprep.subr.bf16.mxu0 %v2743_v13  ;;  %v288_v0 = vadd.f32 %v2463_v56, %v3228_v37  ;;  %v3297_v7 = vadd.f32 %v2442_v58, %v3185_v22  ;;  %v3300_v10 = vadd.f32 %v2443_v59, %v3185_v22  ;;  %v2447_v20 = vunpack.c.h.bf16 %v2597_v62  ;;  %v3357_v55 = vld [vmem:[%s4873_s0 + $0x20] sm:$0xff]   ;;  %v2616_v59 = vld [vmem:[%s4873_s0 + $0x88] sm:$0xff]  }
  0x11   :  { %413 = vmatprep.subr.bf16.mxu1 %v3157_v14  ;;  %4933 = vst [vmem:[#allocation9_spill] sm:$0xff] %v3280_v60  ;;  %4934 = vst [vmem:[#allocation10_spill] sm:$0xff] %v3283_v61  ;;  %v3309_v18 = vpack.c.bf16 %v3283_v61, %v3280_v60  ;;  %v2466_v21 = vunpack.c.l.bf16 %v2601_v4  ;;  %v2454_v44 = vunpack.c.l.bf16 %v2599_v31  ;;  %v2455_v45 = vunpack.c.h.bf16 %v2599_v31 }
  0x12   :  { %4935 = vst [vmem:[#allocation11_spill] sm:$0xff] %v3297_v7  ;;  %4936 = vst [vmem:[#allocation12_spill] sm:$0xff] %v3300_v10  ;;  %v302_v24 = vpack.c.bf16 %v288_v0, %v287_v63  ;;  %v3316_v25 = vpack.c.bf16 %v3300_v10, %v3297_v7  ;;  %v3327_v34 = vadd.f32 %v2447_v20, %v3185_v22  ;;  %v2470_v53 = vunpack.c.l.bf16 %v2602_v39  ;;  %v2607_v0 = vld [vmem:[%s4873_s0 + $0x40] sm:$0xff]  }
  0x13   :  { %2671 = vmatpush3.bf16.msra.mxu0 %v2743_v13  ;;  %v2446_v13 = vunpack.c.l.bf16 %v2597_v62  ;;  %v2522_v56 = vunpack.c.l.bf16 %v2615_v43  ;;  %v2523_v58 = vunpack.c.h.bf16 %v2615_v43 }
  0x14   :  { %414 = vmatpush1.bf16.msra.mxu1 %v3162_v15  ;;  %2672 = vmatprep.subr.bf16.mxu0 %v2747_v16  ;;  %4938 = vst [vmem:[#allocation14_spill] sm:$0xff] %v3327_v34 }
  0x15   :  { %415 = vmatprep.subr.bf16.mxu1 %v3172_v17  ;;  %v3322_v33 = vadd.f32 %v2446_v13, %v3185_v22  ;;  %v3375_v13 = vadd.f32 %v2455_v45, %v3185_v22  ;;  %v3381_v20 = vadd.f32 %v2523_v58, %v3342_v49  ;;  %v2475_v58 = vunpack.c.h.bf16 %v3357_v55 }
  0x17   :  { %2673 = vmatpush3.bf16.msra.mxu0 %v2747_v16  ;;  %v2598_v16 = vld [vmem:[%s4873_s0 + $0xf0] sm:$0xff]   ;;  %4937 = vst [vmem:[#allocation13_spill] sm:$0xff] %v3322_v33  ;;  %v3364_v62 = vpack.c.bf16 %v3327_v34, %v3322_v33  ;;  %4942 = vst [vmem:[#allocation18_spill] sm:$0xff] %v3375_v13 }
  0x18   :  { %416 = vmatpush1.bf16.msra.mxu1 %v3180_v19  ;;  %2674 = vmatprep.subr.bf16.mxu0 %v2751_v23  ;;  %v2450_v29 = vunpack.c.l.bf16 %v2598_v16  ;;  %v2451_v30 = vunpack.c.h.bf16 %v2598_v16  ;;  %v3378_v16 = vadd.f32 %v2522_v56, %v3342_v49 }
  0x19   :  { %417 = vmatprep.subr.bf16.mxu1 %v3201_v26 }
  0x1a   :  { %v3347_v50 = vadd.f32 %v2450_v29, %v3185_v22  ;;  %v3350_v52 = vadd.f32 %v2451_v30, %v3185_v22  ;;  %v2527_v29 = vunpack.c.h.bf16 %v2616_v59  ;;  %v291_v30 = vadd.f32 %v2470_v53, %v3228_v37  ;;  %v2618_v53 = vld [vmem:[%s4873_s0 + $0x98] sm:$0xff]  }
  0x1b   :  { %2675 = vmatpush3.bf16.msra.mxu0 %v2751_v23  ;;  %v2467_v23 = vunpack.c.h.bf16 %v2601_v4  ;;  %v3372_v4 = vadd.f32 %v2454_v44, %v3185_v22  ;;  %v2526_v22 = vunpack.c.l.bf16 %v2616_v59  ;;  %v2619_v59 = vld [vmem:[%s4873_s0 + $0xa0] sm:$0xff]  }
  0x1c   :  { %418 = vmatpush1.bf16.msra.mxu1 %v3220_v35  ;;  %2676 = vmatprep.subr.bf16.mxu0 %v2755_v36  ;;  %4939 = vst [vmem:[#allocation15_spill] sm:$0xff] %v3347_v50  ;;  %4940 = vst [vmem:[#allocation16_spill] sm:$0xff] %v3350_v52  ;;  %v3403_v43 = vadd.f32 %v2527_v29, %v3342_v49 }
  0x1d   :  { %419 = vmatprep.subr.bf16.mxu1 %v3234_v40  ;;  %v290_v38 = vadd.f32 %v2467_v23, %v3228_v37  ;;  %4941 = vst [vmem:[#allocation17_spill] sm:$0xff] %v3372_v4  ;;  %v3389_v23 = vpack.c.bf16 %v3350_v52, %v3347_v50  ;;  %v3416_v56 = vpack.c.bf16 %v3375_v13, %v3372_v4  ;;  %v2535_v50 = vunpack.c.h.bf16 %v2618_v53 }
  0x1e   :  { %v2538_v13 = vunpack.c.l.bf16 %v2619_v59 }
  0x1f   :  { %2677 = vmatpush3.bf16.msra.mxu0 %v2755_v36  ;;  %v289_v36 = vadd.f32 %v2466_v21, %v3228_v37  ;;  %v2617_v21 = vld [vmem:[%s4873_s0 + $0x90] sm:$0xff]  }
  0x20   :  { %420 = vmatpush1.bf16.msra.mxu1 %v3252_v46  ;;  %820 = vmatprep.subr.bf16.mxu0 %v3098_v2  ;;  %v2530_v44 = vunpack.c.l.bf16 %v2617_v21  ;;  %v2531_v45 = vunpack.c.h.bf16 %v2617_v21  ;;  %v2491_v21 = vunpack.c.h.bf16 %v2607_v0 }
  0x21   :  { %1251 = vmatprep.subr.bf16.mxu1 %v3098_v2  ;;  %v303_v63 = vpack.c.bf16 %v290_v38, %v289_v36  ;;  %v2490_v36 = vunpack.c.l.bf16 %v2607_v0  ;;  %v2534_v0 = vunpack.c.l.bf16 %v2618_v53 }
  0x22   :  { %2679 = vmatmul.mubr.bf16.vlgmr.msra.gmra.mxu0 %v3269_v51  ;;  %v3430_v29 = vadd.f32 %v2531_v45, %v3342_v49 }
  0x23   :  { %438 = vmatmul.mubr.bf16.vlgmr.msra.gmra.mxu1 %v301_v54  ;;  %821 = vmatpush1.bf16.msra.mxu0 %v3103_v3  ;;  %v2471_v54 = vunpack.c.h.bf16 %v2602_v39  ;;  %v3400_v39 = vadd.f32 %v2526_v22, %v3342_v49  ;;  %v3427_v22 = vadd.f32 %v2530_v44, %v3342_v49  ;;  %v2621_v44 = vld [vmem:[%s4873_s0 + $0xb0] sm:$0xff]  }
  0x24   :  { %822 = vmatprep.subr.bf16.mxu0 %v3113_v5  ;;  %2682 = vmatprep.mubr.bf16.mxu0 %v3275_v57  ;;  %v2547_v7 = vunpack.c.h.bf16 %v2621_v44 }
  0x25   :  { %447 = vmatprep.mubr.bf16.mxu1 %v4881_v1  ;;  %1252 = vmatpush1.bf16.msra.mxu1 %v3103_v3  ;;  %v292_v31 = vadd.f32 %v2471_v54, %v3228_v37  ;;  %v3411_v54 = vld [vmem:[%s4874_s1 + $0x1] ss:$0 sm:$0xff] }
  0x26   :  { %1253 = vmatprep.subr.bf16.mxu1 %v3113_v5  ;;  %v796_v45 = vadd.f32 %v2490_v36, %v3411_v54  ;;  %v2622_v36 = vld [vmem:[%s4873_s0 + $0xb8] sm:$0xff]  }
  0x27   :  { %823 = vmatpush1.bf16.msra.mxu0 %v3118_v6  ;;  %v304_v38 = vpack.c.bf16 %v292_v31, %v291_v30  ;;  %v3450_v30 = vadd.f32 %v2535_v50, %v3342_v49  ;;  %v2551_v34 = vunpack.c.h.bf16 %v2622_v36  ;;  %v3487_v50 = vadd.f32 %v2547_v7, %v3342_v49 }
  0x28   :  { %824 = vmatprep.subr.bf16.mxu0 %v3127_v8 }
  0x29   :  { %1254 = vmatpush1.bf16.msra.mxu1 %v3118_v6 }
  0x2a   :  { %2683 = vmatmul.mubr.bf16.gmra.mxu0 %v3309_v18  ;;  %1255 = vmatprep.subr.bf16.mxu1 %v3127_v8 }
  0x2b   :  { %448 = vmatmul.mubr.bf16.gmra.mxu1 %v302_v24  ;;  %825 = vmatpush1.bf16.msra.mxu0 %v3132_v9  ;;  %v2474_v24 = vunpack.c.l.bf16 %v3357_v55  ;;  %v2620_v55 = vld [vmem:[%s4873_s0 + $0xa8] sm:$0xff]  }
  0x2c   :  { %826 = vmatprep.subr.bf16.mxu0 %v3142_v11  ;;  %2686 = vmatprep.mubr.bf16.mxu0 %v3316_v25  ;;  %v2542_v31 = vunpack.c.l.bf16 %v2620_v55  ;;  %v2543_v53 = vunpack.c.h.bf16 %v2620_v55 }
  0x2d   :  { %457 = vmatprep.mubr.bf16.mxu1 %v4881_v1  ;;  %1256 = vmatpush1.bf16.msra.mxu1 %v3132_v9  ;;  %v293_v52 = vadd.f32 %v2474_v24, %v3228_v37  ;;  %v3447_v24 = vadd.f32 %v2534_v0, %v3342_v49  ;;  %v2546_v0 = vunpack.c.l.bf16 %v2621_v44  ;;  %v2608_v44 = vld [vmem:[%s4873_s0 + $0x48] sm:$0xff]  }
  0x2e   :  { %1257 = vmatprep.subr.bf16.mxu1 %v3142_v11  ;;  %v3467_v55 = vadd.f32 %v2542_v31, %v3342_v49  ;;  %v3470_v10 = vadd.f32 %v2543_v53, %v3342_v49  ;;  %v294_v31 = vadd.f32 %v2475_v58, %v3228_v37  ;;  %v2495_v33 = vunpack.c.h.bf16 %v2608_v44 }
  0x2f   :  { %827 = vmatpush1.bf16.msra.mxu0 %v3147_v12 }
  0x30   :  { %828 = vmatprep.subr.bf16.mxu0 %v3157_v14 }
  0x31   :  { %1258 = vmatpush1.bf16.msra.mxu1 %v3147_v12 }
  0x32   :  { %2687 = vmatmul.mubr.bf16.gmra.mxu0 %v3364_v62  ;;  %1259 = vmatprep.subr.bf16.mxu1 %v3157_v14 }
  0x33   :  { %458 = vmatmul.mubr.bf16.gmra.mxu1 %v303_v63  ;;  %829 = vmatpush1.bf16.msra.mxu0 %v3162_v15  ;;  %v797_v63 = vadd.f32 %v2491_v21, %v3411_v54  ;;  %v2550_v21 = vunpack.c.l.bf16 %v2622_v36  ;;  %v3498_v36 = vadd.f32 %v2551_v34, %v3342_v49 }
  0x34   :  { %830 = vmatprep.subr.bf16.mxu0 %v3172_v17  ;;  %2690 = vmatprep.mubr.bf16.mxu0 %v3389_v23 }
  0x35   :  { %467 = vmatprep.mubr.bf16.mxu1 %v4881_v1  ;;  %1260 = vmatpush1.bf16.msra.mxu1 %v3162_v15  ;;  %v2539_v1 = vunpack.c.h.bf16 %v2619_v59  ;;  %v3458_v59 = vadd.f32 %v2538_v13, %v3342_v49  ;;  %v3477_v13 = vadd.f32 %v2546_v0, %v3342_v49  ;;  %v4943_v0 = vmov 0  }
  0x36   :  { %1261 = vmatprep.subr.bf16.mxu1 %v3172_v17  ;;  %v3495_v58 = vadd.f32 %v2550_v21, %v3342_v49  ;;  %v812_v53 = vpack.c.bf16 %v797_v63, %v796_v45  ;;  %v305_v21 = vpack.c.bf16 %v294_v31, %v293_v52  ;;  %v799_v63 = vadd.f32 %v2495_v33, %v3411_v54  ;;  %v2609_v52 = vld [vmem:[%s4873_s0 + $0x50] sm:$0xff]  }
  0x37   :  { %831 = vmatpush1.bf16.msra.mxu0 %v3180_v19  ;;  %v3461_v4 = vadd.f32 %v2539_v1, %v3342_v49  ;;  %v2494_v1 = vunpack.c.l.bf16 %v2608_v44 }
  0x38   :  { %832 = vmatprep.subr.bf16.mxu0 %v3201_v26  ;;  %v1250_v48 = vpack.c.bf16 %v3498_v36, %v3495_v58 }
  0x39   :  { %1262 = vmatpush1.bf16.msra.mxu1 %v3180_v19  ;;  %v798_v7 = vadd.f32 %v2494_v1, %v3411_v54  ;;  %v2499_v1 = vunpack.c.h.bf16 %v2609_v52 }
  0x3a   :  { %2691 = vmatmul.mubr.bf16.gmra.mxu0 %v3416_v56  ;;  %1263 = vmatprep.subr.bf16.mxu1 %v3201_v26 }
  0x3b   :  { %468 = vmatmul.mubr.bf16.gmra.mxu1 %v304_v38  ;;  %833 = vmatpush1.bf16.msra.mxu0 %v3220_v35  ;;  %v2604_v38 = vld [vmem:[%s4873_s0 + $0x28] sm:$0xff]   ;;  %v813_v33 = vpack.c.bf16 %v799_v63, %v798_v7 }
  0x3c   :  { %834 = vmatprep.subr.bf16.mxu0 %v3234_v40  ;;  %477 = vmatprep.mubr.bf16.mxu1 %v4943_v0  ;;  %v2478_v34 = vunpack.c.l.bf16 %v2604_v38  ;;  %v2479_v49 = vunpack.c.h.bf16 %v2604_v38 }
  0x3d   :  { %852 = vmatprep.mubr.bf16.mxu0 %v4943_v0  ;;  %1264 = vmatpush1.bf16.msra.mxu1 %v3220_v35 }
  0x3e   :  { %1265 = vmatprep.subr.bf16.mxu1 %v3234_v40  ;;  %v295_v45 = vadd.f32 %v2478_v34, %v3228_v37  ;;  %v296_v44 = vadd.f32 %v2479_v49, %v3228_v37  ;;  %v801_v34 = vadd.f32 %v2499_v1, %v3411_v54  ;;  %v2611_v1 = vld [vmem:[%s4873_s0 + $0x60] sm:$0xff]  }
  0x3f   :  { %835 = vmatpush1.bf16.msra.mxu0 %v3252_v46 }
  0x40   :  { %1620 = vmatprep.subr.bf16.mxu0 %v3098_v2  ;;  %v2605_v2 = vld [vmem:[%s4873_s0 + $0x30] sm:$0xff]   ;;  %v306_v31 = vpack.c.bf16 %v296_v44, %v295_v45 }
  0x41   :  { %1266 = vmatpush1.bf16.msra.mxu1 %v3252_v46  ;;  %v2483_v38 = vunpack.c.h.bf16 %v2605_v2 }
  0x42   :  { %853 = vmatmul.mubr.bf16.vlgmr.msra.gmra.mxu0 %v812_v53  ;;  %v2482_v53 = vunpack.c.l.bf16 %v2605_v2 }
  0x43   :  { %478 = vmatmul.mubr.bf16.gmra.mxu1 %v305_v21  ;;  %1621 = vmatpush1.bf16.msra.mxu0 %v3103_v3  ;;  %v2498_v3 = vunpack.c.l.bf16 %v2609_v52  ;;  %v298_v7 = vadd.f32 %v2483_v38, %v3228_v37 }
  0x44   :  { %487 = vmatprep.mubr.bf16.mxu1 %v4943_v0  ;;  %862 = vmatprep.mubr.bf16.mxu0 %v4943_v0 }
  0x45   :  { %1622 = vmatprep.subr.bf16.mxu0 %v3113_v5  ;;  %v800_v21 = vadd.f32 %v2498_v3, %v3411_v54  ;;  %v297_v5 = vadd.f32 %v2482_v53, %v3228_v37 }
  0x47   :  { %1623 = vmatpush1.bf16.msra.mxu0 %v3118_v6  ;;  %v2610_v6 = vld [vmem:[%s4873_s0 + $0x58] sm:$0xff]   ;;  %v814_v49 = vpack.c.bf16 %v801_v34, %v800_v21  ;;  %v307_v44 = vpack.c.bf16 %v298_v7, %v297_v5  ;;  %v4944_v5 = vpack.c.bf16 %v3381_v20, %v3378_v16  ;;  %v4945_v16 = vpack.c.bf16 %v3403_v43, %v3400_v39 }
  0x48   :  { %1624 = vmatprep.subr.bf16.mxu0 %v3127_v8  ;;  %v2606_v8 = vld [vmem:[%s4873_s0 + $0x38] sm:$0xff]   ;;  %v2502_v63 = vunpack.c.l.bf16 %v2610_v6  ;;  %v2503_v45 = vunpack.c.h.bf16 %v2610_v6  ;;  %v4946_v39 = vpack.c.bf16 %v3430_v29, %v3427_v22  ;;  %v4949_v22 = vpack.c.bf16 %v3470_v10, %v3467_v55 }
  0x49   :  { %v2486_v52 = vunpack.c.l.bf16 %v2606_v8  ;;  %v2487_v2 = vunpack.c.h.bf16 %v2606_v8  ;;  %v2614_v20 = vld [vmem:[%s4873_s0 + $0x78] sm:$0xff]  }
  0x4a   :  { %863 = vmatmul.mubr.bf16.gmra.mxu0 %v813_v33  ;;  %v802_v33 = vadd.f32 %v2502_v63, %v3411_v54  ;;  %v2518_v63 = vunpack.c.l.bf16 %v2614_v20 }
  0x4b   :  { %488 = vmatmul.mubr.bf16.gmra.mxu1 %v306_v31  ;;  %872 = vmatprep.mubr.bf16.mxu0 %v4943_v0  ;;  %v300_v3 = vadd.f32 %v2487_v2, %v3228_v37  ;;  %v2507_v31 = vunpack.c.h.bf16 %v2611_v1  ;;  %v4947_v2 = vpack.c.bf16 %v3450_v30, %v3447_v24 }
  0x4c   :  { %497 = vmatprep.mubr.bf16.mxu1 %v4943_v0  ;;  %1625 = vmatpush1.bf16.msra.mxu0 %v3132_v9  ;;  %v803_v9 = vadd.f32 %v2503_v45, %v3411_v54  ;;  %v2519_v45 = vunpack.c.h.bf16 %v2614_v20 }
  0x4d   :  { %1626 = vmatprep.subr.bf16.mxu0 %v3142_v11  ;;  %v299_v11 = vadd.f32 %v2486_v52, %v3228_v37  ;;  %v805_v38 = vadd.f32 %v2507_v31, %v3411_v54 }
  0x4e   :  { %v811_v52 = vadd.f32 %v2519_v45, %v3411_v54 }
  0x4f   :  { %v308_v53 = vpack.c.bf16 %v300_v3, %v299_v11 }
  0x50   :  { %1627 = vmatpush1.bf16.msra.mxu0 %v3147_v12  ;;  %v815_v12 = vpack.c.bf16 %v803_v9, %v802_v33 }
  0x51   :  { %1628 = vmatprep.subr.bf16.mxu0 %v3157_v14  ;;  %v2506_v14 = vunpack.c.l.bf16 %v2611_v1 }
  0x52   :  { %873 = vmatmul.mubr.bf16.gmra.mxu0 %v814_v49 }
  0x53   :  { %498 = vmatmul.mubr.bf16.gmra.mxu1 %v307_v44  ;;  %882 = vmatprep.mubr.bf16.mxu0 %v4943_v0  ;;  %v804_v37 = vadd.f32 %v2506_v14, %v3411_v54  ;;  %v810_v44 = vadd.f32 %v2518_v63, %v3411_v54 }
  0x54   :  { %507 = vmatprep.mubr.bf16.mxu1 %v4943_v0  ;;  %1629 = vmatpush1.bf16.msra.mxu0 %v3162_v15  ;;  %v2612_v15 = vld [vmem:[%s4873_s0 + $0x68] sm:$0xff]  }
  0x55   :  { %1630 = vmatprep.subr.bf16.mxu0 %v3172_v17  ;;  %v816_v17 = vpack.c.bf16 %v805_v38, %v804_v37  ;;  %v819_v43 = vpack.c.bf16 %v811_v52, %v810_v44 }
  0x58   :  { %1631 = vmatpush1.bf16.msra.mxu0 %v3180_v19  ;;  %v2510_v19 = vunpack.c.l.bf16 %v2612_v15 }
  0x59   :  { %1632 = vmatprep.subr.bf16.mxu0 %v3201_v26  ;;  %v2511_v26 = vunpack.c.h.bf16 %v2612_v15 }
  0x5a   :  { %883 = vmatmul.mubr.bf16.gmra.mxu0 %v815_v12  ;;  %v806_v21 = vadd.f32 %v2510_v19, %v3411_v54 }
  0x5b   :  { %508 = vmatmul.mubr.bf16.gmra.mxu1 %v308_v53  ;;  %892 = vmatprep.mubr.bf16.mxu0 %v4943_v0  ;;  %v807_v34 = vadd.f32 %v2511_v26, %v3411_v54 }
  0x5c   :  { %1283 = vmatprep.mubr.bf16.mxu1 %v4943_v0  ;;  %1633 = vmatpush1.bf16.msra.mxu0 %v3220_v35  ;;  %v2613_v35 = vld [vmem:[%s4873_s0 + $0x70] sm:$0xff]  }
  0x5d   :  { %1634 = vmatprep.subr.bf16.mxu0 %v3234_v40  ;;  %v817_v40 = vpack.c.bf16 %v807_v34, %v806_v21  ;;  %v2514_v7 = vunpack.c.l.bf16 %v2613_v35 }
  0x5f   :  { %v808_v6 = vadd.f32 %v2514_v7, %v3411_v54 }
  0x60   :  { %1635 = vmatpush1.bf16.msra.mxu0 %v3252_v46  ;;  %v2515_v46 = vunpack.c.h.bf16 %v2613_v35 }
  0x62   :  { %893 = vmatmul.mubr.bf16.gmra.mxu0 %v816_v17  ;;  %v809_v8 = vadd.f32 %v2515_v46, %v3411_v54  ;;  %v4948_v54 = vpack.c.bf16 %v3461_v4, %v3458_v59 }
  0x63   :  { %1284 = vmatmul.mubr.bf16.vlgmr.msra.gmra.mxu1 %v4944_v5  ;;  %902 = vmatprep.mubr.bf16.mxu0 %v4943_v0 }
  0x64   :  { %1293 = vmatprep.mubr.bf16.mxu1 %v4943_v0  ;;  %v818_v49 = vpack.c.bf16 %v809_v8, %v808_v6 }
  0x6a   :  { %903 = vmatmul.mubr.bf16.gmra.mxu0 %v817_v40 }
  0x6b   :  { %1294 = vmatmul.mubr.bf16.gmra.mxu1 %v4945_v16  ;;  %912 = vmatprep.mubr.bf16.mxu0 %v4943_v0 }
  0x6c   :  { %1303 = vmatprep.mubr.bf16.mxu1 %v4943_v0 }
  0x72   :  { %913 = vmatmul.mubr.bf16.gmra.mxu0 %v818_v49 }
  0x73   :  { %1304 = vmatmul.mubr.bf16.gmra.mxu1 %v4946_v39  ;;  %922 = vmatprep.mubr.bf16.mxu0 %v4943_v0 }
  0x74   :  { %1313 = vmatprep.mubr.bf16.mxu1 %v4943_v0 }
  0x7a   :  { %923 = vmatmul.mubr.bf16.gmra.mxu0 %v819_v43 }
  0x7b   :  { %1314 = vmatmul.mubr.bf16.gmra.mxu1 %v4947_v2  ;;  %1652 = vmatprep.mubr.bf16.mxu0 %v4943_v0 }
  0x7c   :  { %1323 = vmatprep.mubr.bf16.mxu1 %v4943_v0 }
  0x82   :  { %1653 = vmatmul.mubr.bf16.vlgmr.msra.gmra.mxu0 %v3214_v32  ;;  %v4950_v32 = vpack.c.bf16 %v3487_v50, %v3477_v13 }
  0x83   :  { %1324 = vmatmul.mubr.bf16.gmra.mxu1 %v4948_v54  ;;  %1662 = vmatprep.mubr.bf16.mxu0 %v4943_v0 }
  0x84   :  { %1333 = vmatprep.mubr.bf16.mxu1 %v4943_v0 }
  0x8a   :  { %1663 = vmatmul.mubr.bf16.gmra.mxu0 %v3269_v51 }
  0x8b   :  { %1334 = vmatmul.mubr.bf16.gmra.mxu1 %v4949_v22  ;;  %1672 = vmatprep.mubr.bf16.mxu0 %v4943_v0 }
  0x8c   :  { %1343 = vmatprep.mubr.bf16.mxu1 %v4943_v0 }
  0x92   :  { %1673 = vmatmul.mubr.bf16.gmra.mxu0 %v3275_v57 }
  0x93   :  { %1344 = vmatmul.mubr.bf16.gmra.mxu1 %v4950_v32  ;;  %1682 = vmatprep.mubr.bf16.mxu0 %v4943_v0 }
  0x94   :  { %1353 = vmatprep.mubr.bf16.mxu1 %v4943_v0 }
  0x9a   :  { %1683 = vmatmul.mubr.bf16.gmra.mxu0 %v3309_v18 }
  0x9b   :  { %1354 = vmatmul.mubr.bf16.gmra.mxu1 %v1250_v48  ;;  %1692 = vmatprep.mubr.bf16.mxu0 %v4943_v0 }
  0xa2   :  { %1693 = vmatmul.mubr.bf16.gmra.mxu0 %v3316_v25 }
  0xa3   :  { %1702 = vmatprep.mubr.bf16.mxu0 %v4943_v0 }
  0xaa   :  { %1703 = vmatmul.mubr.bf16.gmra.mxu0 %v3364_v62 }
  0xab   :  { %1712 = vmatprep.mubr.bf16.mxu0 %v4943_v0 }
  0xb2   :  { %1713 = vmatmul.mubr.bf16.gmra.mxu0 %v3389_v23 }
  0xb3   :  { %1722 = vmatprep.mubr.bf16.mxu0 %v4943_v0 }
  0xba   :  { %1723 = vmatmul.mubr.bf16.gmra.mxu0 %v3416_v56 }
  0xe2   :  { %v3627_v51 = vpop.f32.mrf.mxu0 }
  0xe3   :  { %v439_v57 = vpop.f32.mrf.mxu1 }
  0xe4   :  { %v3629_v48 = vpop.f32.mrf.mxu0 }
  0xe5   :  { %v3631_v10 = vpop.f32.mrf.mxu1  ;;  %v518_v18 = vmul.f32 %v439_v57, %v3629_v48 }
  0xe6   :  { %v3634_v25 = vpop.f32.mrf.mxu0 }
  0xe7   :  { %v443_v62 = vpop.f32.mrf.mxu1  ;;  %534 = vadd.xlane.f32.xlu0 %v518_v18 }
  0xe8   :  { %v3636_v4 = vpop.f32.mrf.mxu0 }
  0xe9   :  { %v3638_v23 = vpop.f32.mrf.mxu1  ;;  %v519_v29 = vmul.f32 %v443_v62, %v3636_v4 }
  0xea   :  { %v3641_v56 = vpop.f32.mrf.mxu0 }
  0xeb   :  { %v449_v24 = vpop.f32.mrf.mxu1  ;;  %536 = vadd.xlane.f32.xlu0 %v519_v29 }
  0xec   :  { %v3643_v30 = vpop.f32.mrf.mxu0  ;;  %v520_v59 = vmul.f32 %v3627_v51, %v449_v24 }
  0xed   :  { %v3646_v50 = vpop.f32.mrf.mxu1 }
  0xee   :  { %538 = vadd.xlane.f32.xlu1 %v520_v59  ;;  %v3648_v55 = vpop.f32.mrf.mxu0 }
  0xef   :  { %v453_v13 = vpop.f32.mrf.mxu1 }
  0xf0   :  { %v521_v0 = vmul.f32 %v3634_v25, %v453_v13  ;;  %v3651_v58 = vpop.f32.mrf.mxu0 }
  0xf1   :  { %v3653_v36 = vpop.f32.mrf.mxu1 }
  0xf2   :  { %540 = vadd.xlane.f32.xlu1 %v521_v0  ;;  %v3655_v33 = vpop.f32.mrf.mxu0 }
  0xf3   :  { %v459_v9 = vpop.f32.mrf.mxu1 }
  0xf4   :  { %v522_v11 = vmul.f32 %v459_v9, %v3643_v30  ;;  %v3658_v3 = vpop.f32.mrf.mxu0 }
  0xf5   :  { %v3660_v1 = vpop.f32.mrf.mxu1 }
  0xf6   :  { %542 = vadd.xlane.f32.xlu0 %v522_v11  ;;  %v3662_v12 = vpop.f32.mrf.mxu0 }
  0xf7   :  { %v463_v14 = vpop.f32.mrf.mxu1 }
  0xf8   :  { %v523_v31 = vmul.f32 %v463_v14, %v3651_v58  ;;  %v3665_v53 = vpop.f32.mrf.mxu0 }
  0xf9   :  { %v3667_v37 = vpop.f32.mrf.mxu1 }
  0xfa   :  { %544 = vadd.xlane.f32.xlu1 %v523_v31  ;;  %v3669_v38 = vpop.f32.mrf.mxu0 }
  0xfb   :  { %v469_v15 = vpop.f32.mrf.mxu1 }
  0xfc   :  { %v524_v17 = vmul.f32 %v3641_v56, %v469_v15  ;;  %v3672_v19 = vpop.f32.mrf.mxu0 }
  0xfd   :  { %v3674_v26 = vpop.f32.mrf.mxu1 }
  0xfe   :  { %546 = vadd.xlane.f32.xlu0 %v524_v17  ;;  %v3676_v21 = vpop.f32.mrf.mxu0 }
  0xff   :  { %v473_v34 = vpop.f32.mrf.mxu1 }
 0x100   :  { %v525_v5 = vmul.f32 %v3648_v55, %v473_v34  ;;  %v3679_v35 = vpop.f32.mrf.mxu0 }
 0x101   :  { %v3681_v40 = vpop.f32.mrf.mxu1 }
 0x102   :  { %548 = vadd.xlane.f32.xlu1 %v525_v5  ;;  %v854_v7 = vpop.f32.mrf.mxu0 }
 0x103   :  { %v479_v46 = vpop.f32.mrf.mxu1  ;;  %v933_v6 = vmul.f32 %v854_v7, %v3629_v48 }
 0x104   :  { %v3684_v8 = vpop.f32.mrf.mxu0  ;;  %v526_v49 = vmul.f32 %v479_v46, %v3658_v3 }
 0x105   :  { %v3686_v16 = vpop.f32.mrf.mxu1  ;;  %949 = vadd.xlane.f32.xlu0 %v933_v6 }
 0x106   :  { %v858_v20 = vpop.f32.mrf.mxu0 }
 0x107   :  { %v483_v63 = vpop.f32.mrf.mxu1  ;;  %v934_v45 = vmul.f32 %v858_v20, %v3636_v4 }
 0x108   :  { %v3690_v44 = vpop.f32.mrf.mxu0  ;;  %v527_v43 = vmul.f32 %v483_v63, %v3665_v53 }
 0x109   :  { %v3692_v52 = vpop.f32.mrf.mxu1  ;;  %550 = vadd.xlane.f32.xlu0 %v526_v49  ;;  %951 = vadd.xlane.f32.xlu1 %v934_v45 }
 0x10a   :  { %v864_v39 = vpop.f32.mrf.mxu0 }
 0x10b   :  { %v489_v2 = vpop.f32.mrf.mxu1  ;;  %v935_v54 = vmul.f32 %v3627_v51, %v864_v39 }
 0x10c   :  { %v3696_v22 = vpop.f32.mrf.mxu0  ;;  %v528_v18 = vmul.f32 %v3655_v33, %v489_v2 }
 0x10d   :  { %v3698_v32 = vpop.f32.mrf.mxu1  ;;  %552 = vadd.xlane.f32.xlu1 %v527_v43  ;;  %953 = vadd.xlane.f32.xlu0 %v935_v54 }
 0x10e   :  { %v868_v57 = vpop.f32.mrf.mxu0 }
 0x10f   :  { %v493_v62 = vpop.f32.mrf.mxu1  ;;  %v936_v29 = vmul.f32 %v3634_v25, %v868_v57 }
 0x110   :  { %v3702_v24 = vpop.f32.mrf.mxu0  ;;  %v529_v0 = vmul.f32 %v3662_v12, %v493_v62 }
 0x111   :  { %v3704_v59 = vpop.f32.mrf.mxu1  ;;  %554 = vadd.xlane.f32.xlu0 %v528_v18  ;;  %955 = vadd.xlane.f32.xlu1 %v936_v29 }
 0x112   :  { %v874_v13 = vpop.f32.mrf.mxu0 }
 0x113   :  { %v499_v9 = vpop.f32.mrf.mxu1  ;;  %v937_v11 = vmul.f32 %v874_v13, %v3643_v30 }
 0x114   :  { %v3708_v14 = vpop.f32.mrf.mxu0  ;;  %v530_v17 = vmul.f32 %v499_v9, %v3672_v19 }
 0x115   :  { %v3710_v31 = vpop.f32.mrf.mxu1  ;;  %556 = vadd.xlane.f32.xlu1 %v529_v0  ;;  %957 = vadd.xlane.f32.xlu0 %v937_v11 }
 0x116   :  { %v878_v15 = vpop.f32.mrf.mxu0 }
 0x117   :  { %v503_v34 = vpop.f32.mrf.mxu1  ;;  %v938_v5 = vmul.f32 %v878_v15, %v3651_v58 }
 0x118   :  { %v3714_v7 = vpop.f32.mrf.mxu0  ;;  %v531_v20 = vmul.f32 %v503_v34, %v3679_v35 }
 0x119   :  { %v3716_v46 = vpop.f32.mrf.mxu1  ;;  %558 = vadd.xlane.f32.xlu0 %v530_v17  ;;  %959 = vadd.xlane.f32.xlu1 %v938_v5 }
 0x11a   :  { %v884_v6 = vpop.f32.mrf.mxu0 }
 0x11b   :  { %v509_v49 = vpop.f32.mrf.mxu1  ;;  %v939_v63 = vmul.f32 %v3641_v56, %v884_v6 }
 0x11c   :  { %v3720_v45 = vpop.f32.mrf.mxu0  ;;  %v532_v2 = vmul.f32 %v3669_v38, %v509_v49 }
 0x11d   :  { %v3722_v39 = vpop.f32.mrf.mxu1  ;;  %961 = vadd.xlane.f32.xlu0 %v939_v63  ;;  %560 = vadd.xlane.f32.xlu1 %v531_v20 }
 0x11e   :  { %v888_v43 = vpop.f32.mrf.mxu0 }
 0x11f   :  { %v513_v54 = vpop.f32.mrf.mxu1  ;;  %v940_v57 = vmul.f32 %v3648_v55, %v888_v43 }
 0x120   :  { %v3726_v18 = vpop.f32.mrf.mxu0  ;;  %v533_v13 = vmul.f32 %v3676_v21, %v513_v54 }
 0x121   :  { %v3728_v62 = vpop.f32.mrf.mxu1  ;;  %562 = vadd.xlane.f32.xlu0 %v532_v2  ;;  %963 = vadd.xlane.f32.xlu1 %v940_v57 }
 0x122   :  { %v894_v29 = vpop.f32.mrf.mxu0 }
 0x123   :  { %v1285_v0 = vpop.f32.mrf.mxu1  ;;  %v941_v5 = vmul.f32 %v894_v29, %v3658_v3 }
 0x124   :  { %v1364_v9 = vmul.f32 %v1285_v0, %v3629_v48  ;;  %v3732_v11 = vpop.f32.mrf.mxu0 }
 0x125   :  { %4951 = vst [vmem:[#allocation19_spill] sm:$0xff] %v3732_v11  ;;  %v3734_v15 = vpop.f32.mrf.mxu1  ;;  %564 = vadd.xlane.f32.xlu1 %v533_v13 }
 0x126   :  { %4952 = vst [vmem:[#allocation20_spill] sm:$0xff] %v3734_v15  ;;  %1380 = vadd.xlane.f32.xlu0 %v1364_v9  ;;  %v898_v17 = vpop.f32.mrf.mxu0 }
 0x127   :  { %v1289_v34 = vpop.f32.mrf.mxu1  ;;  %v942_v2 = vmul.f32 %v898_v17, %v3665_v53 }
 0x128   :  { %v1365_v6 = vmul.f32 %v1289_v34, %v3636_v4  ;;  %v3738_v20 = vpop.f32.mrf.mxu0 }
 0x129   :  { %4953 = vst [vmem:[#allocation21_spill] sm:$0xff] %v3738_v20  ;;  %v3740_v49 = vpop.f32.mrf.mxu1 }
 0x12a   :  { %4954 = vst [vmem:[#allocation22_spill] sm:$0xff] %v3740_v49  ;;  %965 = vadd.xlane.f32.xlu0 %v941_v5  ;;  %1382 = vadd.xlane.f32.xlu1 %v1365_v6  ;;  %v904_v63 = vpop.f32.mrf.mxu0 }
 0x12b   :  { %v1295_v43 = vpop.f32.mrf.mxu1  ;;  %v943_v9 = vmul.f32 %v3655_v33, %v904_v63 }
 0x12c   :  { %v1366_v54 = vmul.f32 %v3627_v51, %v1295_v43  ;;  %v3744_v57 = vpop.f32.mrf.mxu0 }
 0x12d   :  { %4955 = vst [vmem:[#allocation23_spill] sm:$0xff] %v3744_v57  ;;  %v3746_v13 = vpop.f32.mrf.mxu1 }
 0x12e   :  { %4956 = vst [vmem:[#allocation24_spill] sm:$0xff] %v3746_v13  ;;  %1384 = vadd.xlane.f32.xlu0 %v1366_v54  ;;  %967 = vadd.xlane.f32.xlu1 %v942_v2  ;;  %v908_v29 = vpop.f32.mrf.mxu0 }
 0x12f   :  { %v1299_v0 = vpop.f32.mrf.mxu1  ;;  %v944_v47 = vmul.f32 %v3662_v12, %v908_v29 }
 0x130   :  { %v1367_v34 = vmul.f32 %v3634_v25, %v1299_v0  ;;  %v3750_v5 = vpop.f32.mrf.mxu0 }
 0x131   :  { %4957 = vst [vmem:[#allocation25_spill] sm:$0xff] %v3750_v5  ;;  %v3752_v6 = vpop.f32.mrf.mxu1 }
 0x132   :  { %4958 = vst [vmem:[#allocation26_spill] sm:$0xff] %v3752_v6  ;;  %969 = vadd.xlane.f32.xlu0 %v943_v9  ;;  %1386 = vadd.xlane.f32.xlu1 %v1367_v34  ;;  %v914_v17 = vpop.f32.mrf.mxu0 }
 0x133   :  { %v1305_v43 = vpop.f32.mrf.mxu1  ;;  %v945_v60 = vmul.f32 %v914_v17, %v3672_v19 }
 0x134   :  { %v1368_v61 = vmul.f32 %v1305_v43, %v3643_v30  ;;  %v3756_v54 = vpop.f32.mrf.mxu0 }
 0x135   :  { %4959 = vst [vmem:[#allocation27_spill] sm:$0xff] %v3756_v54  ;;  %v3758_v2 = vpop.f32.mrf.mxu1 }
 0x136   :  { %4960 = vst [vmem:[#allocation28_spill] sm:$0xff] %v3758_v2  ;;  %1388 = vadd.xlane.f32.xlu0 %v1368_v61  ;;  %971 = vadd.xlane.f32.xlu1 %v944_v47  ;;  %v918_v63 = vpop.f32.mrf.mxu0 }
 0x137   :  { %v1309_v0 = vpop.f32.mrf.mxu1  ;;  %v946_v27 = vmul.f32 %v918_v63, %v3679_v35 }
 0x138   :  { %v1369_v28 = vmul.f32 %v1309_v0, %v3651_v58  ;;  %v3762_v9 = vpop.f32.mrf.mxu0 }
 0x139   :  { %4961 = vst [vmem:[#allocation29_spill] sm:$0xff] %v3762_v9  ;;  %v3764_v34 = vpop.f32.mrf.mxu1 }
 0x13a   :  { %4962 = vst [vmem:[#allocation30_spill] sm:$0xff] %v3764_v34  ;;  %973 = vadd.xlane.f32.xlu0 %v945_v60  ;;  %1390 = vadd.xlane.f32.xlu1 %v1369_v28  ;;  %v924_v29 = vpop.f32.mrf.mxu0 }
 0x13b   :  { %v1315_v43 = vpop.f32.mrf.mxu1  ;;  %v947_v41 = vmul.f32 %v3669_v38, %v924_v29 }
 0x13c   :  { %v1370_v42 = vmul.f32 %v3641_v56, %v1315_v43  ;;  %v3768_v61 = vpop.f32.mrf.mxu0 }
 0x13d   :  { %4963 = vst [vmem:[#allocation31_spill] sm:$0xff] %v3768_v61  ;;  %v3770_v47 = vpop.f32.mrf.mxu1 }
 0x13e   :  { %4964 = vst [vmem:[#allocation32_spill] sm:$0xff] %v3770_v47  ;;  %1392 = vadd.xlane.f32.xlu0 %v1370_v42  ;;  %975 = vadd.xlane.f32.xlu1 %v946_v27  ;;  %v928_v17 = vpop.f32.mrf.mxu0 }
 0x13f   :  { %v1319_v0 = vpop.f32.mrf.mxu1  ;;  %v948_v47 = vmul.f32 %v3676_v21, %v928_v17 }
 0x140   :  { %v1371_v34 = vmul.f32 %v3648_v55, %v1319_v0  ;;  %v3774_v60 = vpop.f32.mrf.mxu0 }
 0x141   :  { %4965 = vst [vmem:[#allocation33_spill] sm:$0xff] %v3774_v60  ;;  %v3776_v28 = vpop.f32.mrf.mxu1 }
 0x142   :  { %4966 = vst [vmem:[#allocation34_spill] sm:$0xff] %v3776_v28  ;;  %977 = vadd.xlane.f32.xlu0 %v947_v41  ;;  %1394 = vadd.xlane.f32.xlu1 %v1371_v34  ;;  %v1654_v63 = vpop.f32.mrf.mxu0 }
 0x143   :  { %v1325_v43 = vpop.f32.mrf.mxu1  ;;  %v1733_v2 = vmul.f32 %v1654_v63, %v3629_v48 }
 0x144   :  { %v3780_v42 = vpop.f32.mrf.mxu0  ;;  %v1372_v28 = vmul.f32 %v1325_v43, %v3658_v3 }
 0x145   :  { %4967 = vst [vmem:[#allocation35_spill] sm:$0xff] %v3780_v42  ;;  %v3782_v27 = vpop.f32.mrf.mxu1 }
 0x146   :  { %4968 = vst [vmem:[#allocation36_spill] sm:$0xff] %v3782_v27  ;;  %1749 = vadd.xlane.f32.xlu0 %v1733_v2  ;;  %979 = vadd.xlane.f32.xlu1 %v948_v47  ;;  %v1658_v29 = vpop.f32.mrf.mxu0 }
 0x147   :  { %v1329_v0 = vpop.f32.mrf.mxu1  ;;  %v1734_v49 = vmul.f32 %v1658_v29, %v3636_v4 }
 0x148   :  { %v3786_v41 = vpop.f32.mrf.mxu0  ;;  %v1373_v27 = vmul.f32 %v1329_v0, %v3665_v53 }
 0x149   :  { %4969 = vst [vmem:[#allocation37_spill] sm:$0xff] %v3786_v41  ;;  %v3788_v34 = vpop.f32.mrf.mxu1 }
 0x14a   :  { %4970 = vst [vmem:[#allocation38_spill] sm:$0xff] %v3788_v34  ;;  %1396 = vadd.xlane.f32.xlu0 %v1372_v28  ;;  %1751 = vadd.xlane.f32.xlu1 %v1734_v49  ;;  %v1664_v48 = vpop.f32.mrf.mxu0 }
 0x14b   :  { %v1335_v17 = vpop.f32.mrf.mxu1  ;;  %v1735_v63 = vmul.f32 %v3627_v51, %v1664_v48 }
 0x14c   :  { %v3792_v2 = vpop.f32.mrf.mxu0  ;;  %v1374_v34 = vmul.f32 %v3655_v33, %v1335_v17 }
 0x14d   :  { %4971 = vst [vmem:[#allocation39_spill] sm:$0xff] %v3792_v2  ;;  %v3794_v47 = vpop.f32.mrf.mxu1 }
 0x14e   :  { %4972 = vst [vmem:[#allocation40_spill] sm:$0xff] %v3794_v47  ;;  %1753 = vadd.xlane.f32.xlu0 %v1735_v63  ;;  %1398 = vadd.xlane.f32.xlu1 %v1373_v27  ;;  %v1668_v4 = vpop.f32.mrf.mxu0 }
 0x14f   :  { %v1339_v43 = vpop.f32.mrf.mxu1  ;;  %v1736_v29 = vmul.f32 %v3634_v25, %v1668_v4 }
 0x150   :  { %v3798_v28 = vpop.f32.mrf.mxu0  ;;  %v1375_v47 = vmul.f32 %v3662_v12, %v1339_v43 }
 0x151   :  { %4973 = vst [vmem:[#allocation41_spill] sm:$0xff] %v3798_v28  ;;  %v3800_v49 = vpop.f32.mrf.mxu1 }
 0x152   :  { %4974 = vst [vmem:[#allocation42_spill] sm:$0xff] %v3800_v49  ;;  %1400 = vadd.xlane.f32.xlu0 %v1374_v34  ;;  %1755 = vadd.xlane.f32.xlu1 %v1736_v29  ;;  %v1674_v51 = vpop.f32.mrf.mxu0 }
 0x153   :  { %v1345_v0 = vpop.f32.mrf.mxu1  ;;  %v1737_v48 = vmul.f32 %v1674_v51, %v3643_v30 }
 0x154   :  { %v3804_v63 = vpop.f32.mrf.mxu0  ;;  %v1376_v49 = vmul.f32 %v1345_v0, %v3672_v19 }
 0x155   :  { %4975 = vst [vmem:[#allocation43_spill] sm:$0xff] %v3804_v63  ;;  %v3806_v27 = vpop.f32.mrf.mxu1 }
 0x156   :  { %4976 = vst [vmem:[#allocation44_spill] sm:$0xff] %v3806_v27  ;;  %1757 = vadd.xlane.f32.xlu0 %v1737_v48  ;;  %1402 = vadd.xlane.f32.xlu1 %v1375_v47  ;;  %v1678_v25 = vpop.f32.mrf.mxu0 }
 0x157   :  { %v1349_v17 = vpop.f32.mrf.mxu1  ;;  %v1738_v4 = vmul.f32 %v1678_v25, %v3651_v58 }
 0x158   :  { %v3810_v34 = vpop.f32.mrf.mxu0  ;;  %v1377_v27 = vmul.f32 %v1349_v17, %v3679_v35 }
 0x159   :  { %4977 = vst [vmem:[#allocation45_spill] sm:$0xff] %v3810_v34  ;;  %v3812_v29 = vpop.f32.mrf.mxu1 }
 0x15a   :  { %4978 = vst [vmem:[#allocation46_spill] sm:$0xff] %v3812_v29  ;;  %1404 = vadd.xlane.f32.xlu0 %v1376_v49  ;;  %1759 = vadd.xlane.f32.xlu1 %v1738_v4  ;;  %v1684_v30 = vpop.f32.mrf.mxu0 }
 0x15b   :  { %v1355_v43 = vpop.f32.mrf.mxu1  ;;  %v1739_v51 = vmul.f32 %v3641_v56, %v1684_v30 }
 0x15c   :  { %v3816_v48 = vpop.f32.mrf.mxu0  ;;  %v1378_v25 = vmul.f32 %v3669_v38, %v1355_v43 }
 0x15d   :  { %4979 = vst [vmem:[#allocation47_spill] sm:$0xff] %v3816_v48  ;;  %v3818_v47 = vpop.f32.mrf.mxu1 }
 0x15e   :  { %4980 = vst [vmem:[#allocation48_spill] sm:$0xff] %v3818_v47  ;;  %1761 = vadd.xlane.f32.xlu0 %v1739_v51  ;;  %1406 = vadd.xlane.f32.xlu1 %v1377_v27  ;;  %v1688_v58 = vpop.f32.mrf.mxu0 }
 0x15f   :  { %v1740_v0 = vmul.f32 %v3648_v55, %v1688_v58  ;;  %v1359_v49 = vpop.f32.mrf.mxu1 }
 0x160   :  { %v3822_v29 = vpop.f32.mrf.mxu0  ;;  %v1379_v17 = vmul.f32 %v3676_v21, %v1359_v49 }
 0x161   :  { %4981 = vst [vmem:[#allocation49_spill] sm:$0xff] %v3822_v29 }
 0x162   :  { %1408 = vadd.xlane.f32.xlu0 %v1378_v25  ;;  %1763 = vadd.xlane.f32.xlu1 %v1740_v0  ;;  %v1694_v4 = vpop.f32.mrf.mxu0 }
 0x163   :  { %v1741_v56 = vmul.f32 %v1694_v4, %v3658_v3 }
 0x164   :  { %v3826_v30 = vpop.f32.mrf.mxu0 }
 0x165   :  { %4982 = vst [vmem:[#allocation50_spill] sm:$0xff] %v3826_v30 }
 0x166   :  { %1765 = vadd.xlane.f32.xlu0 %v1741_v56  ;;  %1410 = vadd.xlane.f32.xlu1 %v1379_v17  ;;  %v1698_v27 = vpop.f32.mrf.mxu0 }
 0x167   :  { %v1742_v51 = vmul.f32 %v1698_v27, %v3665_v53 }
 0x168   :  { %v3829_v55 = vpop.f32.mrf.mxu0 }
 0x169   :  { %4983 = vst [vmem:[#allocation51_spill] sm:$0xff] %v3829_v55 }
 0x16a   :  { %1767 = vadd.xlane.f32.xlu1 %v1742_v51  ;;  %v1704_v43 = vpop.f32.mrf.mxu0 }
 0x16b   :  { %v1743_v58 = vmul.f32 %v3655_v33, %v1704_v43 }
 0x16c   :  { %v3832_v25 = vpop.f32.mrf.mxu0 }
 0x16d   :  { %4984 = vst [vmem:[#allocation52_spill] sm:$0xff] %v3832_v25  ;;  %1769 = vadd.xlane.f32.xlu0 %v1743_v58 }
 0x16e   :  { %v1708_v0 = vpop.f32.mrf.mxu0 }
 0x16f   :  { %v1744_v3 = vmul.f32 %v3662_v12, %v1708_v0 }
 0x170   :  { %v535_v49 = vpop.xlane.xlu0 %534  ;;  %v3835_v4 = vpop.f32.mrf.mxu0 }
 0x171   :  { %4985 = vst [vmem:[#allocation53_spill] sm:$0xff] %v3835_v4  ;;  %v566_v56 = vmul.f32 0.25, %v535_v49  ;;  %1771 = vadd.xlane.f32.xlu1 %v1744_v3 }
 0x172   :  { %v1714_v17 = vpop.f32.mrf.mxu0 }
 0x173   :  { %v3837_v47 = vmax.f32 %v566_v56, -1e+30  ;;  %v1745_v53 = vmul.f32 %v1714_v17, %v3672_v19 }
 0x174   :  { %v537_v27 = vpop.xlane.xlu0 %536  ;;  %v3840_v51 = vpop.f32.mrf.mxu0 }
 0x175   :  { %4986 = vst [vmem:[#allocation54_spill] sm:$0xff] %v3840_v51  ;;  %v598_v33 = vsub.f32 -1e+30, %v3837_v47  ;;  %v646_v43 = vsub.f32 %v566_v56, %v3837_v47  ;;  %v567_v58 = vmul.f32 0.25, %v537_v27  ;;  %1773 = vadd.xlane.f32.xlu0 %v1745_v53 }
 0x176   :  { %v1718_v12 = vpop.f32.mrf.mxu0 }
 0x177   :  { %v614_v0 = vmul.f32 1.442695, %v598_v33  ;;  %v3844_v25 = vmax.f32 %v567_v58, -1e+30  ;;  %v539_v49 = vpop.xlane.xlu1 %538  ;;  %v1746_v3 = vmul.f32 %v1718_v12, %v3679_v35  ;;  %v662_v4 = vmul.f32 1.442695, %v646_v43 }
 0x178   :  { %v568_v55 = vmul.f32 0.25, %v539_v49  ;;  %v3847_v30 = vpop.f32.mrf.mxu0 }
 0x179   :  { %4987 = vst [vmem:[#allocation55_spill] sm:$0xff] %v3847_v30  ;;  %v599_v19 = vsub.f32 -1e+30, %v3844_v25  ;;  %v647_v17 = vsub.f32 %v567_v58, %v3844_v25  ;;  %1775 = vadd.xlane.f32.xlu1 %v1746_v3  ;;  %2767 = vpow2.f32 %v614_v0 }
 0x17a   :  { %v3851_v51 = vmax.f32 %v568_v55, -1e+30  ;;  %v1724_v56 = vpop.f32.mrf.mxu0  ;;  %2769 = vpow2.f32 %v662_v4 }
 0x17b   :  { %v616_v53 = vmul.f32 1.442695, %v599_v19  ;;  %v664_v27 = vmul.f32 1.442695, %v647_v17  ;;  %v541_v33 = vpop.xlane.xlu1 %540  ;;  %v1747_v29 = vmul.f32 %v3669_v38, %v1724_v56 }
 0x17c   :  { %v600_v35 = vsub.f32 -1e+30, %v3851_v51  ;;  %v648_v43 = vsub.f32 %v568_v55, %v3851_v51  ;;  %v569_v12 = vmul.f32 0.25, %v541_v33  ;;  %v3856_v49 = vpop.f32.mrf.mxu0 }
 0x17d   :  { %4988 = vst [vmem:[#allocation56_spill] sm:$0xff] %v3856_v49  ;;  %2771 = vpow2.f32 %v616_v53  ;;  %1777 = vadd.xlane.f32.xlu0 %v1747_v29 }
 0x17e   :  { %2773 = vpow2.f32 %v664_v27  ;;  %v618_v58 = vmul.f32 1.442695, %v600_v35  ;;  %v666_v3 = vmul.f32 1.442695, %v648_v43  ;;  %v3858_v30 = vmax.f32 %v569_v12, -1e+30  ;;  %v1728_v0 = vpop.f32.mrf.mxu0 }
 0x17f   :  { %v543_v19 = vpop.xlane.xlu0 %542  ;;  %v1748_v17 = vmul.f32 %v3676_v21, %v1728_v0 }
 0x180   :  { %2775 = vpow2.f32 %v618_v58  ;;  %v601_v38 = vsub.f32 -1e+30, %v3858_v30  ;;  %v649_v4 = vsub.f32 %v569_v12, %v3858_v30  ;;  %v570_v55 = vmul.f32 0.25, %v543_v19 }
 0x181   :  { %2777 = vpow2.f32 %v666_v3  ;;  %1779 = vadd.xlane.f32.xlu1 %v1748_v17  ;;  %v2759_v3 = vld [vmem:[%s4875_s4 + $0x38] sm:$0xff]  }
 0x182   :  { %v620_v56 = vmul.f32 1.442695, %v601_v38  ;;  %v668_v53 = vmul.f32 1.442695, %v649_v4  ;;  %v3863_v29 = vmax.f32 %v570_v55, -1e+30  ;;  %2694 = vmatprep.subr.bf16.mxu1 %v2759_v3 }
 0x183   :  { %v545_v27 = vpop.xlane.xlu1 %544  ;;  %2695 = vmatpush3.bf16.msra.mxu1 %v2759_v3 }
 0x184   :  { %2779 = vpow2.f32 %v620_v56  ;;  %v602_v33 = vsub.f32 -1e+30, %v3863_v29  ;;  %v650_v35 = vsub.f32 %v570_v55, %v3863_v29  ;;  %v571_v43 = vmul.f32 0.25, %v545_v27 }
 0x185   :  { %2781 = vpow2.f32 %v668_v53 }
 0x186   :  { %v622_v21 = vmul.f32 1.442695, %v602_v33  ;;  %v670_v58 = vmul.f32 1.442695, %v650_v35  ;;  %v3867_v0 = vmax.f32 %v571_v43, -1e+30  ;;  %v2768_v19 = vpop.eup %2767 }
 0x187   :  { %v547_v12 = vpop.xlane.xlu0 %546  ;;  %v2770_v4 = vpop.eup %2769  ;;  %v694_v48 = vmul.f32 0.0, %v2768_v19 }
 0x188   :  { %2783 = vpow2.f32 %v622_v21  ;;  %v603_v17 = vsub.f32 -1e+30, %v3867_v0  ;;  %v651_v38 = vsub.f32 %v571_v43, %v3867_v0  ;;  %v572_v55 = vmul.f32 0.25, %v547_v12  ;;  %v2760_v12 = vld [vmem:[%s4875_s4 + $0x30] sm:$0xff]  }
 0x189   :  { %2785 = vpow2.f32 %v670_v58  ;;  %v726_v34 = vmul.f32 %v2770_v4, %v3631_v10  ;;  %2696 = vmatprep.subr.bf16.mxu1 %v2760_v12 }
 0x18a   :  { %v2772_v56 = vpop.eup %2771  ;;  %v624_v53 = vmul.f32 1.442695, %v603_v17  ;;  %v672_v27 = vmul.f32 1.442695, %v651_v38  ;;  %v3874_v35 = vmax.f32 %v572_v55, -1e+30  ;;  %2697 = vmatpush3.bf16.msra.mxu1 %v2760_v12 }
 0x18b   :  { %v2774_v33 = vpop.eup %2773  ;;  %v549_v49 = vpop.xlane.xlu1 %548  ;;  %v695_v41 = vmul.f32 0.0, %v2772_v56  ;;  %v3885_v56 = vadd.f32 %v2770_v4, %v694_v48 }
 0x18c   :  { %2787 = vpow2.f32 %v624_v53  ;;  %v573_v21 = vmul.f32 0.25, %v549_v49  ;;  %v604_v43 = vsub.f32 -1e+30, %v3874_v35  ;;  %v652_v58 = vsub.f32 %v572_v55, %v3874_v35 }
 0x18d   :  { %v2776_v63 = vpop.eup %2775  ;;  %2789 = vpow2.f32 %v672_v27  ;;  %v727_v17 = vmul.f32 %v2774_v33, %v3638_v23  ;;  %v3887_v27 = vadd.f32 %v726_v34, %v694_v48  ;;  %v3891_v2 = vadd.f32 %v2774_v33, %v695_v41 }
 0x18e   :  { %v2778_v3 = vpop.eup %2777  ;;  %v3883_v38 = vmax.f32 %v573_v21, -1e+30  ;;  %v950_v19 = vpop.xlane.xlu0 %949  ;;  %v696_v10 = vmul.f32 0.0, %v2776_v63  ;;  %v626_v53 = vmul.f32 1.442695, %v604_v43 }
 0x18f   :  { %v674_v49 = vmul.f32 1.442695, %v652_v58  ;;  %v981_v42 = vmul.f32 0.25, %v950_v19  ;;  %4989 = vst [vmem:[#allocation57_spill] sm:$0xff] %v3887_v27  ;;  %v728_v23 = vmul.f32 %v2778_v3, %v3646_v50  ;;  %v3897_v27 = vadd.f32 %v727_v17, %v695_v41 }
 0x190   :  { %v605_v55 = vsub.f32 -1e+30, %v3883_v38  ;;  %v653_v15 = vsub.f32 %v573_v21, %v3883_v38  ;;  %2791 = vpow2.f32 %v626_v53  ;;  %v3902_v50 = vadd.f32 %v2778_v3, %v696_v10 }
 0x191   :  { %v2780_v28 = vpop.eup %2779  ;;  %v3895_v63 = vmax.f32 %v3837_v47, %v981_v42  ;;  %2793 = vpow2.f32 %v674_v49  ;;  %4990 = vst [vmem:[#allocation58_spill] sm:$0xff] %v3897_v27  ;;  %v3905_v49 = vadd.f32 %v728_v23, %v696_v10  ;;  %v2761_v23 = vld [vmem:[%s4875_s4 + $0x28] sm:$0xff]  }
 0x192   :  { %v2782_v43 = vpop.eup %2781  ;;  %v697_v58 = vmul.f32 0.0, %v2780_v28  ;;  %v628_v4 = vmul.f32 1.442695, %v605_v55  ;;  %v676_v34 = vmul.f32 1.442695, %v653_v15  ;;  %v551_v48 = vpop.xlane.xlu0 %550  ;;  %2698 = vmatprep.subr.bf16.mxu1 %v2761_v23 }
 0x193   :  { %v952_v19 = vpop.xlane.xlu1 %951  ;;  %v1013_v21 = vsub.f32 %v3837_v47, %v3895_v63  ;;  %v1061_v33 = vsub.f32 %v981_v42, %v3895_v63  ;;  %v574_v12 = vmul.f32 0.25, %v551_v48  ;;  %v729_v53 = vmul.f32 %v2782_v43, %v3653_v36  ;;  %2699 = vmatpush3.bf16.msra.mxu1 %v2761_v23 }
 0x194   :  { %2795 = vpow2.f32 %v628_v4  ;;  %v982_v60 = vmul.f32 0.25, %v952_v19  ;;  %v3907_v17 = vadd.f32 %v2782_v43, %v697_v58 }
 0x195   :  { %v2784_v28 = vpop.eup %2783  ;;  %2797 = vpow2.f32 %v676_v34  ;;  %v1029_v15 = vmul.f32 1.442695, %v1013_v21  ;;  %v1077_v55 = vmul.f32 1.442695, %v1061_v33  ;;  %v3909_v47 = vmax.f32 %v574_v12, -1e+30 }
 0x196   :  { %v2786_v41 = vpop.eup %2785  ;;  %v698_v27 = vmul.f32 0.0, %v2784_v28  ;;  %v3912_v42 = vmax.f32 %v3844_v25, %v982_v60  ;;  %v954_v48 = vpop.xlane.xlu0 %953  ;;  %v3918_v34 = vadd.f32 %v729_v53, %v697_v58 }
 0x197   :  { %v553_v3 = vpop.xlane.xlu1 %552  ;;  %v730_v36 = vmul.f32 %v2786_v41, %v3660_v1  ;;  %2799 = vpow2.f32 %v1029_v15  ;;  %v983_v10 = vmul.f32 0.25, %v954_v48  ;;  %v606_v43 = vsub.f32 -1e+30, %v3909_v47 }
 0x198   :  { %v575_v4 = vmul.f32 0.25, %v553_v3  ;;  %2801 = vpow2.f32 %v1077_v55  ;;  %v654_v19 = vsub.f32 %v574_v12, %v3909_v47  ;;  %v3922_v33 = vadd.f32 %v2786_v41, %v698_v27 }
 0x199   :  { %v2788_v21 = vpop.eup %2787  ;;  %v1014_v1 = vsub.f32 %v3844_v25, %v3912_v42  ;;  %v1062_v28 = vsub.f32 %v982_v60, %v3912_v42  ;;  %v630_v58 = vmul.f32 1.442695, %v606_v43  ;;  %v3930_v55 = vmax.f32 %v3851_v51, %v983_v10 }
 0x19a   :  { %v3927_v15 = vmax.f32 %v575_v4, -1e+30  ;;  %v2790_v3 = vpop.eup %2789  ;;  %v699_v48 = vmul.f32 0.0, %v2788_v21  ;;  %v678_v53 = vmul.f32 1.442695, %v654_v19  ;;  %v555_v61 = vpop.xlane.xlu0 %554  ;;  %v3932_v41 = vadd.f32 %v730_v36, %v698_v27  ;;  %v2762_v19 = vld [vmem:[%s4875_s4 + $0x20] sm:$0xff]  }
 0x19b   :  { %v956_v12 = vpop.xlane.xlu1 %955  ;;  %v1031_v9 = vmul.f32 1.442695, %v1014_v1  ;;  %v1079_v54 = vmul.f32 1.442695, %v1062_v28  ;;  %v731_v60 = vmul.f32 %v2790_v3, %v3667_v37  ;;  %2803 = vpow2.f32 %v630_v58  ;;  %2700 = vmatprep.subr.bf16.mxu1 %v2762_v19 }
 0x19c   :  { %4991 = vst [vmem:[#allocation59_spill] sm:$0xff] %v3932_v41  ;;  %v607_v25 = vsub.f32 -1e+30, %v3927_v15  ;;  %v655_v5 = vsub.f32 %v575_v4, %v3927_v15  ;;  %v1015_v43 = vsub.f32 %v3851_v51, %v3930_v55  ;;  %v3942_v21 = vadd.f32 %v2790_v3, %v699_v48  ;;  %2701 = vmatpush3.bf16.msra.mxu1 %v2762_v19  ;;  %v2763_v3 = vld [vmem:[%s4875_s4 + $0x18] sm:$0xff]  }
 0x19d   :  { %2805 = vpow2.f32 %v678_v53  ;;  %v1063_v36 = vsub.f32 %v983_v10, %v3930_v55  ;;  %v2792_v23 = vpop.eup %2791  ;;  %v576_v28 = vmul.f32 0.25, %v555_v61  ;;  %v984_v57 = vmul.f32 0.25, %v956_v12  ;;  %2702 = vmatprep.subr.bf16.mxu1 %v2763_v3 }
 0x19e   :  { %v632_v27 = vmul.f32 1.442695, %v607_v25  ;;  %2807 = vpow2.f32 %v1031_v9  ;;  %v680_v1 = vmul.f32 1.442695, %v655_v5  ;;  %v1033_v37 = vmul.f32 1.442695, %v1015_v43  ;;  %v958_v4 = vpop.xlane.xlu0 %957  ;;  %v2794_v41 = vpop.eup %2793 }
 0x19f   :  { %v557_v58 = vpop.xlane.xlu1 %556  ;;  %v700_v51 = vmul.f32 0.0, %v2792_v23  ;;  %2809 = vpow2.f32 %v1079_v54  ;;  %v1081_v6 = vmul.f32 1.442695, %v1063_v36  ;;  %v732_v10 = vmul.f32 %v2794_v41, %v3674_v26 }
 0x1a0   :  { %2811 = vpow2.f32 %v632_v27  ;;  %v3949_v9 = vmax.f32 %v576_v28, -1e+30  ;;  %v577_v5 = vmul.f32 0.25, %v557_v58  ;;  %v3951_v53 = vadd.f32 %v731_v60, %v699_v48  ;;  %2703 = vmatpush3.bf16.msra.mxu1 %v2763_v3  ;;  %v2764_v60 = vld [vmem:[%s4875_s4 + $0x10] sm:$0xff]  }
 0x1a1   :  { %v2796_v61 = vpop.eup %2795  ;;  %v3953_v25 = vadd.f32 %v2794_v41, %v700_v51  ;;  %2813 = vpow2.f32 %v680_v1  ;;  %v3956_v54 = vmax.f32 %v3858_v30, %v984_v57  ;;  %v985_v26 = vmul.f32 0.25, %v958_v4  ;;  %2704 = vmatprep.subr.bf16.mxu1 %v2764_v60 }
 0x1a2   :  { %4992 = vst [vmem:[#allocation60_spill] sm:$0xff] %v3951_v53  ;;  %v2798_v12 = vpop.eup %2797  ;;  %v701_v43 = vmul.f32 0.0, %v2796_v61  ;;  %2815 = vpow2.f32 %v1033_v37  ;;  %v608_v19 = vsub.f32 -1e+30, %v3949_v9  ;;  %v559_v27 = vpop.xlane.xlu0 %558  ;;  %v656_v48 = vsub.f32 %v576_v28, %v3949_v9 }
 0x1a3   :  { %v960_v36 = vpop.xlane.xlu1 %959  ;;  %v733_v23 = vmul.f32 %v2798_v12, %v3681_v40  ;;  %2817 = vpow2.f32 %v1081_v6  ;;  %v1016_v41 = vsub.f32 %v3858_v30, %v3956_v54  ;;  %v3968_v37 = vadd.f32 %v732_v10, %v700_v51 }
 0x1a4   :  { %v3966_v1 = vpop.eup %2799  ;;  %v634_v58 = vmul.f32 1.442695, %v608_v19  ;;  %v1064_v4 = vsub.f32 %v984_v57, %v3956_v54  ;;  %v3971_v61 = vmax.f32 %v577_v5, -1e+30  ;;  %v3973_v6 = vadd.f32 %v2798_v12, %v701_v43  ;;  %2705 = vmatpush3.bf16.msra.mxu1 %v2764_v60 }
 0x1a5   :  { %4993 = vst [vmem:[#allocation61_spill] sm:$0xff] %v3966_v1  ;;  %4994 = vst [vmem:[#allocation62_spill] sm:$0xff] %v3968_v37  ;;  %v2802_v40 = vpop.eup %2801  ;;  %v3975_v28 = vadd.f32 %v733_v23, %v701_v43  ;;  %v682_v30 = vmul.f32 1.442695, %v656_v48  ;;  %v1035_v3 = vmul.f32 1.442695, %v1016_v41  ;;  %v1109_v53 = vmul.f32 %v3966_v1, %v3885_v56 }
 0x1a6   :  { %2819 = vpow2.f32 %v634_v58  ;;  %v1083_v20 = vmul.f32 1.442695, %v1064_v4  ;;  %v609_v51 = vsub.f32 -1e+30, %v3971_v61  ;;  %v3980_v10 = vpop.xlane.xlu0 %961  ;;  %v3985_v19 = vmul.f32 %v2802_v40, %v3684_v8  ;;  %v2765_v56 = vld [vmem:[%s4875_s4 + $0x8] sm:$0xff]  }
 0x1a7   :  { %4995 = vst [vmem:[#allocation63_spill] sm:$0xff] %v3975_v28  ;;  %v3982_v57 = vpop.xlane.xlu1 %560  ;;  %2821 = vpow2.f32 %v682_v30  ;;  %v657_v12 = vsub.f32 %v577_v5, %v3971_v61  ;;  %v3989_v43 = vmax.f32 %v3863_v29, %v985_v26  ;;  %v578_v48 = vmul.f32 0.25, %v559_v27  ;;  %2706 = vmatprep.subr.bf16.mxu1 %v2765_v56 }
 0x1a8   :  { %4996 = vst [vmem:[#allocation64_spill] sm:$0xff] %v3985_v19  ;;  %2823 = vpow2.f32 %v1035_v3  ;;  %v636_v23 = vmul.f32 1.442695, %v609_v51  ;;  %v986_v41 = vmul.f32 0.25, %v960_v36  ;;  %v2804_v58 = vpop.eup %2803  ;;  %2707 = vmatpush3.bf16.msra.mxu1 %v2765_v56 }
 0x1a9   :  { %2825 = vpow2.f32 %v1083_v20  ;;  %v684_v4 = vmul.f32 1.442695, %v657_v12  ;;  %v1017_v8 = vsub.f32 %v3863_v29, %v3989_v43  ;;  %v1065_v5 = vsub.f32 %v985_v26, %v3989_v43 }
 0x1aa   :  { %v2806_v30 = vpop.eup %2805  ;;  %v702_v28 = vmul.f32 0.0, %v2804_v58  ;;  %2827 = vpow2.f32 %v636_v23  ;;  %v3997_v60 = vmax.f32 %v578_v48, -1e+30  ;;  %v4000_v37 = vmax.f32 %v3867_v0, %v986_v41  ;;  %v563_v3 = vpop.xlane.xlu0 %562 }
 0x1ab   :  { %v964_v27 = vpop.xlane.xlu1 %963  ;;  %v4002_v36 = vpop.eup %2807  ;;  %v734_v20 = vmul.f32 %v2806_v30, %v3686_v16  ;;  %2829 = vpow2.f32 %v684_v4  ;;  %v1037_v51 = vmul.f32 1.442695, %v1017_v8  ;;  %v1085_v29 = vmul.f32 1.442695, %v1065_v5 }
 0x1ac   :  { %4997 = vst [vmem:[#allocation65_spill] sm:$0xff] %v4002_v36  ;;  %v2810_v26 = vpop.eup %2809  ;;  %v4005_v12 = vadd.f32 %v2802_v40, %v1109_v53  ;;  %v1110_v23 = vmul.f32 %v4002_v36, %v3891_v2  ;;  %v610_v58 = vsub.f32 -1e+30, %v3997_v60  ;;  %v658_v19 = vsub.f32 %v578_v48, %v3997_v60 }
 0x1ad   :  { %v2812_v1 = vpop.eup %2811  ;;  %v4011_v13 = vadd.f32 %v2806_v30, %v702_v28  ;;  %v4013_v11 = vadd.f32 %v734_v20, %v702_v28  ;;  %2831 = vpow2.f32 %v1037_v51  ;;  %v1018_v16 = vsub.f32 %v3867_v0, %v4000_v37 }
 0x1ae   :  { %v2814_v56 = vpop.eup %2813  ;;  %v4018_v53 = vmul.f32 %v2810_v26, %v3690_v44  ;;  %v703_v40 = vmul.f32 0.0, %v2812_v1  ;;  %2833 = vpow2.f32 %v1085_v29  ;;  %v638_v2 = vmul.f32 1.442695, %v610_v58 }
 0x1af   :  { %4998 = vst [vmem:[#allocation66_spill] sm:$0xff] %v4013_v11  ;;  %v565_v4 = vpop.xlane.xlu1 %564  ;;  %v2816_v8 = vpop.eup %2815  ;;  %v735_v48 = vmul.f32 %v2814_v56, %v3692_v52  ;;  %v686_v5 = vmul.f32 1.442695, %v658_v19  ;;  %v1039_v30 = vmul.f32 1.442695, %v1018_v16  ;;  %v1066_v28 = vsub.f32 %v986_v41, %v4000_v37 }
 0x1b0   :  { %4999 = vst [vmem:[#allocation67_spill] sm:$0xff] %v4018_v53  ;;  %v1381_v20 = vpop.xlane.xlu0 %1380  ;;  %v2818_v51 = vpop.eup %2817  ;;  %v4022_v11 = vadd.f32 %v2810_v26, %v1110_v23  ;;  %v1111_v0 = vmul.f32 %v2816_v8, %v3902_v50  ;;  %v1143_v44 = vmul.f32 %v2816_v8, %v3905_v49  ;;  %2835 = vpow2.f32 %v638_v2 }
 0x1b1   :  { %v4026_v1 = vadd.f32 %v2814_v56, %v703_v40  ;;  %v1159_v29 = vmul.f32 %v2818_v51, %v3696_v22  ;;  %2837 = vpow2.f32 %v686_v5  ;;  %v1087_v58 = vmul.f32 1.442695, %v1066_v28 }
 0x1b2   :  { %v4029_v52 = vadd.f32 %v735_v48, %v703_v40  ;;  %2839 = vpow2.f32 %v1039_v30  ;;  %v987_v19 = vmul.f32 0.25, %v3980_v10  ;;  %v579_v41 = vmul.f32 0.25, %v3982_v57 }
 0x1b3   :  { %5000 = vst [vmem:[#allocation68_spill] sm:$0xff] %v4026_v1  ;;  %v2820_v26 = vpop.eup %2819  ;;  %v4033_v23 = vadd.f32 %v2818_v51, %v1111_v0  ;;  %2841 = vpow2.f32 %v1087_v58  ;;  %v580_v50 = vmul.f32 0.25, %v563_v3  ;;  %v4035_v49 = vmul.f32 0.25, %v964_v27  ;;  %v4039_v56 = vpop.xlane.xlu1 %1382 }
 0x1b4   :  { %5001 = vst [vmem:[#allocation69_spill] sm:$0xff] %v4029_v52  ;;  %v4037_v16 = vpop.xlane.xlu0 %965  ;;  %v2822_v22 = vpop.eup %2821  ;;  %v4041_v2 = vadd.f32 %v1159_v29, %v1143_v44  ;;  %v704_v40 = vmul.f32 0.0, %v2820_v26  ;;  %v4044_v8 = vmax.f32 %v3874_v35, %v987_v19  ;;  %v4046_v10 = vmax.f32 %v579_v41, -1e+30 }
 0x1b5   :  { %v2824_v57 = vpop.eup %2823  ;;  %v736_v48 = vmul.f32 %v2822_v22, %v3698_v32  ;;  %v4049_v5 = vmax.f32 %v580_v50, -1e+30  ;;  %v4053_v3 = vmax.f32 %v3883_v38, %v4035_v49  ;;  %v4055_v27 = vmul.f32 0.25, %v1381_v20 }
 0x1b6   :  { %5002 = vst [vmem:[#allocation70_spill] sm:$0xff] %v4041_v2  ;;  %v2826_v30 = vpop.eup %2825  ;;  %v1112_v28 = vmul.f32 %v2824_v57, %v3907_v17  ;;  %v1144_v51 = vmul.f32 %v2824_v57, %v3918_v34  ;;  %v1019_v0 = vsub.f32 %v3874_v35, %v4044_v8  ;;  %v4061_v44 = vmul.f32 0.25, %v565_v4 }
 0x1b7   :  { %v2828_v29 = vpop.eup %2827  ;;  %v4063_v32 = vadd.f32 %v2822_v22, %v704_v40  ;;  %v1160_v58 = vmul.f32 %v2826_v30, %v3702_v24  ;;  %v1067_v26 = vsub.f32 %v987_v19, %v4044_v8  ;;  %v611_v20 = vsub.f32 -1e+30, %v4046_v10  ;;  %v968_v35 = vpop.xlane.xlu1 %967 }
 0x1b8   :  { %v2830_v52 = vpop.eup %2829  ;;  %v4068_v53 = vadd.f32 %v736_v48, %v704_v40  ;;  %v705_v17 = vmul.f32 0.0, %v2828_v29  ;;  %v1041_v36 = vmul.f32 1.442695, %v1019_v0  ;;  %v659_v34 = vsub.f32 %v579_v41, %v4046_v10  ;;  %v1385_v57 = vpop.xlane.xlu0 %1384 }
 0x1b9   :  { %5003 = vst [vmem:[#allocation71_spill] sm:$0xff] %v4063_v32  ;;  %v4071_v4 = vadd.f32 %v2826_v30, %v1112_v28  ;;  %v737_v22 = vmul.f32 %v2830_v52, %v3704_v59  ;;  %v1089_v32 = vmul.f32 1.442695, %v1067_v26  ;;  %v640_v1 = vmul.f32 1.442695, %v611_v20 }
 0x1ba   :  { %5004 = vst [vmem:[#allocation72_spill] sm:$0xff] %v4068_v53  ;;  %v4074_v24 = vpop.eup %2831  ;;  %v4076_v19 = vadd.f32 %v1160_v58, %v1144_v51  ;;  %2843 = vpow2.f32 %v1041_v36  ;;  %v688_v2 = vmul.f32 1.442695, %v659_v34  ;;  %v612_v40 = vsub.f32 -1e+30, %v4049_v5 }
 0x1bb   :  { %5005 = vst [vmem:[#allocation73_spill] sm:$0xff] %v4074_v24  ;;  %v2834_v48 = vpop.eup %2833  ;;  %v4079_v0 = vadd.f32 %v2830_v52, %v705_v17  ;;  %v4081_v41 = vadd.f32 %v737_v22, %v705_v17  ;;  %2845 = vpow2.f32 %v1089_v32  ;;  %v660_v30 = vsub.f32 %v580_v50, %v4049_v5  ;;  %v1387_v20 = vpop.xlane.xlu1 %1386 }
 0x1bc   :  { %v1113_v59 = vmul.f32 %v4074_v24, %v3922_v33  ;;  %2847 = vpow2.f32 %v640_v1  ;;  %v642_v28 = vmul.f32 1.442695, %v612_v40  ;;  %v1020_v51 = vsub.f32 %v3883_v38, %v4053_v3  ;;  %v970_v1 = vpop.xlane.xlu0 %969 }
 0x1bd   :  { %5006 = vst [vmem:[#allocation74_spill] sm:$0xff] %v4081_v41  ;;  %v2836_v36 = vpop.eup %2835  ;;  %v4089_v29 = vmul.f32 %v2834_v48, %v3708_v14  ;;  %2849 = vpow2.f32 %v688_v2  ;;  %v690_v52 = vmul.f32 1.442695, %v660_v30  ;;  %v1068_v58 = vsub.f32 %v4035_v49, %v4053_v3 }
 0x1be   :  { %v2838_v32 = vpop.eup %2837  ;;  %v706_v26 = vmul.f32 0.0, %v2836_v36  ;;  %2851 = vpow2.f32 %v642_v28  ;;  %v1043_v50 = vmul.f32 1.442695, %v1020_v51  ;;  %v4095_v33 = vmax.f32 %v3895_v63, %v4055_v27 }
 0x1bf   :  { %5007 = vst [vmem:[#allocation75_spill] sm:$0xff] %v4089_v29  ;;  %v4097_v38 = vpop.eup %2839  ;;  %v738_v14 = vmul.f32 %v2838_v32, %v3710_v31  ;;  %2853 = vpow2.f32 %v690_v52  ;;  %v1091_v2 = vmul.f32 1.442695, %v1068_v58  ;;  %v4101_v17 = vmax.f32 %v4061_v44, -1e+30 }
 0x1c0   :  { %5008 = vst [vmem:[#allocation76_spill] sm:$0xff] %v4097_v38  ;;  %v2842_v49 = vpop.eup %2841  ;;  %v4103_v34 = vadd.f32 %v2834_v48, %v1113_v59  ;;  %v4105_v22 = vadd.f32 %v2838_v32, %v706_v26  ;;  %2855 = vpow2.f32 %v1043_v50  ;;  %v1444_v40 = vsub.f32 %v3895_v63, %v4095_v33  ;;  %v2766_v63 = vld [vmem:[%s4875_s4] sm:$0xff]   ;;  %v1389_v50 = vpop.xlane.xlu0 %1388 }
 0x1c1   :  { %v4109_v30 = vadd.f32 %v738_v14, %v706_v26  ;;  %v1114_v28 = vmul.f32 %v4097_v38, %v3942_v21  ;;  %2857 = vpow2.f32 %v1091_v2  ;;  %v1492_v31 = vsub.f32 %v4055_v27, %v4095_v33  ;;  %v4126_v14 = vpop.xlane.xlu1 %971  ;;  %2708 = vmatprep.subr.bf16.mxu1 %v2766_v63 }
 0x1c2   :  { %v4116_v51 = vmul.f32 %v2842_v49, %v3714_v7  ;;  %v1460_v48 = vmul.f32 1.442695, %v1444_v40  ;;  %v613_v59 = vsub.f32 -1e+30, %v4101_v17  ;;  %v661_v36 = vsub.f32 %v4061_v44, %v4101_v17  ;;  %2709 = vmatpush3.bf16.msra.mxu1 %v2766_v63 }
 0x1c3   :  { %5009 = vst [vmem:[#allocation77_spill] sm:$0xff] %v4109_v30  ;;  %v1508_v52 = vmul.f32 1.442695, %v1492_v31  ;;  %v989_v21 = vmul.f32 0.25, %v4037_v16  ;;  %v1413_v58 = vmul.f32 0.25, %v4039_v56  ;;  %v1414_v32 = vmul.f32 0.25, %v1385_v57 }
 0x1c4   :  { %5010 = vst [vmem:[#allocation78_spill] sm:$0xff] %v4116_v51  ;;  %2859 = vpow2.f32 %v1460_v48  ;;  %v644_v27 = vmul.f32 1.442695, %v613_v59  ;;  %v692_v7 = vmul.f32 1.442695, %v661_v36  ;;  %v990_v26 = vmul.f32 0.25, %v968_v35 }
 0x1c5   :  { %2861 = vpow2.f32 %v1508_v52  ;;  %v4129_v44 = vmax.f32 %v3909_v47, %v989_v21  ;;  %v4132_v2 = vmax.f32 %v3912_v42, %v1413_v58  ;;  %v4135_v16 = vmax.f32 %v3930_v55, %v1414_v32  ;;  %v4166_v51 = vpop.xlane.xlu1 %1390 }
 0x1c6   :  { %2863 = vpow2.f32 %v644_v27  ;;  %v4138_v56 = vmax.f32 %v3927_v15, %v990_v26  ;;  %v4140_v57 = vmul.f32 0.25, %v970_v1  ;;  %v4142_v35 = vmul.f32 0.25, %v1387_v20 }
 0x1c7   :  { %v4144_v40 = vpop.eup %2843  ;;  %2865 = vpow2.f32 %v692_v7  ;;  %v1021_v31 = vsub.f32 %v3909_v47, %v4129_v44  ;;  %v1069_v48 = vsub.f32 %v989_v21, %v4129_v44  ;;  %v1445_v59 = vsub.f32 %v3912_v42, %v4132_v2 }
 0x1c8   :  { %5011 = vst [vmem:[#allocation79_spill] sm:$0xff] %v4144_v40  ;;  %v2846_v36 = vpop.eup %2845  ;;  %v1115_v63 = vmul.f32 %v4144_v40, %v3953_v25  ;;  %v1493_v1 = vsub.f32 %v1413_v58, %v4132_v2  ;;  %v1446_v20 = vsub.f32 %v3930_v55, %v4135_v16  ;;  %v1494_v52 = vsub.f32 %v1414_v32, %v4135_v16  ;;  %v4164_v58 = vpop.xlane.xlu0 %973 }
 0x1c9   :  { %v2848_v27 = vpop.eup %2847  ;;  %v4157_v7 = vadd.f32 %v2842_v49, %v1114_v28  ;;  %v1045_v47 = vmul.f32 1.442695, %v1021_v31  ;;  %v1093_v30 = vmul.f32 1.442695, %v1069_v48  ;;  %v1462_v21 = vmul.f32 1.442695, %v1445_v59 }
 0x1ca   :  { %v2850_v41 = vpop.eup %2849  ;;  %v4159_v53 = vadd.f32 %v2846_v36, %v1115_v63  ;;  %v4162_v42 = vmul.f32 %v2846_v36, %v3720_v45  ;;  %v707_v25 = vmul.f32 0.0, %v2848_v27  ;;  %v1510_v40 = vmul.f32 1.442695, %v1493_v1 }
 0x1cb   :  { %v2852_v55 = vpop.eup %2851  ;;  %v739_v32 = vmul.f32 %v2850_v41, %v3716_v46  ;;  %2867 = vpow2.f32 %v1045_v47  ;;  %v1464_v49 = vmul.f32 1.442695, %v1446_v20  ;;  %v1022_v28 = vsub.f32 %v3927_v15, %v4138_v56 }
 0x1cc   :  { %5012 = vst [vmem:[#allocation80_spill] sm:$0xff] %v4162_v42  ;;  %v2854_v31 = vpop.eup %2853  ;;  %v708_v48 = vmul.f32 0.0, %v2852_v55  ;;  %2869 = vpow2.f32 %v1093_v30  ;;  %v1512_v59 = vmul.f32 1.442695, %v1494_v52  ;;  %v1070_v45 = vsub.f32 %v990_v26, %v4138_v56  ;;  %v1393_v52 = vpop.xlane.xlu0 %1392 }
 0x1cd   :  { %v4172_v36 = vpop.eup %2855  ;;  %v4174_v63 = vadd.f32 %v2850_v41, %v707_v25  ;;  %v740_v1 = vmul.f32 %v2854_v31, %v3722_v39  ;;  %2871 = vpow2.f32 %v1462_v21  ;;  %v1047_v27 = vmul.f32 1.442695, %v1022_v28  ;;  %v976_v21 = vpop.xlane.xlu1 %975 }
 0x1ce   :  { %5013 = vst [vmem:[#allocation81_spill] sm:$0xff] %v4172_v36  ;;  %v2858_v46 = vpop.eup %2857  ;;  %v4177_v47 = vadd.f32 %v739_v32, %v707_v25  ;;  %v4179_v20 = vadd.f32 %v2854_v31, %v708_v48  ;;  %2873 = vpow2.f32 %v1510_v40  ;;  %v1095_v15 = vmul.f32 1.442695, %v1070_v45 }
 0x1cf   :  { %v4181_v55 = vadd.f32 %v740_v1, %v708_v48  ;;  %v1116_v30 = vmul.f32 %v4172_v36, %v3973_v6  ;;  %2875 = vpow2.f32 %v1464_v49  ;;  %v4187_v41 = vmax.f32 %v3949_v9, %v4140_v57 }
 0x1d0   :  { %5014 = vst [vmem:[#allocation82_spill] sm:$0xff] %v4177_v47  ;;  %v4190_v39 = vmul.f32 %v2858_v46, %v3726_v18  ;;  %2877 = vpow2.f32 %v1512_v59  ;;  %v4194_v26 = vmax.f32 %v3956_v54, %v4142_v35  ;;  %v1416_v40 = vmul.f32 0.25, %v1389_v50 }
 0x1d1   :  { %5015 = vst [vmem:[#allocation83_spill] sm:$0xff] %v4181_v55  ;;  %v4196_v25 = vpop.eup %2859  ;;  %2879 = vpow2.f32 %v1047_v27  ;;  %v1023_v6 = vsub.f32 %v3949_v9, %v4187_v41  ;;  %v1071_v32 = vsub.f32 %v4140_v57, %v4187_v41  ;;  %v992_v18 = vmul.f32 0.25, %v4126_v14 }
 0x1d2   :  { %5016 = vst [vmem:[#allocation84_spill] sm:$0xff] %v4190_v39  ;;  %v4203_v49 = vpop.eup %2861  ;;  %v1540_v28 = vmul.f32 %v4196_v25, %v4005_v12  ;;  %2881 = vpow2.f32 %v1095_v15  ;;  %v1447_v50 = vsub.f32 %v3956_v54, %v4194_v26  ;;  %v1495_v31 = vsub.f32 %v4142_v35, %v4194_v26 }
 0x1d3   :  { %v2864_v48 = vpop.eup %2863  ;;  %v1049_v59 = vmul.f32 1.442695, %v1023_v6  ;;  %v1097_v9 = vmul.f32 1.442695, %v1071_v32  ;;  %v4212_v45 = vmax.f32 %v3989_v43, %v1416_v40  ;;  %v4215_v14 = vmax.f32 %v3971_v61, %v992_v18 }
 0x1d4   :  { %v2866_v57 = vpop.eup %2865  ;;  %v4217_v1 = vadd.f32 %v2858_v46, %v1116_v30  ;;  %v709_v12 = vmul.f32 0.0, %v2864_v48  ;;  %v1466_v27 = vmul.f32 1.442695, %v1447_v50  ;;  %v1514_v15 = vmul.f32 1.442695, %v1495_v31  ;;  %v978_v30 = vpop.xlane.xlu0 %977 }
 0x1d5   :  { %v4220_v54 = vadd.f32 %v4203_v49, %v1540_v28  ;;  %2883 = vpow2.f32 %v1049_v59  ;;  %v1448_v35 = vsub.f32 %v3989_v43, %v4212_v45  ;;  %v1496_v6 = vsub.f32 %v1416_v40, %v4212_v45  ;;  %v1395_v50 = vpop.xlane.xlu1 %1394 }
 0x1d6   :  { %v741_v32 = vmul.f32 %v2866_v57, %v3728_v62  ;;  %2885 = vpow2.f32 %v1097_v9  ;;  %v1024_v55 = vsub.f32 %v3971_v61, %v4215_v14  ;;  %v1072_v46 = vsub.f32 %v992_v18, %v4215_v14 }
 0x1d7   :  { %v4229_v31 = vadd.f32 %v2866_v57, %v709_v12  ;;  %2887 = vpow2.f32 %v1466_v27  ;;  %v1468_v28 = vmul.f32 1.442695, %v1448_v35  ;;  %v1516_v48 = vmul.f32 1.442695, %v1496_v6  ;;  %v5019_v35 = vld [vmem:[#allocation19_spill] sm:$0xff] }
 0x1d8   :  { %v4231_v59 = vpop.eup %2867  ;;  %2889 = vpow2.f32 %v1514_v15  ;;  %v1051_v43 = vmul.f32 1.442695, %v1024_v55  ;;  %v1099_v40 = vmul.f32 1.442695, %v1072_v46  ;;  %v993_v62 = vmul.f32 0.25, %v4164_v58 }
 0x1d9   :  { %5017 = vst [vmem:[#allocation85_spill] sm:$0xff] %v4231_v59  ;;  %v2870_v9 = vpop.eup %2869  ;;  %v1117_v61 = vmul.f32 %v4231_v59, %v4011_v13  ;;  %2891 = vpow2.f32 %v1468_v28  ;;  %v1417_v18 = vmul.f32 0.25, %v4166_v51  ;;  %v1418_v47 = vmul.f32 0.25, %v1393_v52  ;;  %v1750_v28 = vpop.xlane.xlu0 %1749 }
 0x1da   :  { %v4237_v57 = vpop.eup %2871  ;;  %v4239_v27 = vadd.f32 %v741_v32, %v709_v12  ;;  %v4242_v6 = vmul.f32 %v2870_v9, %v5019_v35  ;;  %2893 = vpow2.f32 %v1516_v48  ;;  %v4245_v55 = vmax.f32 %v3997_v60, %v993_v62  ;;  %v4260_v48 = vpop.xlane.xlu1 %979 }
 0x1db   :  { %v4247_v58 = vpop.eup %2873  ;;  %v1541_v13 = vmul.f32 %v4237_v57, %v4022_v11  ;;  %2895 = vpow2.f32 %v1051_v43  ;;  %v4252_v51 = vmax.f32 %v4000_v37, %v1417_v18  ;;  %v994_v52 = vmul.f32 0.25, %v976_v21 }
 0x1dc   :  { %5018 = vst [vmem:[#allocation86_spill] sm:$0xff] %v4239_v27  ;;  %5020 = vst [vmem:[#allocation19_spill] sm:$0xff] %v4242_v6  ;;  %v2876_v15 = vpop.eup %2875  ;;  %2897 = vpow2.f32 %v1099_v40  ;;  %v1025_v12 = vsub.f32 %v3997_v60, %v4245_v55  ;;  %v1073_v32 = vsub.f32 %v993_v62, %v4245_v55  ;;  %v4258_v46 = vmax.f32 %v4044_v8, %v1418_v47  ;;  %v5021_v27 = vld [vmem:[#allocation70_spill] sm:$0xff]  ;;  %v5023_v60 = vld [vmem:[#allocation24_spill] sm:$0xff] }
 0x1dd   :  { %v2878_v35 = vpop.eup %2877  ;;  %v4262_v11 = vadd.f32 %v2870_v9, %v1117_v61  ;;  %v1542_v43 = vmul.f32 %v2876_v15, %v4033_v23  ;;  %v1574_v21 = vmul.f32 %v2876_v15, %v5021_v27  ;;  %v1449_v40 = vsub.f32 %v4000_v37, %v4252_v51  ;;  %v5024_v37 = vld [vmem:[#allocation68_spill] sm:$0xff] }
 0x1de   :  { %v4268_v6 = vpop.eup %2879  ;;  %v1590_v62 = vmul.f32 %v2878_v35, %v5023_v60  ;;  %v1053_v59 = vmul.f32 1.442695, %v1025_v12  ;;  %v1101_v39 = vmul.f32 1.442695, %v1073_v32  ;;  %v1497_v42 = vsub.f32 %v1417_v18, %v4252_v51  ;;  %v5025_v32 = vld [vmem:[#allocation21_spill] sm:$0xff] }
 0x1df   :  { %5022 = vst [vmem:[#allocation70_spill] sm:$0xff] %v4268_v6  ;;  %v2882_v36 = vpop.eup %2881  ;;  %v4273_v29 = vadd.f32 %v4247_v58, %v1541_v13  ;;  %v4275_v9 = vadd.f32 %v2878_v35, %v1542_v43  ;;  %v1470_v23 = vmul.f32 1.442695, %v1449_v40  ;;  %v1450_v61 = vsub.f32 %v4044_v8, %v4258_v46  ;;  %v1397_v40 = vpop.xlane.xlu0 %1396 }
 0x1e0   :  { %v4279_v27 = vadd.f32 %v1590_v62, %v1574_v21  ;;  %v1118_v15 = vmul.f32 %v4268_v6, %v5024_v37  ;;  %2899 = vpow2.f32 %v1053_v59  ;;  %v1518_v12 = vmul.f32 1.442695, %v1497_v42  ;;  %v1752_v62 = vpop.xlane.xlu1 %1751  ;;  %v5028_v59 = vld [vmem:[#allocation71_spill] sm:$0xff] }
 0x1e1   :  { %v4284_v60 = vmul.f32 %v2882_v36, %v5025_v32  ;;  %2901 = vpow2.f32 %v1101_v39  ;;  %v1472_v18 = vmul.f32 1.442695, %v1450_v61  ;;  %v1498_v13 = vsub.f32 %v1418_v47, %v4258_v46  ;;  %v5029_v6 = vld [vmem:[#allocation23_spill] sm:$0xff] }
 0x1e2   :  { %v4287_v35 = vpop.eup %2883  ;;  %2903 = vpow2.f32 %v1470_v23  ;;  %v4290_v43 = vmax.f32 %v4046_v10, %v994_v52  ;;  %v995_v8 = vmul.f32 0.25, %v978_v30  ;;  %v1419_v21 = vmul.f32 0.25, %v1395_v50 }
 0x1e3   :  { %5026 = vst [vmem:[#allocation24_spill] sm:$0xff] %v4284_v60  ;;  %5027 = vst [vmem:[#allocation68_spill] sm:$0xff] %v4287_v35  ;;  %v2886_v37 = vpop.eup %2885  ;;  %v1119_v42 = vmul.f32 %v4287_v35, %v5028_v59  ;;  %2905 = vpow2.f32 %v1518_v12  ;;  %v1520_v32 = vmul.f32 1.442695, %v1498_v13  ;;  %v1781_v39 = vmul.f32 0.25, %v1750_v28 }
 0x1e4   :  { %v2888_v61 = vpop.eup %2887  ;;  %v4294_v60 = vadd.f32 %v2882_v36, %v1118_v15  ;;  %2907 = vpow2.f32 %v1472_v18  ;;  %v1026_v47 = vsub.f32 %v4046_v10, %v4290_v43  ;;  %v1074_v23 = vsub.f32 %v994_v52, %v4290_v43  ;;  %v5032_v36 = vld [vmem:[#allocation26_spill] sm:$0xff] }
 0x1e5   :  { %v2890_v30 = vpop.eup %2889  ;;  %v4299_v50 = vadd.f32 %v2886_v37, %v1119_v42  ;;  %v4302_v38 = vmul.f32 %v2886_v37, %v5029_v6  ;;  %v1543_v59 = vmul.f32 %v2888_v61, %v4071_v4  ;;  %v1575_v12 = vmul.f32 %v2888_v61, %v4076_v19 }
 0x1e6   :  { %v4306_v28 = vpop.eup %2891  ;;  %v1591_v15 = vmul.f32 %v2890_v30, %v5032_v36  ;;  %v1055_v18 = vmul.f32 1.442695, %v1026_v47  ;;  %v1103_v13 = vmul.f32 1.442695, %v1074_v23  ;;  %v4310_v10 = vmax.f32 %v4049_v5, %v995_v8  ;;  %v1754_v23 = vpop.xlane.xlu0 %1753 }
 0x1e7   :  { %5030 = vst [vmem:[#allocation21_spill] sm:$0xff] %v4302_v38  ;;  %5031 = vst [vmem:[#allocation71_spill] sm:$0xff] %v4306_v28  ;;  %v4312_v52 = vpop.eup %2893  ;;  %v1544_v42 = vmul.f32 %v4306_v28, %v4103_v34  ;;  %2909 = vpow2.f32 %v1520_v32  ;;  %v4317_v6 = vmax.f32 %v4053_v3, %v1419_v21  ;;  %v1797_v4 = vmax.f32 %v4095_v33, %v1781_v39  ;;  %v1399_v36 = vpop.xlane.xlu1 %1398 }
 0x1e8   :  { %5033 = vst [vmem:[#allocation23_spill] sm:$0xff] %v4312_v52  ;;  %v4320_v19 = vpop.eup %2895  ;;  %v4322_v37 = vadd.f32 %v2890_v30, %v1543_v59  ;;  %2911 = vpow2.f32 %v1055_v18  ;;  %v1027_v61 = vsub.f32 %v4049_v5, %v4310_v10  ;;  %v1075_v47 = vsub.f32 %v995_v8, %v4310_v10  ;;  %v5035_v8 = vld [vmem:[#allocation25_spill] sm:$0xff] }
 0x1e9   :  { %5034 = vst [vmem:[#allocation26_spill] sm:$0xff] %v4320_v19  ;;  %v2898_v38 = vpop.eup %2897  ;;  %v4327_v34 = vadd.f32 %v1591_v15, %v1575_v12  ;;  %v4330_v32 = vadd.f32 %v4312_v52, %v1544_v42  ;;  %2913 = vpow2.f32 %v1103_v13  ;;  %v1451_v35 = vsub.f32 %v4053_v3, %v4317_v6 }
 0x1ea   :  { %v1120_v30 = vmul.f32 %v4320_v19, %v4079_v0  ;;  %v1057_v59 = vmul.f32 1.442695, %v1027_v61  ;;  %v1105_v18 = vmul.f32 1.442695, %v1075_v47  ;;  %v1499_v5 = vsub.f32 %v1419_v21, %v4317_v6 }
 0x1eb   :  { %v4338_v28 = vmul.f32 %v2898_v38, %v5035_v8  ;;  %v1474_v24 = vmul.f32 1.442695, %v1451_v35  ;;  %v1813_v12 = vsub.f32 %v4095_v33, %v1797_v4  ;;  %v1861_v15 = vsub.f32 %v1781_v39, %v1797_v4  ;;  %v1401_v39 = vpop.xlane.xlu0 %1400 }
 0x1ec   :  { %2915 = vpow2.f32 %v1057_v59  ;;  %v1522_v42 = vmul.f32 1.442695, %v1499_v5  ;;  %v996_v13 = vmul.f32 0.25, %v4260_v48  ;;  %v1420_v52 = vmul.f32 0.25, %v1397_v40  ;;  %v1756_v48 = vpop.xlane.xlu1 %1755  ;;  %v5038_v59 = vld [vmem:[#allocation27_spill] sm:$0xff] }
 0x1ed   :  { %5036 = vst [vmem:[#allocation25_spill] sm:$0xff] %v4338_v28  ;;  %v4342_v3 = vpop.eup %2899  ;;  %2917 = vpow2.f32 %v1105_v18  ;;  %v1829_v0 = vmul.f32 1.442695, %v1813_v12  ;;  %v1877_v61 = vmul.f32 1.442695, %v1861_v15  ;;  %v1782_v47 = vmul.f32 0.25, %v1752_v62 }
 0x1ee   :  { %5037 = vst [vmem:[#allocation87_spill] sm:$0xff] %v4342_v3  ;;  %v2902_v19 = vpop.eup %2901  ;;  %v1121_v21 = vmul.f32 %v4342_v3, %v4105_v22  ;;  %2919 = vpow2.f32 %v1474_v24  ;;  %v4347_v35 = vmax.f32 %v4101_v17, %v996_v13  ;;  %v4350_v33 = vmax.f32 %v4129_v44, %v1420_v52 }
 0x1ef   :  { %v4352_v40 = vpop.eup %2903  ;;  %v4354_v4 = vadd.f32 %v2898_v38, %v1120_v30  ;;  %v4357_v18 = vmul.f32 %v2902_v19, %v5038_v59  ;;  %2921 = vpow2.f32 %v1522_v42  ;;  %v1798_v62 = vmax.f32 %v4132_v2, %v1782_v47 }
 0x1f0   :  { %v4360_v22 = vpop.eup %2905  ;;  %v1545_v24 = vmul.f32 %v4352_v40, %v4157_v7  ;;  %2923 = vpow2.f32 %v1829_v0  ;;  %v1028_v5 = vsub.f32 %v4101_v17, %v4347_v35  ;;  %v1783_v8 = vmul.f32 0.25, %v1754_v23  ;;  %v1403_v28 = vpop.xlane.xlu1 %1402 }
 0x1f1   :  { %5039 = vst [vmem:[#allocation27_spill] sm:$0xff] %v4357_v18  ;;  %v4366_v12 = vpop.eup %2907  ;;  %v4368_v38 = vadd.f32 %v2902_v19, %v1121_v21  ;;  %v1076_v30 = vsub.f32 %v996_v13, %v4347_v35  ;;  %v1452_v15 = vsub.f32 %v4129_v44, %v4350_v33  ;;  %v1500_v42 = vsub.f32 %v1420_v52, %v4350_v33  ;;  %v1758_v21 = vpop.xlane.xlu0 %1757 }
 0x1f2   :  { %5040 = vst [vmem:[#allocation88_spill] sm:$0xff] %v4366_v12  ;;  %v1546_v59 = vmul.f32 %v4366_v12, %v4159_v53  ;;  %2925 = vpow2.f32 %v1877_v61  ;;  %v1059_v7 = vmul.f32 1.442695, %v1028_v5  ;;  %v1814_v0 = vsub.f32 %v4132_v2, %v1798_v62 }
 0x1f3   :  { %v1107_v17 = vmul.f32 1.442695, %v1076_v30  ;;  %v1476_v23 = vmul.f32 1.442695, %v1452_v15  ;;  %v1524_v18 = vmul.f32 1.442695, %v1500_v42  ;;  %v1862_v3 = vsub.f32 %v1782_v47, %v1798_v62 }
 0x1f4   :  { %v4377_v19 = vpop.eup %2909  ;;  %v4380_v13 = vadd.f32 %v4360_v22, %v1545_v24  ;;  %2927 = vpow2.f32 %v1059_v7  ;;  %v1831_v44 = vmul.f32 1.442695, %v1814_v0  ;;  %v1799_v52 = vmax.f32 %v4135_v16, %v1783_v8 }
 0x1f5   :  { %5041 = vst [vmem:[#allocation89_spill] sm:$0xff] %v4377_v19  ;;  %v4383_v53 = vpop.eup %2911  ;;  %2929 = vpow2.f32 %v1107_v17  ;;  %v1879_v61 = vmul.f32 1.442695, %v1862_v3  ;;  %v1421_v2 = vmul.f32 0.25, %v1399_v36  ;;  %v1422_v5 = vmul.f32 0.25, %v1401_v39  ;;  %v5043_v36 = vld [vmem:[#allocation29_spill] sm:$0xff] }
 0x1f6   :  { %5042 = vst [vmem:[#allocation90_spill] sm:$0xff] %v4383_v53  ;;  %v2914_v30 = vpop.eup %2913  ;;  %v4386_v47 = vadd.f32 %v4377_v19, %v1546_v59  ;;  %2931 = vpow2.f32 %v1476_v23  ;;  %v1815_v62 = vsub.f32 %v4135_v16, %v1799_v52  ;;  %v1863_v24 = vsub.f32 %v1783_v8, %v1799_v52  ;;  %v1405_v52 = vpop.xlane.xlu0 %1404 }
 0x1f7   :  { %v1122_v15 = vmul.f32 %v4383_v53, %v4174_v63  ;;  %2933 = vpow2.f32 %v1524_v18  ;;  %v4392_v42 = vmax.f32 %v4138_v56, %v1421_v2  ;;  %v4395_v7 = vmax.f32 %v4187_v41, %v1422_v5 }
 0x1f8   :  { %v4398_v3 = vmul.f32 %v2914_v30, %v5043_v36  ;;  %2935 = vpow2.f32 %v1831_v44  ;;  %v1833_v39 = vmul.f32 1.442695, %v1815_v62  ;;  %v1881_v59 = vmul.f32 1.442695, %v1863_v24  ;;  %v1760_v62 = vpop.xlane.xlu1 %1759 }
 0x1f9   :  { %v4400_v0 = vpop.eup %2915  ;;  %2937 = vpow2.f32 %v1879_v61  ;;  %v1453_v16 = vsub.f32 %v4138_v56, %v4392_v42  ;;  %v1501_v63 = vsub.f32 %v1421_v2, %v4392_v42  ;;  %v1454_v18 = vsub.f32 %v4187_v41, %v4395_v7 }
 0x1fa   :  { %5044 = vst [vmem:[#allocation29_spill] sm:$0xff] %v4398_v3  ;;  %5045 = vst [vmem:[#allocation91_spill] sm:$0xff] %v4400_v0  ;;  %v2918_v8 = vpop.eup %2917  ;;  %v1123_v17 = vmul.f32 %v4400_v0, %v4179_v20  ;;  %2939 = vpow2.f32 %v1833_v39  ;;  %v1502_v23 = vsub.f32 %v1422_v5, %v4395_v7  ;;  %v1784_v44 = vmul.f32 0.25, %v1756_v48  ;;  %v5048_v3 = vld [vmem:[#allocation31_spill] sm:$0xff] }
 0x1fb   :  { %v4410_v24 = vpop.eup %2919  ;;  %v4412_v61 = vadd.f32 %v2914_v30, %v1122_v15  ;;  %2941 = vpow2.f32 %v1881_v59  ;;  %v1478_v56 = vmul.f32 1.442695, %v1453_v16  ;;  %v1526_v2 = vmul.f32 1.442695, %v1501_v63 }
 0x1fc   :  { %5046 = vst [vmem:[#allocation92_spill] sm:$0xff] %v4410_v24  ;;  %v4414_v36 = vpop.eup %2921  ;;  %v4416_v41 = vadd.f32 %v2918_v8, %v1123_v17  ;;  %v4419_v53 = vmul.f32 %v2918_v8, %v5048_v3  ;;  %v1480_v20 = vmul.f32 1.442695, %v1454_v18  ;;  %v1528_v39 = vmul.f32 1.442695, %v1502_v23 }
 0x1fd   :  { %5047 = vst [vmem:[#allocation93_spill] sm:$0xff] %v4414_v36  ;;  %v4421_v5 = vpop.eup %2923  ;;  %2943 = vpow2.f32 %v1478_v56  ;;  %v1800_v48 = vmax.f32 %v4194_v26, %v1784_v44  ;;  %v1785_v0 = vmul.f32 0.25, %v1758_v21  ;;  %v1423_v30 = vmul.f32 0.25, %v1403_v28  ;;  %v1407_v21 = vpop.xlane.xlu1 %1406 }
 0x1fe   :  { %5049 = vst [vmem:[#allocation31_spill] sm:$0xff] %v4419_v53  ;;  %v1547_v15 = vmul.f32 %v4410_v24, %v4217_v1  ;;  %v1909_v59 = vmul.f32 %v4421_v5, %v4220_v54  ;;  %2945 = vpow2.f32 %v1526_v2  ;;  %v1424_v16 = vmul.f32 0.25, %v1405_v52  ;;  %v1762_v54 = vpop.xlane.xlu0 %1761 }
 0x1ff   :  { %v4428_v63 = vpop.eup %2925  ;;  %2947 = vpow2.f32 %v1480_v20  ;;  %v1816_v3 = vsub.f32 %v4194_v26, %v1800_v48  ;;  %v1864_v18 = vsub.f32 %v1784_v44, %v1800_v48  ;;  %v1801_v8 = vmax.f32 %v4212_v45, %v1785_v0 }
 0x200   :  { %v1925_v17 = vadd.f32 %v4428_v63, %v1909_v59  ;;  %2949 = vpow2.f32 %v1528_v39  ;;  %v4434_v28 = vmax.f32 %v4215_v14, %v1423_v30  ;;  %v4437_v1 = vmax.f32 %v4245_v55, %v1424_v16 }
 0x201   :  { %v4439_v23 = vpop.eup %2927  ;;  %v1835_v52 = vmul.f32 1.442695, %v1816_v3  ;;  %v1883_v56 = vmul.f32 1.442695, %v1864_v18  ;;  %v1817_v26 = vsub.f32 %v4212_v45, %v1801_v8  ;;  %v1865_v44 = vsub.f32 %v1785_v0, %v1801_v8  ;;  %v5053_v0 = vld [vmem:[#allocation33_spill] sm:$0xff] }
 0x202   :  { %5050 = vst [vmem:[#allocation94_spill] sm:$0xff] %v4439_v23  ;;  %v2930_v2 = vpop.eup %2929  ;;  %2951 = vrcp.f32 %v1925_v17  ;;  %v1124_v20 = vmul.f32 %v4439_v23, %v4229_v31  ;;  %v1455_v39 = vsub.f32 %v4215_v14, %v4434_v28  ;;  %v1503_v48 = vsub.f32 %v1423_v30, %v4434_v28 }
 0x203   :  { %v4447_v59 = vpop.eup %2931  ;;  %v4450_v53 = vadd.f32 %v4414_v36, %v1547_v15  ;;  %2953 = vpow2.f32 %v1835_v52  ;;  %v1837_v3 = vmul.f32 1.442695, %v1817_v26  ;;  %v1885_v18 = vmul.f32 1.442695, %v1865_v44 }
 0x204   :  { %5051 = vst [vmem:[#allocation95_spill] sm:$0xff] %v4447_v59  ;;  %v4452_v45 = vpop.eup %2933  ;;  %v4455_v8 = vmul.f32 %v2930_v2, %v5053_v0  ;;  %v1548_v31 = vmul.f32 %v4447_v59, %v4262_v11  ;;  %2955 = vpow2.f32 %v1883_v56  ;;  %v1482_v14 = vmul.f32 1.442695, %v1455_v39  ;;  %v1409_v56 = vpop.xlane.xlu0 %1408 }
 0x205   :  { %5052 = vst [vmem:[#allocation96_spill] sm:$0xff] %v4452_v45  ;;  %v4459_v17 = vpop.eup %2935  ;;  %2957 = vpow2.f32 %v1837_v3  ;;  %v1530_v30 = vmul.f32 1.442695, %v1503_v48  ;;  %v1456_v15 = vsub.f32 %v4245_v55, %v4437_v1  ;;  %v1504_v52 = vsub.f32 %v1424_v16, %v4437_v1  ;;  %v1764_v39 = vpop.xlane.xlu1 %1763 }
 0x206   :  { %5054 = vst [vmem:[#allocation33_spill] sm:$0xff] %v4455_v8  ;;  %v4464_v26 = vpop.eup %2937  ;;  %v4466_v44 = vadd.f32 %v2930_v2, %v1124_v20  ;;  %v1910_v0 = vmul.f32 %v4459_v17, %v4273_v29  ;;  %2959 = vpow2.f32 %v1885_v18  ;;  %v1786_v11 = vmul.f32 0.25, %v1760_v62 }
 0x207   :  { %v4470_v8 = vpop.eup %2939  ;;  %2961 = vpow2.f32 %v1482_v14  ;;  %v1484_v48 = vmul.f32 1.442695, %v1456_v15  ;;  %v1532_v3 = vmul.f32 1.442695, %v1504_v52  ;;  %v1787_v23 = vmul.f32 0.25, %v1762_v54  ;;  %v5056_v54 = vld [vmem:[#allocation39_spill] sm:$0xff] }
 0x208   :  { %v2942_v55 = vpop.eup %2941  ;;  %v1926_v16 = vadd.f32 %v4464_v26, %v1910_v0  ;;  %v1911_v2 = vmul.f32 %v4470_v8, %v4275_v9  ;;  %2963 = vpow2.f32 %v1530_v30  ;;  %v1802_v20 = vmax.f32 %v4252_v51, %v1786_v11 }
 0x209   :  { %v4477_v29 = vadd.f32 %v4452_v45, %v1548_v31  ;;  %2965 = vpow2.f32 %v1484_v48  ;;  %v1803_v62 = vmax.f32 %v4258_v46, %v1787_v23  ;;  %v1425_v18 = vmul.f32 0.25, %v1407_v21 }
 0x20a   :  { %v4480_v14 = vpop.eup %2943  ;;  %v1927_v15 = vadd.f32 %v2942_v55, %v1911_v2  ;;  %v4483_v52 = vmul.f32 %v2942_v55, %v5056_v54  ;;  %v1818_v0 = vsub.f32 %v4252_v51, %v1802_v20  ;;  %v1866_v59 = vsub.f32 %v1786_v11, %v1802_v20  ;;  %v1766_v54 = vpop.xlane.xlu0 %1765 }
 0x20b   :  { %5055 = vst [vmem:[#allocation97_spill] sm:$0xff] %v4480_v14  ;;  %v4486_v9 = vpop.eup %2945  ;;  %2967 = vrcp.f32 %v1926_v16  ;;  %v1549_v31 = vmul.f32 %v4480_v14, %v4294_v60  ;;  %v1819_v30 = vsub.f32 %v4258_v46, %v1803_v62  ;;  %v1867_v48 = vsub.f32 %v1787_v23, %v1803_v62  ;;  %v1411_v51 = vpop.xlane.xlu1 %1410 }
 0x20c   :  { %5057 = vst [vmem:[#allocation39_spill] sm:$0xff] %v4486_v9  ;;  %v4491_v45 = vpop.eup %2947  ;;  %2969 = vpow2.f32 %v1532_v3  ;;  %v1839_v21 = vmul.f32 1.442695, %v1818_v0  ;;  %v1887_v2 = vmul.f32 1.442695, %v1866_v59  ;;  %v4494_v55 = vmax.f32 %v4290_v43, %v1425_v18 }
 0x20d   :  { %5058 = vst [vmem:[#allocation98_spill] sm:$0xff] %v4491_v45  ;;  %v4496_v11 = vpop.eup %2949  ;;  %2971 = vrcp.f32 %v1927_v15  ;;  %v1550_v16 = vmul.f32 %v4491_v45, %v4299_v50  ;;  %v1841_v60 = vmul.f32 1.442695, %v1819_v30  ;;  %v1889_v20 = vmul.f32 1.442695, %v1867_v48 }
 0x20e   :  { %5059 = vst [vmem:[#allocation99_spill] sm:$0xff] %v4496_v11  ;;  %2973 = vpow2.f32 %v1839_v21  ;;  %v1457_v46 = vsub.f32 %v4290_v43, %v4494_v55  ;;  %v1505_v23 = vsub.f32 %v1425_v18, %v4494_v55  ;;  %v1426_v59 = vmul.f32 0.25, %v1409_v56  ;;  %v1770_v45 = vpop.xlane.xlu0 %1769 }
 0x20f   :  { %v4503_v3 = vpop.eup %2951  ;;  %v4506_v62 = vadd.f32 %v4486_v9, %v1549_v31  ;;  %2975 = vpow2.f32 %v1887_v2  ;;  %v1788_v0 = vmul.f32 0.25, %v1764_v39  ;;  %v1789_v15 = vmul.f32 0.25, %v1766_v54 }
 0x210   :  { %v4508_v14 = vpop.eup %2953  ;;  %2977 = vpow2.f32 %v1841_v60  ;;  %v1486_v50 = vmul.f32 1.442695, %v1457_v46  ;;  %v1534_v30 = vmul.f32 1.442695, %v1505_v23  ;;  %v4511_v48 = vmax.f32 %v4310_v10, %v1426_v59  ;;  %v1768_v60 = vpop.xlane.xlu1 %1767 }
 0x211   :  { %v2956_v43 = vpop.eup %2955  ;;  %v1912_v56 = vmul.f32 %v4508_v14, %v4322_v37  ;;  %2979 = vpow2.f32 %v1889_v20  ;;  %v1804_v18 = vmax.f32 %v4317_v6, %v1788_v0  ;;  %v1805_v31 = vmax.f32 %v4350_v33, %v1789_v15 }
 0x212   :  { %v4517_v21 = vpop.eup %2957  ;;  %v4520_v39 = vadd.f32 %v4496_v11, %v1550_v16  ;;  %2981 = vpow2.f32 %v1486_v50  ;;  %v1458_v2 = vsub.f32 %v4310_v10, %v4511_v48  ;;  %v1506_v54 = vsub.f32 %v1426_v59, %v4511_v48 }
 0x213   :  { %v4525_v46 = vpop.eup %2959  ;;  %v1928_v37 = vadd.f32 %v2956_v43, %v1912_v56  ;;  %v1913_v20 = vmul.f32 %v4517_v21, %v4330_v32  ;;  %2983 = vpow2.f32 %v1534_v30  ;;  %v1820_v23 = vsub.f32 %v4317_v6, %v1804_v18  ;;  %v5063_v6 = vld [vmem:[#allocation41_spill] sm:$0xff] }
 0x214   :  { %v4530_v9 = vpop.eup %2961  ;;  %v1488_v16 = vmul.f32 1.442695, %v1458_v2  ;;  %v1536_v50 = vmul.f32 1.442695, %v1506_v54  ;;  %v1868_v11 = vsub.f32 %v1788_v0, %v1804_v18  ;;  %v1821_v10 = vsub.f32 %v4350_v33, %v1805_v31  ;;  %v1772_v0 = vpop.xlane.xlu1 %1771 }
 0x215   :  { %5060 = vst [vmem:[#allocation100_spill] sm:$0xff] %v4530_v9  ;;  %v4533_v24 = vpop.eup %2963  ;;  %2985 = vrcp.f32 %v1928_v37  ;;  %v1929_v59 = vadd.f32 %v4525_v46, %v1913_v20  ;;  %v1551_v56 = vmul.f32 %v4530_v9, %v4354_v4  ;;  %v1843_v32 = vmul.f32 1.442695, %v1820_v23  ;;  %v1774_v20 = vpop.xlane.xlu0 %1773 }
 0x216   :  { %5061 = vst [vmem:[#allocation101_spill] sm:$0xff] %v4533_v24  ;;  %v4538_v30 = vpop.eup %2965  ;;  %v4541_v12 = vmul.f32 %v2956_v43, %v5063_v6  ;;  %2987 = vpow2.f32 %v1488_v16  ;;  %v1891_v2 = vmul.f32 1.442695, %v1868_v11  ;;  %v1869_v54 = vsub.f32 %v1789_v15, %v1805_v31 }
 0x217   :  { %5062 = vst [vmem:[#allocation102_spill] sm:$0xff] %v4538_v30  ;;  %2989 = vrcp.f32 %v1929_v59  ;;  %v4544_v33 = vadd.f32 %v4533_v24, %v1551_v56  ;;  %v1845_v18 = vmul.f32 1.442695, %v1821_v10  ;;  %v1427_v37 = vmul.f32 0.25, %v1411_v51 }
 0x218   :  { %v4546_v36 = vpop.eup %2967  ;;  %2991 = vpow2.f32 %v1536_v50  ;;  %v1893_v4 = vmul.f32 1.442695, %v1869_v54  ;;  %v1790_v23 = vmul.f32 0.25, %v1768_v60  ;;  %v1791_v9 = vmul.f32 0.25, %v1770_v45 }
 0x219   :  { %v4548_v19 = vpop.eup %2969  ;;  %v1552_v11 = vmul.f32 %v4538_v30, %v4368_v38  ;;  %2993 = vpow2.f32 %v1843_v32  ;;  %v4553_v15 = vmax.f32 %v4347_v35, %v1427_v37  ;;  %v1792_v43 = vmul.f32 0.25, %v1772_v0 }
 0x21a   :  { %5064 = vst [vmem:[#allocation41_spill] sm:$0xff] %v4548_v19  ;;  %v4555_v31 = vpop.eup %2971  ;;  %2995 = vpow2.f32 %v1891_v2  ;;  %v1806_v51 = vmax.f32 %v4392_v42, %v1790_v23  ;;  %v1807_v16 = vmax.f32 %v4395_v7, %v1791_v9  ;;  %v1793_v50 = vmul.f32 0.25, %v1774_v20 }
 0x21b   :  { %v4559_v60 = vpop.eup %2973  ;;  %2997 = vpow2.f32 %v1845_v18  ;;  %v1459_v45 = vsub.f32 %v4347_v35, %v4553_v15  ;;  %v1507_v38 = vsub.f32 %v1427_v37, %v4553_v15  ;;  %v1808_v10 = vmax.f32 %v4434_v28, %v1792_v43 }
 0x21c   :  { %v4565_v59 = vpop.eup %2975  ;;  %v1914_v56 = vmul.f32 %v4559_v60, %v4380_v13  ;;  %2999 = vpow2.f32 %v1893_v4  ;;  %v1822_v32 = vsub.f32 %v4392_v42, %v1806_v51  ;;  %v1870_v6 = vsub.f32 %v1790_v23, %v1806_v51 }
 0x21d   :  { %v4570_v2 = vpop.eup %2977  ;;  %v1490_v54 = vmul.f32 1.442695, %v1459_v45  ;;  %v1538_v0 = vmul.f32 1.442695, %v1507_v38  ;;  %v1823_v18 = vsub.f32 %v4395_v7, %v1807_v16  ;;  %v1871_v35 = vsub.f32 %v1791_v9, %v1807_v16 }
 0x21e   :  { %v4573_v20 = vpop.eup %2979  ;;  %v4576_v37 = vadd.f32 %v4548_v19, %v1552_v11  ;;  %v1930_v30 = vadd.f32 %v4565_v59, %v1914_v56  ;;  %v1915_v13 = vmul.f32 %v4570_v2, %v4386_v47  ;;  %v1847_v4 = vmul.f32 1.442695, %v1822_v32  ;;  %v5066_v56 = vld [vmem:[#allocation57_spill] sm:$0xff] }
 0x21f   :  { %v4581_v42 = vpop.eup %2981  ;;  %3001 = vpow2.f32 %v1490_v54  ;;  %v1895_v23 = vmul.f32 1.442695, %v1870_v6  ;;  %v1849_v51 = vmul.f32 1.442695, %v1823_v18  ;;  %v1824_v45 = vsub.f32 %v4434_v28, %v1808_v10  ;;  %v5067_v32 = vld [vmem:[#allocation61_spill] sm:$0xff]  ;;  %v5068_v18 = vld [vmem:[#allocation58_spill] sm:$0xff] }
 0x220   :  { %5065 = vst [vmem:[#allocation103_spill] sm:$0xff] %v4581_v42  ;;  %v4584_v7 = vpop.eup %2983  ;;  %3003 = vrcp.f32 %v1930_v30  ;;  %v1931_v9 = vadd.f32 %v4573_v20, %v1915_v13  ;;  %v1553_v11 = vmul.f32 %v4581_v42, %v4412_v61  ;;  %v1872_v16 = vsub.f32 %v1792_v43, %v1808_v10  ;;  %v5069_v13 = vld [vmem:[#allocation65_spill] sm:$0xff]  ;;  %v5070_v10 = vld [vmem:[#allocation64_spill] sm:$0xff] }
 0x221   :  { %3005 = vpow2.f32 %v1538_v0  ;;  %v1897_v38 = vmul.f32 1.442695, %v1871_v35  ;;  %v1809_v47 = vmax.f32 %v4437_v1, %v1793_v50  ;;  %v1141_v54 = vmul.f32 %v5067_v32, %v5066_v56 }
 0x222   :  { %v4592_v6 = vpop.eup %2985  ;;  %3007 = vrcp.f32 %v1931_v9  ;;  %v4595_v28 = vadd.f32 %v4584_v7, %v1553_v11  ;;  %v1851_v30 = vmul.f32 1.442695, %v1824_v45  ;;  %v1142_v19 = vmul.f32 %v5069_v13, %v5068_v18  ;;  %v5071_v9 = vld [vmem:[#allocation67_spill] sm:$0xff]  ;;  %v5072_v11 = vld [vmem:[#allocation20_spill] sm:$0xff] }
 0x223   :  { %v4599_v24 = vpop.eup %2987  ;;  %3009 = vpow2.f32 %v1847_v4  ;;  %v1825_v61 = vsub.f32 %v4437_v1, %v1809_v47  ;;  %v1873_v43 = vsub.f32 %v1793_v50, %v1809_v47  ;;  %v1173_v0 = vadd.f32 %v5070_v10, %v1141_v54  ;;  %v1776_v50 = vpop.xlane.xlu1 %1775 }
 0x224   :  { %v4603_v35 = vpop.eup %2989  ;;  %3011 = vpow2.f32 %v1895_v23  ;;  %v1899_v56 = vmul.f32 1.442695, %v1872_v16  ;;  %v1174_v32 = vadd.f32 %v5071_v9, %v1142_v19  ;;  %v1588_v45 = vmul.f32 %v4203_v49, %v5072_v11  ;;  %v5073_v19 = vld [vmem:[#allocation22_spill] sm:$0xff] }
 0x225   :  { %v4608_v42 = vpop.eup %2991  ;;  %v1554_v18 = vmul.f32 %v4599_v24, %v4416_v41  ;;  %3013 = vpow2.f32 %v1849_v51  ;;  %v1853_v4 = vmul.f32 1.442695, %v1825_v61  ;;  %v1572_v1 = vmul.f32 %v4196_v25, %v1173_v0  ;;  %v5074_v51 = vld [vmem:[#allocation35_spill] sm:$0xff]  ;;  %v1778_v61 = vpop.xlane.xlu0 %1777 }
 0x226   :  { %v4613_v47 = vpop.eup %2993  ;;  %3015 = vpow2.f32 %v1897_v38  ;;  %v1901_v23 = vmul.f32 1.442695, %v1873_v43  ;;  %v1573_v16 = vmul.f32 %v4237_v57, %v1174_v32  ;;  %v1589_v54 = vmul.f32 %v4247_v58, %v5073_v19  ;;  %v5075_v43 = vld [vmem:[#allocation37_spill] sm:$0xff] }
 0x227   :  { %v4618_v49 = vpop.eup %2995  ;;  %v1916_v13 = vmul.f32 %v4613_v47, %v4450_v53  ;;  %3017 = vpow2.f32 %v1851_v30  ;;  %v1604_v41 = vadd.f32 %v1588_v45, %v1572_v1  ;;  %v1957_v25 = vmul.f32 %v4428_v63, %v5074_v51 }
 0x228   :  { %v4624_v10 = vpop.eup %2997  ;;  %3019 = vpow2.f32 %v1899_v56  ;;  %v1605_v38 = vadd.f32 %v1589_v54, %v1573_v16  ;;  %v1958_v57 = vmul.f32 %v4464_v26, %v5075_v43  ;;  %v1794_v0 = vmul.f32 0.25, %v1776_v50 }
 0x229   :  { %v4628_v58 = vpop.eup %2999  ;;  %v1932_v9 = vadd.f32 %v4618_v49, %v1916_v13  ;;  %v1917_v53 = vmul.f32 %v4624_v10, %v4477_v29  ;;  %3021 = vpow2.f32 %v1853_v4  ;;  %v1941_v30 = vmul.f32 %v4421_v5, %v1604_v41 }
 0x22a   :  { %3023 = vpow2.f32 %v1901_v23  ;;  %v1942_v63 = vmul.f32 %v4459_v17, %v1605_v38  ;;  %v1810_v56 = vmax.f32 %v4494_v55, %v1794_v0  ;;  %v1795_v32 = vmul.f32 0.25, %v1778_v61 }
 0x22b   :  { %3025 = vrcp.f32 %v1932_v9  ;;  %v1933_v26 = vadd.f32 %v4628_v58, %v1917_v53  ;;  %v1973_v11 = vadd.f32 %v1957_v25, %v1941_v30  ;;  %v1943_v45 = vmul.f32 %v4470_v8, %v4279_v27  ;;  %v1780_v27 = vpop.xlane.xlu1 %1779  ;;  %v5076_v9 = vld [vmem:[#allocation59_spill] sm:$0xff]  ;;  %v5077_v53 = vld [vmem:[#allocation73_spill] sm:$0xff] }
 0x22c   :  { %v4639_v1 = vpop.eup %3001  ;;  %v1974_v50 = vadd.f32 %v1958_v57, %v1942_v63  ;;  %v1826_v29 = vsub.f32 %v4494_v55, %v1810_v56  ;;  %v1874_v4 = vsub.f32 %v1794_v0, %v1810_v56  ;;  %v1811_v5 = vmax.f32 %v4511_v48, %v1795_v32 }
 0x22d   :  { %v4643_v23 = vpop.eup %3003  ;;  %v4646_v17 = vadd.f32 %v4608_v42, %v1554_v18  ;;  %3027 = vrcp.f32 %v1933_v26  ;;  %v2005_v16 = vmul.f32 %v4503_v3, %v1973_v11  ;;  %v1944_v19 = vmul.f32 %v4508_v14, %v4327_v34 }
 0x22e   :  { %v4651_v8 = vpop.eup %3005  ;;  %v2006_v54 = vmul.f32 %v4546_v36, %v1974_v50  ;;  %v1855_v55 = vmul.f32 1.442695, %v1826_v29  ;;  %v1903_v13 = vmul.f32 1.442695, %v1874_v4  ;;  %v1827_v41 = vsub.f32 %v4511_v48, %v1811_v5  ;;  %v5080_v29 = vld [vmem:[#allocation75_spill] sm:$0xff] }
 0x22f   :  { %v4655_v51 = vpop.eup %3007  ;;  %v4659_v18 = vmul.f32 %v4639_v1, %v4466_v44  ;;  %v1875_v25 = vsub.f32 %v1795_v32, %v1811_v5  ;;  %v1975_v3 = vadd.f32 %v4483_v52, %v1943_v45  ;;  %v1976_v34 = vadd.f32 %v4541_v12, %v1944_v19  ;;  %v5079_v32 = vld [vmem:[#allocation76_spill] sm:$0xff]  ;;  %v5081_v19 = vld [vmem:[#allocation78_spill] sm:$0xff] }
 0x230   :  { %v4663_v14 = vpop.eup %3009  ;;  %v2021_v61 = vpack.c.bf16 %v2006_v54, %v2005_v16  ;;  %3029 = vpow2.f32 %v1855_v55  ;;  %v1857_v36 = vmul.f32 1.442695, %v1827_v41  ;;  %v1796_v38 = vmul.f32 0.25, %v1780_v27  ;;  %v5082_v41 = vld [vmem:[#allocation71_spill] sm:$0xff] }
 0x231   :  { %v4665_v43 = vpop.eup %3011  ;;  %v1918_v48 = vmul.f32 %v4663_v14, %v4506_v62  ;;  %3031 = vpow2.f32 %v1903_v13  ;;  %v1905_v57 = vmul.f32 1.442695, %v1875_v25  ;;  %v2007_v44 = vmul.f32 %v4555_v31, %v1975_v3  ;;  %v5078_v31 = vld [vmem:[#allocation60_spill] sm:$0xff]  ;;  %v5084_v3 = vld [vmem:[#allocation23_spill] sm:$0xff] }
 0x232   :  { %v4670_v0 = vpop.eup %3013  ;;  %2710 = vmatprep.mubr.bf16.mxu1 %v2021_v61  ;;  %3033 = vpow2.f32 %v1857_v36  ;;  %v2008_v12 = vmul.f32 %v4592_v6, %v1976_v34  ;;  %v1812_v52 = vmax.f32 %v4553_v15, %v1796_v38  ;;  %v1145_v30 = vmul.f32 %v5077_v53, %v5076_v9  ;;  %v5083_v25 = vld [vmem:[#allocation28_spill] sm:$0xff] }
 0x233   :  { %v4676_v63 = vpop.eup %3015  ;;  %v1934_v56 = vadd.f32 %v4665_v43, %v1918_v48  ;;  %v1919_v62 = vmul.f32 %v4670_v0, %v4520_v39  ;;  %3035 = vpow2.f32 %v1905_v57  ;;  %v1146_v26 = vmul.f32 %v5079_v32, %v5078_v31  ;;  %v5085_v57 = vld [vmem:[#allocation30_spill] sm:$0xff] }
 0x234   :  { %v4683_v11 = vpop.eup %3017  ;;  %v2022_v45 = vpack.c.bf16 %v2008_v12, %v2007_v44  ;;  %v1828_v6 = vsub.f32 %v4553_v15, %v1812_v52  ;;  %v1876_v50 = vsub.f32 %v1796_v38, %v1812_v52  ;;  %v1177_v4 = vadd.f32 %v5080_v29, %v1145_v30  ;;  %v5086_v52 = vld [vmem:[#allocation43_spill] sm:$0xff]  ;;  %v5087_v30 = vld [vmem:[#allocation45_spill] sm:$0xff]  ;;  %v5093_v29 = vld [vmem:[#allocation32_spill] sm:$0xff] }
 0x235   :  { %v4687_v5 = vpop.eup %3019  ;;  %3037 = vrcp.f32 %v1934_v56  ;;  %v1935_v16 = vadd.f32 %v4676_v63, %v1919_v62  ;;  %v1920_v39 = vmul.f32 %v4683_v11, %v4544_v33  ;;  %v1178_v27 = vadd.f32 %v5081_v19, %v1146_v26  ;;  %v5088_v62 = vld [vmem:[#allocation62_spill] sm:$0xff] }
 0x236   :  { %v4693_v54 = vpop.eup %3021  ;;  %2711 = vmatmul.mubr.bf16.vlgmr.msra.gmra.mxu1 %v2022_v45  ;;  %v1859_v55 = vmul.f32 1.442695, %v1828_v6  ;;  %v1907_v13 = vmul.f32 1.442695, %v1876_v50  ;;  %v1576_v15 = vmul.f32 %v5082_v41, %v1177_v4  ;;  %v1592_v34 = vmul.f32 %v5084_v3, %v5083_v25  ;;  %v5091_v45 = vld [vmem:[#allocation81_spill] sm:$0xff]  ;;  %v5097_v41 = vld [vmem:[#allocation84_spill] sm:$0xff] }
 0x237   :  { %v4698_v61 = vpop.eup %3023  ;;  %3039 = vrcp.f32 %v1935_v16  ;;  %v1936_v36 = vadd.f32 %v4687_v5, %v1920_v39  ;;  %v1921_v33 = vmul.f32 %v4693_v54, %v4576_v37  ;;  %v1577_v38 = vmul.f32 %v4352_v40, %v1178_v27  ;;  %v5089_v37 = vld [vmem:[#allocation79_spill] sm:$0xff]  ;;  %v5094_v4 = vld [vmem:[#allocation89_spill] sm:$0xff]  ;;  %v5095_v39 = vld [vmem:[#allocation34_spill] sm:$0xff] }
 0x238   :  { %v4704_v48 = vpop.eup %3025  ;;  %3041 = vpow2.f32 %v1859_v55  ;;  %v1593_v44 = vmul.f32 %v4360_v22, %v5085_v57  ;;  %v1608_v12 = vadd.f32 %v1592_v34, %v1576_v15  ;;  %v1961_v9 = vmul.f32 %v4525_v46, %v5086_v52  ;;  %v5090_v22 = vld [vmem:[#allocation63_spill] sm:$0xff]  ;;  %v5092_v46 = vld [vmem:[#allocation80_spill] sm:$0xff]  ;;  %v5102_v57 = vld [vmem:[#allocation85_spill] sm:$0xff] }
 0x239   :  { %3043 = vrcp.f32 %v1936_v36  ;;  %v1937_v53 = vadd.f32 %v4698_v61, %v1921_v33  ;;  %v1962_v56 = vmul.f32 %v4565_v59, %v5087_v30  ;;  %v1147_v31 = vmul.f32 %v5089_v37, %v5088_v62  ;;  %v5096_v59 = vld [vmem:[#allocation93_spill] sm:$0xff]  ;;  %v5098_v15 = vld [vmem:[#allocation47_spill] sm:$0xff]  ;;  %v5099_v3 = vld [vmem:[#allocation88_spill] sm:$0xff] }
 0x23a   :  { %v4715_v40 = vpop.eup %3027  ;;  %3045 = vpow2.f32 %v1907_v13  ;;  %v1609_v32 = vadd.f32 %v1593_v44, %v1577_v38  ;;  %v1945_v26 = vmul.f32 %v4517_v21, %v1608_v12  ;;  %v1148_v6 = vmul.f32 %v5091_v45, %v5090_v22  ;;  %v5100_v36 = vld [vmem:[#allocation49_spill] sm:$0xff]  ;;  %v5101_v38 = vld [vmem:[#allocation66_spill] sm:$0xff]  ;;  %v5105_v62 = vld [vmem:[#allocation92_spill] sm:$0xff] }
 0x23b   :  { %3047 = vrcp.f32 %v1937_v53  ;;  %v1179_v50 = vadd.f32 %v5092_v46, %v1147_v31  ;;  %v1594_v16 = vmul.f32 %v5094_v4, %v5093_v29  ;;  %v1595_v19 = vmul.f32 %v5096_v59, %v5095_v39  ;;  %v5103_v12 = vld [vmem:[#allocation69_spill] sm:$0xff]  ;;  %v5104_v52 = vld [vmem:[#allocation70_spill] sm:$0xff]  ;;  %v5107_v22 = vld [vmem:[#allocation24_spill] sm:$0xff] }
 0x23c   :  { %v1946_v27 = vmul.f32 %v4559_v60, %v1609_v32  ;;  %v1977_v55 = vadd.f32 %v1961_v9, %v1945_v26  ;;  %v1180_v13 = vadd.f32 %v5097_v41, %v1148_v6  ;;  %v1963_v21 = vmul.f32 %v4573_v20, %v5098_v15  ;;  %v5108_v6 = vld [vmem:[#allocation36_spill] sm:$0xff]  ;;  %v5112_v41 = vld [vmem:[#allocation38_spill] sm:$0xff] }
 0x23d   :  { %v4729_v25 = vpop.eup %3029  ;;  %v1578_v34 = vmul.f32 %v5099_v3, %v1179_v50  ;;  %v1964_v33 = vmul.f32 %v4618_v49, %v5100_v36  ;;  %v1149_v44 = vmul.f32 %v5102_v57, %v5101_v38  ;;  %v1150_v53 = vmul.f32 %v5104_v52, %v5103_v12  ;;  %v5106_v49 = vld [vmem:[#allocation19_spill] sm:$0xff]  ;;  %v5109_v46 = vld [vmem:[#allocation96_spill] sm:$0xff]  ;;  %v5114_v57 = vld [vmem:[#allocation50_spill] sm:$0xff] }
 0x23e   :  { %v4738_v60 = vpop.eup %3031  ;;  %v1922_v9 = vmul.f32 %v4729_v25, %v4595_v28  ;;  %v1978_v30 = vadd.f32 %v1962_v56, %v1946_v27  ;;  %v2009_v20 = vmul.f32 %v4603_v35, %v1977_v55  ;;  %v1579_v37 = vmul.f32 %v5105_v62, %v1180_v13  ;;  %v5111_v27 = vld [vmem:[#allocation97_spill] sm:$0xff]  ;;  %v5113_v13 = vld [vmem:[#allocation39_spill] sm:$0xff] }
 0x23f   :  { %v4744_v31 = vpop.eup %3033  ;;  %v1610_v32 = vadd.f32 %v1594_v16, %v1578_v34  ;;  %v1181_v26 = vadd.f32 %v5106_v49, %v1149_v44  ;;  %v1182_v45 = vadd.f32 %v5107_v22, %v1150_v53  ;;  %v1596_v50 = vmul.f32 %v5109_v46, %v5108_v6  ;;  %v5110_v16 = vld [vmem:[#allocation95_spill] sm:$0xff]  ;;  %v5121_v6 = vld [vmem:[#allocation40_spill] sm:$0xff] }
 0x240   :  { %v4750_v29 = vpop.eup %3035  ;;  %v1938_v4 = vadd.f32 %v4738_v60, %v1922_v9  ;;  %v1923_v28 = vmul.f32 %v4744_v31, %v4646_v17  ;;  %v2010_v35 = vmul.f32 %v4643_v23, %v1978_v30  ;;  %v1611_v56 = vadd.f32 %v1595_v19, %v1579_v37  ;;  %v5115_v53 = vld [vmem:[#allocation51_spill] sm:$0xff]  ;;  %v5116_v30 = vld [vmem:[#allocation72_spill] sm:$0xff] }
 0x241   :  { %v1947_v39 = vmul.f32 %v4570_v2, %v1610_v32  ;;  %v1580_v59 = vmul.f32 %v5110_v16, %v1181_v26  ;;  %v1581_v55 = vmul.f32 %v5111_v27, %v1182_v45  ;;  %v1597_v15 = vmul.f32 %v5113_v13, %v5112_v41  ;;  %v5119_v32 = vld [vmem:[#allocation26_spill] sm:$0xff]  ;;  %v5122_v46 = vld [vmem:[#allocation99_spill] sm:$0xff] }
 0x242   :  { %v3038_v3 = vpop.eup %3037  ;;  %v1571_v34 = vadd.f32 %v4651_v8, %v4659_v18  ;;  %3049 = vrcp.f32 %v1938_v4  ;;  %v2023_v36 = vpack.c.bf16 %v2010_v35, %v2009_v20  ;;  %v1948_v17 = vmul.f32 %v4613_v47, %v1611_v56  ;;  %v5117_v18 = vld [vmem:[#allocation68_spill] sm:$0xff]  ;;  %v5123_v35 = vld [vmem:[#allocation25_spill] sm:$0xff]  ;;  %v5124_v56 = vld [vmem:[#allocation42_spill] sm:$0xff] }
 0x243   :  { %v1979_v38 = vadd.f32 %v1963_v21, %v1947_v39  ;;  %v1612_v23 = vadd.f32 %v1596_v50, %v1580_v59  ;;  %v1613_v19 = vadd.f32 %v1597_v15, %v1581_v55  ;;  %v1965_v2 = vmul.f32 %v4628_v58, %v5114_v57  ;;  %v5118_v58 = vld [vmem:[#allocation74_spill] sm:$0xff]  ;;  %v5127_v15 = vld [vmem:[#allocation100_spill] sm:$0xff] }
 0x244   :  { %v3040_v44 = vpop.eup %3039  ;;  %v1939_v12 = vadd.f32 %v4750_v29, %v1923_v28  ;;  %2714 = vmatprep.mubr.bf16.mxu1 %v2023_v36  ;;  %v1980_v52 = vadd.f32 %v1964_v33, %v1948_v17  ;;  %v1966_v9 = vmul.f32 %v4665_v43, %v5115_v53  ;;  %v1151_v62 = vmul.f32 %v5117_v18, %v5116_v30  ;;  %v5120_v43 = vld [vmem:[#allocation21_spill] sm:$0xff]  ;;  %v5126_v55 = vld [vmem:[#allocation98_spill] sm:$0xff]  ;;  %v5128_v36 = vld [vmem:[#allocation52_spill] sm:$0xff] }
 0x245   :  { %v4771_v20 = vpop.eup %3041  ;;  %v2011_v47 = vmul.f32 %v4655_v51, %v1979_v38  ;;  %v1949_v21 = vmul.f32 %v4624_v10, %v1612_v23  ;;  %v1950_v37 = vmul.f32 %v4663_v14, %v1613_v19  ;;  %v1152_v49 = vmul.f32 %v5119_v32, %v5118_v58  ;;  %v5125_v14 = vld [vmem:[#allocation101_spill] sm:$0xff]  ;;  %v5130_v19 = vld [vmem:[#allocation87_spill] sm:$0xff]  ;;  %v5138_v32 = vld [vmem:[#allocation46_spill] sm:$0xff] }
 0x246   :  { %v3044_v26 = vpop.eup %3043  ;;  %v1924_v33 = vmul.f32 %v4771_v20, %v1571_v34  ;;  %v2012_v22 = vmul.f32 %v4704_v48, %v1980_v52  ;;  %v1183_v45 = vadd.f32 %v5120_v43, %v1151_v62  ;;  %v1598_v50 = vmul.f32 %v5122_v46, %v5121_v6  ;;  %v5129_v23 = vld [vmem:[#allocation77_spill] sm:$0xff]  ;;  %v5140_v43 = vld [vmem:[#allocation91_spill] sm:$0xff]  ;;  %v5141_v6 = vld [vmem:[#allocation86_spill] sm:$0xff] }
 0x247   :  { %v3046_v4 = vpop.eup %3045  ;;  %v1981_v28 = vadd.f32 %v1965_v2, %v1949_v21  ;;  %v1982_v51 = vadd.f32 %v1966_v9, %v1950_v37  ;;  %v1184_v10 = vadd.f32 %v5123_v35, %v1152_v49  ;;  %v1599_v39 = vmul.f32 %v5125_v14, %v5124_v56  ;;  %v5131_v2 = vld [vmem:[#allocation82_spill] sm:$0xff]  ;;  %v5133_v30 = vld [vmem:[#allocation53_spill] sm:$0xff]  ;;  %v5144_v35 = vld [vmem:[#allocation103_spill] sm:$0xff] }
 0x248   :  { %v3048_v16 = vpop.eup %3047  ;;  %3051 = vrcp.f32 %v1939_v12  ;;  %v1940_v59 = vadd.f32 %v3046_v4, %v1924_v33  ;;  %v2024_v27 = vpack.c.bf16 %v2012_v22, %v2011_v47  ;;  %v1582_v41 = vmul.f32 %v5126_v55, %v1183_v45  ;;  %v5132_v12 = vld [vmem:[#allocation90_spill] sm:$0xff]  ;;  %v5135_v18 = vld [vmem:[#allocation41_spill] sm:$0xff]  ;;  %v5139_v22 = vld [vmem:[#allocation83_spill] sm:$0xff] }
 0x249   :  { %v2013_v48 = vmul.f32 %v4715_v40, %v1981_v28  ;;  %v2014_v13 = vmul.f32 %v3038_v3, %v1982_v51  ;;  %v1583_v34 = vmul.f32 %v5127_v15, %v1184_v10  ;;  %v1967_v17 = vmul.f32 %v4676_v63, %v5128_v36  ;;  %v5134_v3 = vld [vmem:[#allocation44_spill] sm:$0xff]  ;;  %v5136_v63 = vld [vmem:[#allocation27_spill] sm:$0xff]  ;;  %v5137_v37 = vld [vmem:[#allocation29_spill] sm:$0xff] }
 0x24a   :  { %3053 = vrcp.f32 %v1940_v59  ;;  %2715 = vmatmul.mubr.bf16.gmra.mxu1 %v2024_v27  ;;  %v1614_v38 = vadd.f32 %v1598_v50, %v1582_v41  ;;  %v1153_v57 = vmul.f32 %v5130_v19, %v5129_v23  ;;  %v1154_v52 = vmul.f32 %v5132_v12, %v5131_v2  ;;  %v1361_v50 = vpop.f32.mrf.mxu1  ;;  %v5143_v51 = vld [vmem:[#allocation102_spill] sm:$0xff]  ;;  %v5145_v56 = vld [vmem:[#allocation48_spill] sm:$0xff]  ;;  %v5146_v59 = vld [vmem:[#allocation31_spill] sm:$0xff] }
 0x24b   :  { %v2025_v53 = vpack.c.bf16 %v2014_v13, %v2013_v48  ;;  %v1615_v9 = vadd.f32 %v1599_v39, %v1583_v34  ;;  %v1968_v40 = vmul.f32 %v4687_v5, %v5133_v30  ;;  %v1600_v62 = vmul.f32 %v5135_v18, %v5134_v3  ;;  %v5142_v5 = vld [vmem:[#allocation94_spill] sm:$0xff]  ;;  %v5149_v36 = vld [vmem:[#allocation55_spill] sm:$0xff] }
 0x24c   :  { %v1951_v47 = vmul.f32 %v4670_v0, %v1614_v38  ;;  %v1185_v21 = vadd.f32 %v5136_v63, %v1153_v57  ;;  %v1186_v58 = vadd.f32 %v5137_v37, %v1154_v52  ;;  %v1601_v49 = vmul.f32 %v4584_v7, %v5138_v32  ;;  %v5148_v15 = vld [vmem:[#allocation54_spill] sm:$0xff]  ;;  %v1730_v57 = vpop.f32.mrf.mxu0 }
 0x24d   :  { %2718 = vmatprep.mubr.bf16.mxu1 %v2025_v53  ;;  %v1952_v33 = vmul.f32 %v4683_v11, %v1615_v9  ;;  %v1155_v45 = vmul.f32 %v5140_v43, %v5139_v22  ;;  %v1156_v46 = vmul.f32 %v5142_v5, %v5141_v6  ;;  %v1602_v14 = vmul.f32 %v4608_v42, %v5145_v56  ;;  %v5147_v11 = vld [vmem:[#allocation33_spill] sm:$0xff]  ;;  %v5152_v22 = vld [vmem:[#allocation6_spill] sm:$0xff]  ;;  %v5153_v6 = vld [vmem:[#allocation3_spill] sm:$0xff] }
 0x24e   :  { %v1983_v28 = vadd.f32 %v1967_v17, %v1951_v47  ;;  %v1584_v0 = vmul.f32 %v5143_v51, %v1185_v21  ;;  %v1585_v10 = vmul.f32 %v5144_v35, %v1186_v58  ;;  %v1603_v41 = vmul.f32 %v4651_v8, %v1361_v50  ;;  %v5150_v8 = vld [vmem:[#allocation56_spill] sm:$0xff] }
 0x24f   :  { %v3050_v39 = vpop.eup %3049  ;;  %v1984_v7 = vadd.f32 %v1968_v40, %v1952_v33  ;;  %v1187_v27 = vadd.f32 %v5146_v59, %v1155_v45  ;;  %v1188_v55 = vadd.f32 %v5147_v11, %v1156_v46  ;;  %v1969_v34 = vmul.f32 %v4698_v61, %v5148_v15  ;;  %v5154_v50 = vld [vmem:[#allocation4_spill] sm:$0xff]  ;;  %v5155_v59 = vld [vmem:[#allocation9_spill] sm:$0xff]  ;;  %v5156_v11 = vld [vmem:[#allocation10_spill] sm:$0xff] }
 0x250   :  { %v1616_v48 = vadd.f32 %v1600_v62, %v1584_v0  ;;  %v1617_v13 = vadd.f32 %v1601_v49, %v1585_v10  ;;  %v1970_v17 = vmul.f32 %v4738_v60, %v5149_v36  ;;  %v2015_v38 = vmul.f32 %v3040_v44, %v1983_v28  ;;  %v5151_v49 = vld [vmem:[#allocation5_spill] sm:$0xff] }
 0x251   :  { %v2016_v23 = vmul.f32 %v3044_v26, %v1984_v7  ;;  %v1586_v42 = vmul.f32 %v4599_v24, %v1187_v27  ;;  %v1587_v19 = vmul.f32 %v4639_v1, %v1188_v55  ;;  %v1971_v52 = vmul.f32 %v4750_v29, %v5150_v8  ;;  %v5159_v8 = vld [vmem:[#allocation13_spill] sm:$0xff] }
 0x252   :  { %v1953_v2 = vmul.f32 %v4693_v54, %v1616_v48  ;;  %v1954_v12 = vmul.f32 %v4729_v25, %v1617_v13  ;;  %v1972_v30 = vmul.f32 %v3046_v4, %v1730_v57  ;;  %v2191_v21 = vstv %s4876_s5  ;;  %v5157_v48 = vld [vmem:[#allocation7_spill] sm:$0xff] }
 0x253   :  { %v2026_v53 = vpack.c.bf16 %v2016_v23, %v2015_v38  ;;  %v1618_v9 = vadd.f32 %v1602_v14, %v1586_v42  ;;  %v1619_v61 = vadd.f32 %v1603_v41, %v1587_v19 }
 0x254   :  { %v1985_v40 = vadd.f32 %v1969_v34, %v1953_v2  ;;  %v1986_v60 = vadd.f32 %v1970_v17, %v1954_v12  ;;  %v5158_v34 = vld [vmem:[#allocation8_spill] sm:$0xff] }
 0x255   :  { %v3052_v44 = vpop.eup %3051  ;;  %2719 = vmatmul.mubr.bf16.gmra.mxu1 %v2026_v53  ;;  %v1955_v24 = vmul.f32 %v4744_v31, %v1618_v9  ;;  %v1956_v1 = vmul.f32 %v4771_v20, %v1619_v61  ;;  %v5160_v53 = vld [vmem:[#allocation14_spill] sm:$0xff] }
 0x256   :  { %v2017_v26 = vmul.f32 %v3048_v16, %v1985_v40  ;;  %v2018_v3 = vmul.f32 %v3050_v39, %v1986_v60  ;;  %v5161_v40 = vld [vmem:[#allocation11_spill] sm:$0xff] }
 0x257   :  { %v3054_v54 = vpop.eup %3053  ;;  %v1987_v18 = vadd.f32 %v1971_v52, %v1955_v24  ;;  %v1988_v25 = vadd.f32 %v1972_v30, %v1956_v1  ;;  %v5162_v24 = vld [vmem:[#allocation12_spill] sm:$0xff] }
 0x258   :  { %v2027_v62 = vpack.c.bf16 %v2018_v3, %v2017_v26 }
 0x259   :  { %v2019_v47 = vmul.f32 %v3052_v44, %v1987_v18  ;;  %v2020_v29 = vmul.f32 %v3054_v54, %v1988_v25 }
 0x25a   :  { %2722 = vmatprep.mubr.bf16.mxu1 %v2027_v62 }
 0x25b   :  { %v2028_v63 = vpack.c.bf16 %v2020_v29, %v2019_v47  ;;  %v5163_v29 = vld [vmem:[#allocation17_spill] sm:$0xff] }
 0x25d   :  { %2723 = vmatmul.mubr.bf16.gmra.mxu1 %v2028_v63 }
 0x2f6   :  { %v2712_v4 = vpop.f32.mrf.mxu1 }
 0x2f7   :  { %v2194_v31 = vmul.f32 %v2712_v4, %v2191_v21  ;;  %v5164_v4 = vld [vmem:[#allocation18_spill] sm:$0xff] }
 0x2f8   :  { %v2127_v37 = vpop.f32.mrf.mxu1 }
 0x2f9   :  { %v2192_v20 = vmul.f32 %v2191_v21, %v2127_v37  ;;  %v2210_v33 = vadd.f32 %v2194_v31, %v5151_v49 }
 0x2fa   :  { %v2713_v58 = vpop.f32.mrf.mxu1 }
 0x2fb   :  { %v2195_v16 = vmul.f32 %v2713_v58, %v2191_v21  ;;  %v2208_v5 = vadd.f32 %v2192_v20, %v5153_v6  ;;  %v5165_v58 = vld [vmem:[#allocation15_spill] sm:$0xff] }
 0x2fc   :  { %v2130_v32 = vpop.f32.mrf.mxu1 }
 0x2fd   :  { %v2211_v43 = vadd.f32 %v2195_v16, %v5152_v22  ;;  %v2193_v45 = vmul.f32 %v2191_v21, %v2130_v32  ;;  %v5166_v32 = vld [vmem:[#allocation16_spill] sm:$0xff] }
 0x2ff   :  { %v2560_v46 = vpack.c.bf16 %v2211_v43, %v2210_v33  ;;  %v2209_v28 = vadd.f32 %v2193_v45, %v5154_v50 }
 0x301   :  { %2623 = vst [vmem:[%s4877_s6 + $0x8] sm:$0xff] %v2560_v46   ;;  %v2555_v51 = vpack.c.bf16 %v2209_v28, %v2208_v5 }
 0x303   :  { %2556 = vst [vmem:[%s4877_s6] sm:$0xff] %v2555_v51  }
 0x30a   :  { %v2716_v0 = vpop.f32.mrf.mxu1 }
 0x30b   :  { %v2198_v10 = vmul.f32 %v2716_v0, %v2191_v21 }
 0x30c   :  { %v2143_v35 = vpop.f32.mrf.mxu1 }
 0x30d   :  { %v2196_v14 = vmul.f32 %v2191_v21, %v2143_v35  ;;  %v2214_v27 = vadd.f32 %v2198_v10, %v5155_v59 }
 0x30e   :  { %v2717_v56 = vpop.f32.mrf.mxu1 }
 0x30f   :  { %v2199_v39 = vmul.f32 %v2717_v56, %v2191_v21  ;;  %v2212_v13 = vadd.f32 %v2196_v14, %v5157_v48 }
 0x310   :  { %v2146_v7 = vpop.f32.mrf.mxu1 }
 0x311   :  { %v2215_v55 = vadd.f32 %v2199_v39, %v5156_v11  ;;  %v2197_v41 = vmul.f32 %v2191_v21, %v2146_v7 }
 0x313   :  { %v2570_v15 = vpack.c.bf16 %v2215_v55, %v2214_v27  ;;  %v2213_v36 = vadd.f32 %v2197_v41, %v5158_v34 }
 0x315   :  { %2625 = vst [vmem:[%s4877_s6 + $0x18] sm:$0xff] %v2570_v15   ;;  %v2565_v17 = vpack.c.bf16 %v2213_v36, %v2212_v13  ;;  %v2720_v38 = vpop.f32.mrf.mxu1 }
 0x316   :  { %v2202_v42 = vmul.f32 %v2720_v38, %v2191_v21 }
 0x317   :  { %2624 = vst [vmem:[%s4877_s6 + $0x10] sm:$0xff] %v2565_v17   ;;  %v2159_v23 = vpop.f32.mrf.mxu1 }
 0x318   :  { %v2200_v57 = vmul.f32 %v2191_v21, %v2159_v23  ;;  %v2218_v52 = vadd.f32 %v2202_v42, %v5159_v8 }
 0x319   :  { %v2721_v19 = vpop.f32.mrf.mxu1 }
 0x31a   :  { %v2203_v2 = vmul.f32 %v2721_v19, %v2191_v21  ;;  %v2216_v60 = vadd.f32 %v2200_v57, %v5161_v40 }
 0x31b   :  { %v2162_v12 = vpop.f32.mrf.mxu1 }
 0x31c   :  { %v2219_v9 = vadd.f32 %v2203_v2, %v5160_v53  ;;  %v2201_v61 = vmul.f32 %v2191_v21, %v2162_v12 }
 0x31d   :  { %v2724_v30 = vpop.f32.mrf.mxu1 }
 0x31e   :  { %v2580_v44 = vpack.c.bf16 %v2219_v9, %v2218_v52  ;;  %v2217_v1 = vadd.f32 %v2201_v61, %v5162_v24  ;;  %v2206_v54 = vmul.f32 %v2724_v30, %v2191_v21 }
 0x31f   :  { %v2175_v26 = vpop.f32.mrf.mxu1 }
 0x320   :  { %2627 = vst [vmem:[%s4877_s6 + $0x28] sm:$0xff] %v2580_v44   ;;  %v2575_v3 = vpack.c.bf16 %v2217_v1, %v2216_v60  ;;  %v2204_v25 = vmul.f32 %v2191_v21, %v2175_v26  ;;  %v2222_v63 = vadd.f32 %v2206_v54, %v5163_v29 }
 0x321   :  { %v2725_v18 = vpop.f32.mrf.mxu1 }
 0x322   :  { %2626 = vst [vmem:[%s4877_s6 + $0x20] sm:$0xff] %v2575_v3   ;;  %v2207_v62 = vmul.f32 %v2725_v18, %v2191_v21  ;;  %v2220_v20 = vadd.f32 %v2204_v25, %v5165_v58 }
 0x323   :  { %v2178_v47 = vpop.f32.mrf.mxu1 }
 0x324   :  { %v2223_v37 = vadd.f32 %v2207_v62, %v5164_v4  ;;  %v2205_v31 = vmul.f32 %v2191_v21, %v2178_v47 }
 0x326   :  { %v2590_v16 = vpack.c.bf16 %v2223_v37, %v2222_v63  ;;  %v2221_v49 = vadd.f32 %v2205_v31, %v5166_v32 }
 0x328   :  { %2629 = vst [vmem:[%s4877_s6 + $0x38] sm:$0xff] %v2590_v16   ;;  %v2585_v33 = vpack.c.bf16 %v2221_v49, %v2220_v20 }
 0x32a   :  { %2628 = vst [vmem:[%s4877_s6 + $0x30] sm:$0xff] %v2585_v33  }

</bundles_post_ra>
